<compile_context>
chip_gen: v6e
topology: v6e:2x2x1
jax: 0.10.0
libtpu: 0.0.40
codegen_flags: <defaults>
</compile_context>

<pallas_src>
import jax
import jax.numpy as jnp
from jax.experimental import pallas as pl
from jax.experimental.pallas import tpu as pltpu


def _round_up(x, m):
    return (x + m - 1) // m * m


# ---------------------------------------------------------------------------
# Kernels
# ---------------------------------------------------------------------------
def conv_relu_pool_kernel(p_ref, w_ref, b_ref, o_ref):
    """Fused conv(im2col matmul) + bias + ReLU + 2x2 max-pool.

    p_ref : (4, Mt, K)   im2col patches (bf16), leading axis = pool quadrant
    w_ref : (K, 128)     conv weight, (ky,kx,cin)-flattened, Cout zero-padded
    b_ref : (1, 128)     conv bias (f32, zero-padded)
    o_ref : (Mt, 128)    pooled activations (bf16, lane-dense)

    max-pool commutes with bias+ReLU (both monotone), so we max the raw
    accumulators across the 4 quadrants and apply bias+ReLU once.
    """
    w = w_ref[...]
    acc = jnp.dot(p_ref[0], w, preferred_element_type=jnp.float32)
    for q in range(1, 4):
        acc = jnp.maximum(
            acc, jnp.dot(p_ref[q], w, preferred_element_type=jnp.float32))
    o_ref[...] = jnp.maximum(acc + b_ref[...], 0.0).astype(o_ref.dtype)


def mlp_kernel(x_ref, w1_ref, b1_ref, w2_ref, b2_ref, o_ref):
    """fc1 + ReLU + fc2.  All channel dims zero-padded to 128 lanes."""
    h = jnp.dot(x_ref[...], w1_ref[...], preferred_element_type=jnp.float32)
    h = jnp.maximum(h + b1_ref[...], 0.0).astype(w2_ref.dtype)
    o = jnp.dot(h, w2_ref[...], preferred_element_type=jnp.float32) + b2_ref[...]
    o_ref[...] = o.astype(o_ref.dtype)


# ---------------------------------------------------------------------------
# Pallas wrappers
# ---------------------------------------------------------------------------
def conv_relu_pool(patches, w_mat, bias):
    """patches (4, M, K) bf16 -> pooled activations (M, 128) bf16."""
    q, M, K = patches.shape
    assert q == 4
    Cp = w_mat.shape[1]
    Mt = min(1024, _round_up(M, 8))          # big-M tile, VMEM-safe on v7x too
    Mp = _round_up(M, Mt)
    if Mp != M:
        patches = jnp.pad(patches, ((0, 0), (0, Mp - M), (0, 0)))
    out = pl.pallas_call(
        conv_relu_pool_kernel,
        out_shape=jax.ShapeDtypeStruct((Mp, Cp), jnp.bfloat16),
        grid_spec=pltpu.PrefetchScalarGridSpec(
            num_scalar_prefetch=0,
            grid=(Mp // Mt,),
            in_specs=[
                pl.BlockSpec((4, Mt, K), lambda i: (0, i, 0)),
                pl.BlockSpec((K, Cp), lambda i: (0, 0)),
                pl.BlockSpec((1, Cp), lambda i: (0, 0)),
            ],
            out_specs=pl.BlockSpec((Mt, Cp), lambda i: (i, 0)),
        ),
        compiler_params=pltpu.CompilerParams(dimension_semantics=("parallel",)),
    )(patches, w_mat, bias)
    return out[:M]


def mlp(x, w1, b1, w2, b2):
    """x (B, D) bf16 -> logits (B, 128) f32 (caller slices to 10)."""
    B, D = x.shape
    H = w1.shape[1]
    O = w2.shape[1]
    Bt = min(256, _round_up(B, 8))
    Bp = _round_up(B, Bt)
    if Bp != B:
        x = jnp.pad(x, ((0, Bp - B), (0, 0)))
    out = pl.pallas_call(
        mlp_kernel,
        out_shape=jax.ShapeDtypeStruct((Bp, O), jnp.float32),
        grid_spec=pltpu.PrefetchScalarGridSpec(
            num_scalar_prefetch=0,
            grid=(Bp // Bt,),
            in_specs=[
                pl.BlockSpec((Bt, D), lambda i: (i, 0)),
                pl.BlockSpec((D, H), lambda i: (0, 0)),   # fc1 weight resident
                pl.BlockSpec((1, H), lambda i: (0, 0)),
                pl.BlockSpec((H, O), lambda i: (0, 0)),
                pl.BlockSpec((1, O), lambda i: (0, 0)),
            ],
            out_specs=pl.BlockSpec((Bt, O), lambda i: (i, 0)),
        ),
        compiler_params=pltpu.CompilerParams(dimension_semantics=("parallel",)),
    )(x, w1, b1, w2, b2)
    return out[:B]


# ---------------------------------------------------------------------------
# JAX glue: im2col with the 2x2 pool quadrant as a leading axis
# ---------------------------------------------------------------------------
def im2col_pool_quadrants(x_nhwc, ksize=3, pad=1):
    # TODO(synk): fuse this im2col (pad/stack/transpose) into the conv kernel
    # via in-kernel shifted slices to avoid the 9x-expanded HBM tensor.
    B, H, W, C = x_nhwc.shape
    xp = jnp.pad(x_nhwc, ((0, 0), (pad, pad), (pad, pad), (0, 0)))
    rows = []
    for ky in range(ksize):
        cols = [xp[:, ky:ky + H, kx:kx + W, :] for kx in range(ksize)]
        rows.append(jnp.stack(cols, axis=3))            # (B, H, W, kx, C)
    patches = jnp.stack(rows, axis=3)                   # (B, H, W, ky, kx, C)
    K = ksize * ksize * C
    patches = patches.reshape(B, H, W, K)
    Hp, Wp = H // 2, W // 2
    patches = patches.reshape(B, Hp, 2, Wp, 2, K)
    patches = patches.transpose(2, 4, 0, 1, 3, 5)       # (dy, dx, B, Hp, Wp, K)
    return patches.reshape(4, B * Hp * Wp, K)


# ---------------------------------------------------------------------------
# Parameters (random init; layout documented for loading PyTorch weights)
# ---------------------------------------------------------------------------
def init_params(key):
    ks = jax.random.split(key, 8)
    s = 0.05
    f32, bf16 = jnp.float32, jnp.bfloat16

    def pad_lanes(a, n=128):
        return jnp.pad(a, ((0, 0),) * (a.ndim - 1) + ((0, n - a.shape[-1]),))

    # conv1: 1 -> 32, 3x3, rows flattened (ky,kx,cin), Cout zero-padded to 128
    cw1 = (jax.random.normal(ks[0], (3, 3, 1, 32), f32) * s).reshape(9, 32)
    cb1 = jax.random.normal(ks[1], (1, 32), f32) * s
    # conv2: 32 -> 64
    cw2 = (jax.random.normal(ks[2], (3, 3, 32, 64), f32) * s).reshape(288, 64)
    cb2 = jax.random.normal(ks[3], (1, 64), f32) * s
    # fc1: rows in (h, w, c_padded) order (= NHWC flatten of conv2 output with
    # channels padded to 128); rows for c >= 64 and output cols >= 64 are zero.
    # To load a PyTorch checkpoint:
    #   fw1[h*7*128 + w*128 + c, o] = fc1.weight[o, c*49 + h*7 + w]  (c<64, o<64)
    fw1_real = jax.random.normal(ks[4], (7, 7, 64, 64), f32) * s
    fw1 = jnp.pad(fw1_real, ((0, 0), (0, 0), (0, 64), (0, 64)))
    fw1 = fw1.reshape(7 * 7 * 128, 128)
    fb1 = jax.random.normal(ks[5], (1, 64), f32) * s
    # fc2: 64 -> 10; input rows padded to 128 (padded hidden units are exactly
    # zero after ReLU), output columns padded to 128 (sliced off post-kernel).
    fw2_real = jax.random.normal(ks[6], (64, 10), f32) * s
    fw2 = jnp.pad(fw2_real, ((0, 64), (0, 118)))
    fb2 = jax.random.normal(ks[7], (1, 10), f32) * s

    return {
        "cw1": pad_lanes(cw1).astype(bf16), "cb1": pad_lanes(cb1),
        "cw2": pad_lanes(cw2).astype(bf16), "cb2": pad_lanes(cb2),
        "fw1": fw1.astype(bf16),            "fb1": pad_lanes(fb1),
        "fw2": fw2.astype(bf16),            "fb2": pad_lanes(fb2),
    }


# ---------------------------------------------------------------------------
# Forward pass (matches PyTorch module semantics)
# ---------------------------------------------------------------------------
def forward(x_nchw, params):
    B = x_nchw.shape[0]
    x = jnp.transpose(x_nchw, (0, 2, 3, 1)).astype(jnp.bfloat16)   # NCHW -> NHWC

    # conv1 + ReLU + 2x2 maxpool : (B,28,28,1) -> (B,14,14,32) (padded to 128 ch)
    p1 = im2col_pool_quadrants(x)                                  # (4, B*196, 9)
    y1 = conv_relu_pool(p1, params["cw1"], params["cb1"])          # (B*196, 128)
    y1 = y1.reshape(B, 14, 14, 128)[..., :32]                      # drop lane padding

    # conv2 + ReLU + 2x2 maxpool : -> (B,7,7,64) (kept padded to 128 ch)
    p2 = im2col_pool_quadrants(y1)                                 # (4, B*49, 288)
    y2 = conv_relu_pool(p2, params["cw2"], params["cb2"])          # (B*49, 128)

    # NHWC(-padded) flatten; the (C,H,W) transpose is folded into fw1's rows.
    flat = y2.reshape(B, 7 * 7 * 128)
    logits = mlp(flat, params["fw1"], params["fb1"],
                 params["fw2"], params["fb2"])                     # (B, 128) f32
    return logits[:, :10]


if __name__ == "__main__":
    key = jax.random.PRNGKey(0)
    kx, kp = jax.random.split(key)
    # MNIST-shaped input (batch=2); 28x28 is required by fc1 = Linear(64*7*7, 64)
    x = jax.random.normal(kx, (2, 1, 28, 28), jnp.float32)
    params = init_params(kp)

    out = jax.jit(forward)(x, params)
    out = jax.block_until_ready(out)
    assert out.shape == (2, 10), out.shape
    assert out.dtype == jnp.float32
    print("KERNEL_OK")
</pallas_src>

<mosaic_0001>
module attributes {stable_mosaic.version = 11 : i64} {
  func.func @conv_relu_pool_kernel(%arg0: i32, %arg1: memref<4x392x9xbf16, #tpu.memory_space<vmem>>, %arg2: memref<9x128xbf16, #tpu.memory_space<vmem>>, %arg3: memref<1x128xf32, #tpu.memory_space<vmem>>, %arg4: memref<392x128xbf16, #tpu.memory_space<vmem>>) attributes {dimension_semantics = [#tpu.dimension_semantics<parallel>], iteration_bounds = array<i64: 1>, scalar_prefetch = 0 : i64, scratch_operands = 0 : i64, tpu.core_type = #tpu.core_type<tc>, window_params = [{transform_indices = @transform_0, window_bounds = array<i64: 4, 392, 9>}, {pipeline_mode = #tpu.pipeline_mode<synchronous>, transform_indices = @transform_1, window_bounds = array<i64: 9, 128>}, {pipeline_mode = #tpu.pipeline_mode<synchronous>, transform_indices = @transform_2, window_bounds = array<i64: 1, 128>}, {transform_indices = @transform_3, window_bounds = array<i64: 392, 128>}]} {
    %c0 = arith.constant 0 : index
    %c0_0 = arith.constant 0 : index
    %0 = vector.load %arg2[%c0, %c0_0] : memref<9x128xbf16, #tpu.memory_space<vmem>>, vector<9x128xbf16>
    %c0_1 = arith.constant 0 : index
    %c0_2 = arith.constant 0 : index
    %c0_3 = arith.constant 0 : index
    %1 = vector.load %arg1[%c0_1, %c0_2, %c0_3] : memref<4x392x9xbf16, #tpu.memory_space<vmem>>, vector<1x392x9xbf16>
    %2 = vector.shape_cast %1 : vector<1x392x9xbf16> to vector<392x9xbf16>
    %cst = arith.constant dense<0.000000e+00> : vector<392x128xf32>
    %3 = tpu.matmul %2, %0, %cst {dimension_numbers = #tpu.dot_dimension_numbers<[1], [0], [0], [1], [0, 0, 1, 1], [], []>} : vector<392x9xbf16>, vector<9x128xbf16>, vector<392x128xf32> -> vector<392x128xf32>
    %c1 = arith.constant 1 : index
    %c0_4 = arith.constant 0 : index
    %c0_5 = arith.constant 0 : index
    %4 = vector.load %arg1[%c1, %c0_4, %c0_5] : memref<4x392x9xbf16, #tpu.memory_space<vmem>>, vector<1x392x9xbf16>
    %5 = vector.shape_cast %4 : vector<1x392x9xbf16> to vector<392x9xbf16>
    %cst_6 = arith.constant dense<0.000000e+00> : vector<392x128xf32>
    %6 = tpu.matmul %5, %0, %cst_6 {dimension_numbers = #tpu.dot_dimension_numbers<[1], [0], [0], [1], [0, 0, 1, 1], [], []>} : vector<392x9xbf16>, vector<9x128xbf16>, vector<392x128xf32> -> vector<392x128xf32>
    %7 = arith.maximumf %3, %6 : vector<392x128xf32>
    %c2 = arith.constant 2 : index
    %c0_7 = arith.constant 0 : index
    %c0_8 = arith.constant 0 : index
    %8 = vector.load %arg1[%c2, %c0_7, %c0_8] : memref<4x392x9xbf16, #tpu.memory_space<vmem>>, vector<1x392x9xbf16>
    %9 = vector.shape_cast %8 : vector<1x392x9xbf16> to vector<392x9xbf16>
    %cst_9 = arith.constant dense<0.000000e+00> : vector<392x128xf32>
    %10 = tpu.matmul %9, %0, %cst_9 {dimension_numbers = #tpu.dot_dimension_numbers<[1], [0], [0], [1], [0, 0, 1, 1], [], []>} : vector<392x9xbf16>, vector<9x128xbf16>, vector<392x128xf32> -> vector<392x128xf32>
    %11 = arith.maximumf %7, %10 : vector<392x128xf32>
    %c3 = arith.constant 3 : index
    %c0_10 = arith.constant 0 : index
    %c0_11 = arith.constant 0 : index
    %12 = vector.load %arg1[%c3, %c0_10, %c0_11] : memref<4x392x9xbf16, #tpu.memory_space<vmem>>, vector<1x392x9xbf16>
    %13 = vector.shape_cast %12 : vector<1x392x9xbf16> to vector<392x9xbf16>
    %cst_12 = arith.constant dense<0.000000e+00> : vector<392x128xf32>
    %14 = tpu.matmul %13, %0, %cst_12 {dimension_numbers = #tpu.dot_dimension_numbers<[1], [0], [0], [1], [0, 0, 1, 1], [], []>} : vector<392x9xbf16>, vector<9x128xbf16>, vector<392x128xf32> -> vector<392x128xf32>
    %15 = arith.maximumf %11, %14 : vector<392x128xf32>
    %c0_13 = arith.constant 0 : index
    %c0_14 = arith.constant 0 : index
    %16 = vector.load %arg3[%c0_13, %c0_14] : memref<1x128xf32, #tpu.memory_space<vmem>>, vector<1x128xf32>
    %17 = vector.broadcast %16 : vector<1x128xf32> to vector<392x128xf32>
    %18 = arith.addf %15, %17 : vector<392x128xf32>
    %cst_15 = arith.constant 0.000000e+00 : f32
    %19 = vector.broadcast %cst_15 : f32 to vector<392x128xf32>
    %20 = arith.maximumf %18, %19 : vector<392x128xf32>
    %21 = arith.truncf %20 : vector<392x128xf32> to vector<392x128xbf16>
    %c0_16 = arith.constant 0 : index
    %c0_17 = arith.constant 0 : index
    %22 = vector.load %arg4[%c0_16, %c0_17] : memref<392x128xbf16, #tpu.memory_space<vmem>>, vector<392x128xbf16>
    tpu.vector_store %arg4[%c0_16, %c0_17], %21 {strides = array<i32>} : memref<392x128xbf16, #tpu.memory_space<vmem>>, vector<392x128xbf16>,
    return
  }
  func.func @transform_0(%arg0: i32) -> (i32, i32, i32) {
    %c0_i32 = arith.constant 0 : i32
    %c0_i32_0 = arith.constant 0 : i32
    %c0_i32_1 = arith.constant 0 : i32
    return %c0_i32, %arg0, %c0_i32_0 : i32, i32, i32
  }
  func.func @transform_1(%arg0: i32) -> (i32, i32) {
    %c0_i32 = arith.constant 0 : i32
    %c0_i32_0 = arith.constant 0 : i32
    %c0_i32_1 = arith.constant 0 : i32
    return %c0_i32, %c0_i32_0 : i32, i32
  }
  func.func @transform_2(%arg0: i32) -> (i32, i32) {
    %c0_i32 = arith.constant 0 : i32
    %c0_i32_0 = arith.constant 0 : i32
    %c0_i32_1 = arith.constant 0 : i32
    return %c0_i32, %c0_i32_0 : i32, i32
  }
  func.func @transform_3(%arg0: i32) -> (i32, i32) {
    %c0_i32 = arith.constant 0 : i32
    %c0_i32_0 = arith.constant 0 : i32
    return %arg0, %c0_i32 : i32, i32
  }
}

module attributes {stable_mosaic.version = 11 : i64} {
  func.func @conv_relu_pool_kernel(%arg0: i32, %arg1: memref<4x104x288xbf16, #tpu.memory_space<vmem>>, %arg2: memref<288x128xbf16, #tpu.memory_space<vmem>>, %arg3: memref<1x128xf32, #tpu.memory_space<vmem>>, %arg4: memref<104x128xbf16, #tpu.memory_space<vmem>>) attributes {dimension_semantics = [#tpu.dimension_semantics<parallel>], iteration_bounds = array<i64: 1>, scalar_prefetch = 0 : i64, scratch_operands = 0 : i64, tpu.core_type = #tpu.core_type<tc>, window_params = [{transform_indices = @transform_0, window_bounds = array<i64: 4, 104, 288>}, {pipeline_mode = #tpu.pipeline_mode<synchronous>, transform_indices = @transform_1, window_bounds = array<i64: 288, 128>}, {pipeline_mode = #tpu.pipeline_mode<synchronous>, transform_indices = @transform_2, window_bounds = array<i64: 1, 128>}, {transform_indices = @transform_3, window_bounds = array<i64: 104, 128>}]} {
    %c0 = arith.constant 0 : index
    %c0_0 = arith.constant 0 : index
    %0 = vector.load %arg2[%c0, %c0_0] : memref<288x128xbf16, #tpu.memory_space<vmem>>, vector<288x128xbf16>
    %c0_1 = arith.constant 0 : index
    %c0_2 = arith.constant 0 : index
    %c0_3 = arith.constant 0 : index
    %1 = vector.load %arg1[%c0_1, %c0_2, %c0_3] : memref<4x104x288xbf16, #tpu.memory_space<vmem>>, vector<1x104x288xbf16>
    %2 = vector.shape_cast %1 : vector<1x104x288xbf16> to vector<104x288xbf16>
    %cst = arith.constant dense<0.000000e+00> : vector<104x128xf32>
    %3 = tpu.matmul %2, %0, %cst {dimension_numbers = #tpu.dot_dimension_numbers<[1], [0], [0], [1], [0, 0, 1, 1], [], []>} : vector<104x288xbf16>, vector<288x128xbf16>, vector<104x128xf32> -> vector<104x128xf32>
    %c1 = arith.constant 1 : index
    %c0_4 = arith.constant 0 : index
    %c0_5 = arith.constant 0 : index
    %4 = vector.load %arg1[%c1, %c0_4, %c0_5] : memref<4x104x288xbf16, #tpu.memory_space<vmem>>, vector<1x104x288xbf16>
    %5 = vector.shape_cast %4 : vector<1x104x288xbf16> to vector<104x288xbf16>
    %cst_6 = arith.constant dense<0.000000e+00> : vector<104x128xf32>
    %6 = tpu.matmul %5, %0, %cst_6 {dimension_numbers = #tpu.dot_dimension_numbers<[1], [0], [0], [1], [0, 0, 1, 1], [], []>} : vector<104x288xbf16>, vector<288x128xbf16>, vector<104x128xf32> -> vector<104x128xf32>
    %7 = arith.maximumf %3, %6 : vector<104x128xf32>
    %c2 = arith.constant 2 : index
    %c0_7 = arith.constant 0 : index
    %c0_8 = arith.constant 0 : index
    %8 = vector.load %arg1[%c2, %c0_7, %c0_8] : memref<4x104x288xbf16, #tpu.memory_space<vmem>>, vector<1x104x288xbf16>
    %9 = vector.shape_cast %8 : vector<1x104x288xbf16> to vector<104x288xbf16>
    %cst_9 = arith.constant dense<0.000000e+00> : vector<104x128xf32>
    %10 = tpu.matmul %9, %0, %cst_9 {dimension_numbers = #tpu.dot_dimension_numbers<[1], [0], [0], [1], [0, 0, 1, 1], [], []>} : vector<104x288xbf16>, vector<288x128xbf16>, vector<104x128xf32> -> vector<104x128xf32>
    %11 = arith.maximumf %7, %10 : vector<104x128xf32>
    %c3 = arith.constant 3 : index
    %c0_10 = arith.constant 0 : index
    %c0_11 = arith.constant 0 : index
    %12 = vector.load %arg1[%c3, %c0_10, %c0_11] : memref<4x104x288xbf16, #tpu.memory_space<vmem>>, vector<1x104x288xbf16>
    %13 = vector.shape_cast %12 : vector<1x104x288xbf16> to vector<104x288xbf16>
    %cst_12 = arith.constant dense<0.000000e+00> : vector<104x128xf32>
    %14 = tpu.matmul %13, %0, %cst_12 {dimension_numbers = #tpu.dot_dimension_numbers<[1], [0], [0], [1], [0, 0, 1, 1], [], []>} : vector<104x288xbf16>, vector<288x128xbf16>, vector<104x128xf32> -> vector<104x128xf32>
    %15 = arith.maximumf %11, %14 : vector<104x128xf32>
    %c0_13 = arith.constant 0 : index
    %c0_14 = arith.constant 0 : index
    %16 = vector.load %arg3[%c0_13, %c0_14] : memref<1x128xf32, #tpu.memory_space<vmem>>, vector<1x128xf32>
    %17 = vector.broadcast %16 : vector<1x128xf32> to vector<104x128xf32>
    %18 = arith.addf %15, %17 : vector<104x128xf32>
    %cst_15 = arith.constant 0.000000e+00 : f32
    %19 = vector.broadcast %cst_15 : f32 to vector<104x128xf32>
    %20 = arith.maximumf %18, %19 : vector<104x128xf32>
    %21 = arith.truncf %20 : vector<104x128xf32> to vector<104x128xbf16>
    %c0_16 = arith.constant 0 : index
    %c0_17 = arith.constant 0 : index
    %22 = vector.load %arg4[%c0_16, %c0_17] : memref<104x128xbf16, #tpu.memory_space<vmem>>, vector<104x128xbf16>
    tpu.vector_store %arg4[%c0_16, %c0_17], %21 {strides = array<i32>} : memref<104x128xbf16, #tpu.memory_space<vmem>>, vector<104x128xbf16>,
    return
  }
  func.func @transform_0(%arg0: i32) -> (i32, i32, i32) {
    %c0_i32 = arith.constant 0 : i32
    %c0_i32_0 = arith.constant 0 : i32
    %c0_i32_1 = arith.constant 0 : i32
    return %c0_i32, %arg0, %c0_i32_0 : i32, i32, i32
  }
  func.func @transform_1(%arg0: i32) -> (i32, i32) {
    %c0_i32 = arith.constant 0 : i32
    %c0_i32_0 = arith.constant 0 : i32
    %c0_i32_1 = arith.constant 0 : i32
    return %c0_i32, %c0_i32_0 : i32, i32
  }
  func.func @transform_2(%arg0: i32) -> (i32, i32) {
    %c0_i32 = arith.constant 0 : i32
    %c0_i32_0 = arith.constant 0 : i32
    %c0_i32_1 = arith.constant 0 : i32
    return %c0_i32, %c0_i32_0 : i32, i32
  }
  func.func @transform_3(%arg0: i32) -> (i32, i32) {
    %c0_i32 = arith.constant 0 : i32
    %c0_i32_0 = arith.constant 0 : i32
    return %arg0, %c0_i32 : i32, i32
  }
}

module attributes {stable_mosaic.version = 11 : i64} {
  func.func @mlp_kernel(%arg0: i32, %arg1: memref<8x6272xbf16, #tpu.memory_space<vmem>>, %arg2: memref<6272x128xbf16, #tpu.memory_space<vmem>>, %arg3: memref<1x128xf32, #tpu.memory_space<vmem>>, %arg4: memref<128x128xbf16, #tpu.memory_space<vmem>>, %arg5: memref<1x128xf32, #tpu.memory_space<vmem>>, %arg6: memref<8x128xf32, #tpu.memory_space<vmem>>) attributes {dimension_semantics = [#tpu.dimension_semantics<parallel>], iteration_bounds = array<i64: 1>, scalar_prefetch = 0 : i64, scratch_operands = 0 : i64, tpu.core_type = #tpu.core_type<tc>, window_params = [{transform_indices = @transform_0, window_bounds = array<i64: 8, 6272>}, {pipeline_mode = #tpu.pipeline_mode<synchronous>, transform_indices = @transform_1, window_bounds = array<i64: 6272, 128>}, {pipeline_mode = #tpu.pipeline_mode<synchronous>, transform_indices = @transform_2, window_bounds = array<i64: 1, 128>}, {pipeline_mode = #tpu.pipeline_mode<synchronous>, transform_indices = @transform_3, window_bounds = array<i64: 128, 128>}, {pipeline_mode = #tpu.pipeline_mode<synchronous>, transform_indices = @transform_4, window_bounds = array<i64: 1, 128>}, {transform_indices = @transform_5, window_bounds = array<i64: 8, 128>}]} {
    %c0 = arith.constant 0 : index
    %c0_0 = arith.constant 0 : index
    %0 = vector.load %arg1[%c0, %c0_0] : memref<8x6272xbf16, #tpu.memory_space<vmem>>, vector<8x6272xbf16>
    %c0_1 = arith.constant 0 : index
    %c0_2 = arith.constant 0 : index
    %1 = vector.load %arg2[%c0_1, %c0_2] : memref<6272x128xbf16, #tpu.memory_space<vmem>>, vector<6272x128xbf16>
    %cst = arith.constant dense<0.000000e+00> : vector<8x128xf32>
    %2 = tpu.matmul %0, %1, %cst {dimension_numbers = #tpu.dot_dimension_numbers<[1], [0], [0], [1], [0, 0, 1, 1], [], []>} : vector<8x6272xbf16>, vector<6272x128xbf16>, vector<8x128xf32> -> vector<8x128xf32>
    %c0_3 = arith.constant 0 : index
    %c0_4 = arith.constant 0 : index
    %3 = vector.load %arg3[%c0_3, %c0_4] : memref<1x128xf32, #tpu.memory_space<vmem>>, vector<1x128xf32>
    %4 = vector.broadcast %3 : vector<1x128xf32> to vector<8x128xf32>
    %5 = arith.addf %2, %4 : vector<8x128xf32>
    %cst_5 = arith.constant 0.000000e+00 : f32
    %6 = vector.broadcast %cst_5 : f32 to vector<8x128xf32>
    %7 = arith.maximumf %5, %6 : vector<8x128xf32>
    %8 = arith.truncf %7 : vector<8x128xf32> to vector<8x128xbf16>
    %c0_6 = arith.constant 0 : index
    %c0_7 = arith.constant 0 : index
    %9 = vector.load %arg4[%c0_6, %c0_7] : memref<128x128xbf16, #tpu.memory_space<vmem>>, vector<128x128xbf16>
    %cst_8 = arith.constant dense<0.000000e+00> : vector<8x128xf32>
    %10 = tpu.matmul %8, %9, %cst_8 {dimension_numbers = #tpu.dot_dimension_numbers<[1], [0], [0], [1], [0, 0, 1, 1], [], []>} : vector<8x128xbf16>, vector<128x128xbf16>, vector<8x128xf32> -> vector<8x128xf32>
    %c0_9 = arith.constant 0 : index
    %c0_10 = arith.constant 0 : index
    %11 = vector.load %arg5[%c0_9, %c0_10] : memref<1x128xf32, #tpu.memory_space<vmem>>, vector<1x128xf32>
    %12 = vector.broadcast %11 : vector<1x128xf32> to vector<8x128xf32>
    %13 = arith.addf %10, %12 : vector<8x128xf32>
    %c0_11 = arith.constant 0 : index
    %c0_12 = arith.constant 0 : index
    %14 = vector.load %arg6[%c0_11, %c0_12] : memref<8x128xf32, #tpu.memory_space<vmem>>, vector<8x128xf32>
    tpu.vector_store %arg6[%c0_11, %c0_12], %13 {strides = array<i32>} : memref<8x128xf32, #tpu.memory_space<vmem>>, vector<8x128xf32>,
    return
  }
  func.func @transform_0(%arg0: i32) -> (i32, i32) {
    %c0_i32 = arith.constant 0 : i32
    %c0_i32_0 = arith.constant 0 : i32
    return %arg0, %c0_i32 : i32, i32
  }
  func.func @transform_1(%arg0: i32) -> (i32, i32) {
    %c0_i32 = arith.constant 0 : i32
    %c0_i32_0 = arith.constant 0 : i32
    %c0_i32_1 = arith.constant 0 : i32
    return %c0_i32, %c0_i32_0 : i32, i32
  }
  func.func @transform_2(%arg0: i32) -> (i32, i32) {
    %c0_i32 = arith.constant 0 : i32
    %c0_i32_0 = arith.constant 0 : i32
    %c0_i32_1 = arith.constant 0 : i32
    return %c0_i32, %c0_i32_0 : i32, i32
  }
  func.func @transform_3(%arg0: i32) -> (i32, i32) {
    %c0_i32 = arith.constant 0 : i32
    %c0_i32_0 = arith.constant 0 : i32
    %c0_i32_1 = arith.constant 0 : i32
    return %c0_i32, %c0_i32_0 : i32, i32
  }
  func.func @transform_4(%arg0: i32) -> (i32, i32) {
    %c0_i32 = arith.constant 0 : i32
    %c0_i32_0 = arith.constant 0 : i32
    %c0_i32_1 = arith.constant 0 : i32
    return %c0_i32, %c0_i32_0 : i32, i32
  }
  func.func @transform_5(%arg0: i32) -> (i32, i32) {
    %c0_i32 = arith.constant 0 : i32
    %c0_i32_0 = arith.constant 0 : i32
    return %arg0, %c0_i32 : i32, i32
  }
}

</mosaic_0001>

<bundles_post_ra>
// kernel: forward.3
= control target key start
LH: loop header
LB: loop body
LE: loop exit
PB: predicated region body
PF: predicated region fallthrough
CT: control target
= control target key end

     0   :  { %vm270_vm0 = vcmask 1043456   ;;  %vm271_vm1 = vcmask 1044480   ;;  %v4861_v0 = vmov 0.0   ;;  %v3658_v2 = vmov 65535   ;;  %s4857_s1 = inlined_call_operand.vmem [shape: bf16[9,128], index: 1, kind: input, shape index: {}]   ;;  %s4858_s0 = inlined_call_operand.vmem [shape: bf16[4,392,9], index: 0, kind: input, shape index: {}]   ;;  %s4859_s2 = inlined_call_operand.vmem [shape: f32[1,128], index: 2, kind: input, shape index: {}]   ;;  %s4860_s3 = inlined_call_operand.vmem [shape: bf16[392,128], index: 3, kind: output, shape index: {}]  }
   0x1   :  { %3145 = vmatprep.subr.bf16.mxu0 %v4861_v0  ;;  %3247 = vmatprep.subr.bf16.mxu1 %v4861_v0  ;;  %v3556_v1 = vld [vmem:[%s4857_s1] sm:$0x1f]   ;;  %v272_v3 = vsel %vm270_vm0, 4294967295, %v3658_v2  ;;  %vm3659_vm2 = vmmov 0   ;;  %vm194_vm3 = vcmask 72704   ;;  %v3559_v8 = vld [vmem:[%s4858_s0 + $0x8] sm:$0xff]  }
   0x2   :  { %v273_v4 = vsel %vm271_vm1, %v272_v3, 0  ;;  %3147 = vmatprep.mubr.msk.bf16.mxu0 %vm3659_vm2, %v4861_v0  ;;  %3249 = vmatprep.mubr.msk.bf16.mxu1 %vm3659_vm2, %v4861_v0  ;;  %v3557_v5 = vld [vmem:[%s4858_s0] sm:$0xff]   ;;  %v3560_v9 = vld [vmem:[%s4858_s0 + $0xcc] sm:$0xff]   ;;  %v3562_v11 = vld [vmem:[%s4858_s0 + $0xd4] sm:$0xff]  }
   0x3   :  { %v275_v6 = vand.u32 %v3556_v1, %v273_v4  ;;  %v3558_v7 = vld [vmem:[%s4858_s0 + $0xc4] sm:$0xff]   ;;  %v3561_v10 = vld [vmem:[%s4858_s0 + $0x10] sm:$0xff]   ;;  %v3563_v12 = vld [vmem:[%s4858_s0 + $0x18] sm:$0xff]  }
   0x4   :  { %v3564_v13 = vld [vmem:[%s4858_s0 + $0xdc] sm:$0xff]   ;;  %v3566_v15 = vld [vmem:[%s4858_s0 + $0xe4] sm:$0xff]   ;;  %v3568_v17 = vld [vmem:[%s4858_s0 + $0xec] sm:$0xff]  }
   0x5   :  { %3146 = vmatpush3.bf16.msra.mxu0 %v275_v6  ;;  %3248 = vmatpush3.bf16.msra.mxu1 %v275_v6  ;;  %v3565_v14 = vld [vmem:[%s4858_s0 + $0x20] sm:$0xff]   ;;  %v3567_v16 = vld [vmem:[%s4858_s0 + $0x28] sm:$0xff]   ;;  %v3569_v18 = vld [vmem:[%s4858_s0 + $0x30] sm:$0xff]  }
   0x6   :  { %3349 = vmatprep.subr.bf16.mxu0 %v4861_v0  ;;  %3451 = vmatprep.subr.bf16.mxu1 %v4861_v0  ;;  %v3570_v19 = vld [vmem:[%s4858_s0 + $0xf4] sm:$0xff]   ;;  %v3572_v21 = vld [vmem:[%s4858_s0 + $0xfc] sm:$0xff]   ;;  %v3574_v23 = vld [vmem:[%s4858_s0 + $0x104] sm:$0xff]  }
   0x7   :  { %v3571_v20 = vld [vmem:[%s4858_s0 + $0x38] sm:$0xff]   ;;  %v3573_v22 = vld [vmem:[%s4858_s0 + $0x40] sm:$0xff]   ;;  %v3575_v24 = vld [vmem:[%s4858_s0 + $0x48] sm:$0xff]  }
   0x8   :  { %3148 = vmatmul.mubr.msk.bf16.vlgmr.msra.gmra.mxu0 %vm194_vm3, %v3557_v5  ;;  %3250 = vmatmul.mubr.msk.bf16.vlgmr.msra.gmra.mxu1 %vm194_vm3, %v3558_v7  ;;  %v3576_v25 = vld [vmem:[%s4858_s0 + $0x10c] sm:$0xff]   ;;  %v3578_v27 = vld [vmem:[%s4858_s0 + $0x114] sm:$0xff]   ;;  %v3580_v29 = vld [vmem:[%s4858_s0 + $0x11c] sm:$0xff]  }
   0x9   :  { %3350 = vmatpush3.bf16.msra.mxu0 %v275_v6  ;;  %3452 = vmatpush3.bf16.msra.mxu1 %v275_v6  ;;  %v3577_v26 = vld [vmem:[%s4858_s0 + $0x50] sm:$0xff]   ;;  %v3579_v28 = vld [vmem:[%s4858_s0 + $0x58] sm:$0xff]   ;;  %v3581_v30 = vld [vmem:[%s4858_s0 + $0x60] sm:$0xff]  }
   0xa   :  { %3151 = vmatprep.mubr.msk.bf16.mxu0 %vm3659_vm2, %v4861_v0  ;;  %3253 = vmatprep.mubr.msk.bf16.mxu1 %vm3659_vm2, %v4861_v0  ;;  %v3582_v31 = vld [vmem:[%s4858_s0 + $0x124] sm:$0xff]   ;;  %v3584_v33 = vld [vmem:[%s4858_s0 + $0x12c] sm:$0xff]   ;;  %v3586_v35 = vld [vmem:[%s4858_s0 + $0x134] sm:$0xff]  }
   0xb   :  { %v3583_v32 = vld [vmem:[%s4858_s0 + $0x68] sm:$0xff]   ;;  %v3585_v34 = vld [vmem:[%s4858_s0 + $0x70] sm:$0xff]   ;;  %v3587_v36 = vld [vmem:[%s4858_s0 + $0x78] sm:$0xff]  }
   0xc   :  { %v3588_v37 = vld [vmem:[%s4858_s0 + $0x13c] sm:$0xff]   ;;  %v3590_v39 = vld [vmem:[%s4858_s0 + $0x144] sm:$0xff]   ;;  %v3592_v41 = vld [vmem:[%s4858_s0 + $0x14c] sm:$0xff]  }
   0xd   :  { %v3589_v38 = vld [vmem:[%s4858_s0 + $0x80] sm:$0xff]   ;;  %v3591_v40 = vld [vmem:[%s4858_s0 + $0x88] sm:$0xff]   ;;  %v3593_v42 = vld [vmem:[%s4858_s0 + $0x90] sm:$0xff]  }
   0xe   :  { %v3594_v43 = vld [vmem:[%s4858_s0 + $0x154] sm:$0xff]   ;;  %v3596_v45 = vld [vmem:[%s4858_s0 + $0x15c] sm:$0xff]   ;;  %v3598_v47 = vld [vmem:[%s4858_s0 + $0x164] sm:$0xff]  }
   0xf   :  { %v3595_v44 = vld [vmem:[%s4858_s0 + $0x98] sm:$0xff]   ;;  %v3597_v46 = vld [vmem:[%s4858_s0 + $0xa0] sm:$0xff]   ;;  %v3599_v48 = vld [vmem:[%s4858_s0 + $0xa8] sm:$0xff]  }
  0x10   :  { %3152 = vmatmul.mubr.msk.bf16.gmra.mxu0 %vm194_vm3, %v3559_v8  ;;  %3254 = vmatmul.mubr.msk.bf16.gmra.mxu1 %vm194_vm3, %v3560_v9  ;;  %v3600_v49 = vld [vmem:[%s4858_s0 + $0x16c] sm:$0xff]   ;;  %v3602_v51 = vld [vmem:[%s4858_s0 + $0x174] sm:$0xff]   ;;  %v3604_v53 = vld [vmem:[%s4858_s0 + $0x17c] sm:$0xff]  }
  0x11   :  { %3155 = vmatprep.mubr.msk.bf16.mxu0 %vm3659_vm2, %v4861_v0  ;;  %3257 = vmatprep.mubr.msk.bf16.mxu1 %vm3659_vm2, %v4861_v0  ;;  %v3601_v50 = vld [vmem:[%s4858_s0 + $0xb0] sm:$0xff]   ;;  %v3603_v52 = vld [vmem:[%s4858_s0 + $0xb8] sm:$0xff]   ;;  %v3605_v54 = vld [vmem:[%s4858_s0 + $0xc0] ss:$0 sps:$4 sm:$0xff]  }
  0x12   :  { %v3606_v55 = vld [vmem:[%s4858_s0 + $0x184] ss:$0 sps:$4 sm:$0xff]   ;;  %v3607_v63 = vld [vmem:[%s4858_s0 + $0x188] sm:$0xff]  }
  0x13   :  { %v3608_v1 = vld [vmem:[%s4858_s0 + $0x24c] sm:$0xff]  }
  0x18   :  { %3156 = vmatmul.mubr.msk.bf16.gmra.mxu0 %vm194_vm3, %v3561_v10  ;;  %3258 = vmatmul.mubr.msk.bf16.gmra.mxu1 %vm194_vm3, %v3562_v11 }
  0x19   :  { %3159 = vmatprep.mubr.msk.bf16.mxu0 %vm3659_vm2, %v4861_v0  ;;  %3261 = vmatprep.mubr.msk.bf16.mxu1 %vm3659_vm2, %v4861_v0 }
  0x20   :  { %3160 = vmatmul.mubr.msk.bf16.gmra.mxu0 %vm194_vm3, %v3563_v12  ;;  %3262 = vmatmul.mubr.msk.bf16.gmra.mxu1 %vm194_vm3, %v3564_v13  ;;  %v3609_v12 = vld [vmem:[%s4858_s0 + $0x190] sm:$0xff]  }
  0x21   :  { %3163 = vmatprep.mubr.msk.bf16.mxu0 %vm3659_vm2, %v4861_v0  ;;  %3265 = vmatprep.mubr.msk.bf16.mxu1 %vm3659_vm2, %v4861_v0  ;;  %v3610_v13 = vld [vmem:[%s4858_s0 + $0x254] sm:$0xff]  }
  0x28   :  { %3164 = vmatmul.mubr.msk.bf16.gmra.mxu0 %vm194_vm3, %v3565_v14  ;;  %3266 = vmatmul.mubr.msk.bf16.gmra.mxu1 %vm194_vm3, %v3566_v15 }
  0x29   :  { %3167 = vmatprep.mubr.msk.bf16.mxu0 %vm3659_vm2, %v4861_v0  ;;  %3269 = vmatprep.mubr.msk.bf16.mxu1 %vm3659_vm2, %v4861_v0 }
  0x30   :  { %3168 = vmatmul.mubr.msk.bf16.gmra.mxu0 %vm194_vm3, %v3567_v16  ;;  %3270 = vmatmul.mubr.msk.bf16.gmra.mxu1 %vm194_vm3, %v3568_v17 }
  0x31   :  { %3171 = vmatprep.mubr.msk.bf16.mxu0 %vm3659_vm2, %v4861_v0  ;;  %3273 = vmatprep.mubr.msk.bf16.mxu1 %vm3659_vm2, %v4861_v0 }
  0x38   :  { %3172 = vmatmul.mubr.msk.bf16.gmra.mxu0 %vm194_vm3, %v3569_v18  ;;  %3274 = vmatmul.mubr.msk.bf16.gmra.mxu1 %vm194_vm3, %v3570_v19 }
  0x39   :  { %3175 = vmatprep.mubr.msk.bf16.mxu0 %vm3659_vm2, %v4861_v0  ;;  %3277 = vmatprep.mubr.msk.bf16.mxu1 %vm3659_vm2, %v4861_v0 }
  0x40   :  { %3176 = vmatmul.mubr.msk.bf16.gmra.mxu0 %vm194_vm3, %v3571_v20  ;;  %3278 = vmatmul.mubr.msk.bf16.gmra.mxu1 %vm194_vm3, %v3572_v21 }
  0x41   :  { %3179 = vmatprep.mubr.msk.bf16.mxu0 %vm3659_vm2, %v4861_v0  ;;  %3281 = vmatprep.mubr.msk.bf16.mxu1 %vm3659_vm2, %v4861_v0 }
  0x48   :  { %3180 = vmatmul.mubr.msk.bf16.gmra.mxu0 %vm194_vm3, %v3573_v22  ;;  %3282 = vmatmul.mubr.msk.bf16.gmra.mxu1 %vm194_vm3, %v3574_v23 }
  0x49   :  { %3183 = vmatprep.mubr.msk.bf16.mxu0 %vm3659_vm2, %v4861_v0  ;;  %3285 = vmatprep.mubr.msk.bf16.mxu1 %vm3659_vm2, %v4861_v0 }
  0x50   :  { %3184 = vmatmul.mubr.msk.bf16.gmra.mxu0 %vm194_vm3, %v3575_v24  ;;  %3286 = vmatmul.mubr.msk.bf16.gmra.mxu1 %vm194_vm3, %v3576_v25  ;;  %v3611_v24 = vld [vmem:[%s4858_s0 + $0x198] sm:$0xff]  }
  0x51   :  { %3187 = vmatprep.mubr.msk.bf16.mxu0 %vm3659_vm2, %v4861_v0  ;;  %3289 = vmatprep.mubr.msk.bf16.mxu1 %vm3659_vm2, %v4861_v0  ;;  %v3612_v25 = vld [vmem:[%s4858_s0 + $0x25c] sm:$0xff]  }
  0x58   :  { %3188 = vmatmul.mubr.msk.bf16.gmra.mxu0 %vm194_vm3, %v3577_v26  ;;  %3290 = vmatmul.mubr.msk.bf16.gmra.mxu1 %vm194_vm3, %v3578_v27 }
  0x59   :  { %3191 = vmatprep.mubr.msk.bf16.mxu0 %vm3659_vm2, %v4861_v0  ;;  %3293 = vmatprep.mubr.msk.bf16.mxu1 %vm3659_vm2, %v4861_v0 }
  0x60   :  { %3192 = vmatmul.mubr.msk.bf16.gmra.mxu0 %vm194_vm3, %v3579_v28  ;;  %3294 = vmatmul.mubr.msk.bf16.gmra.mxu1 %vm194_vm3, %v3580_v29 }
  0x61   :  { %3195 = vmatprep.mubr.msk.bf16.mxu0 %vm3659_vm2, %v4861_v0  ;;  %3297 = vmatprep.mubr.msk.bf16.mxu1 %vm3659_vm2, %v4861_v0 }
  0x68   :  { %3196 = vmatmul.mubr.msk.bf16.gmra.mxu0 %vm194_vm3, %v3581_v30  ;;  %3298 = vmatmul.mubr.msk.bf16.gmra.mxu1 %vm194_vm3, %v3582_v31 }
  0x69   :  { %3199 = vmatprep.mubr.msk.bf16.mxu0 %vm3659_vm2, %v4861_v0  ;;  %3301 = vmatprep.mubr.msk.bf16.mxu1 %vm3659_vm2, %v4861_v0 }
  0x70   :  { %3200 = vmatmul.mubr.msk.bf16.gmra.mxu0 %vm194_vm3, %v3583_v32  ;;  %3302 = vmatmul.mubr.msk.bf16.gmra.mxu1 %vm194_vm3, %v3584_v33 }
  0x71   :  { %3203 = vmatprep.mubr.msk.bf16.mxu0 %vm3659_vm2, %v4861_v0  ;;  %3305 = vmatprep.mubr.msk.bf16.mxu1 %vm3659_vm2, %v4861_v0 }
  0x78   :  { %3204 = vmatmul.mubr.msk.bf16.gmra.mxu0 %vm194_vm3, %v3585_v34  ;;  %3306 = vmatmul.mubr.msk.bf16.gmra.mxu1 %vm194_vm3, %v3586_v35 }
  0x79   :  { %3207 = vmatprep.mubr.msk.bf16.mxu0 %vm3659_vm2, %v4861_v0  ;;  %3309 = vmatprep.mubr.msk.bf16.mxu1 %vm3659_vm2, %v4861_v0 }
  0x80   :  { %3208 = vmatmul.mubr.msk.bf16.gmra.mxu0 %vm194_vm3, %v3587_v36  ;;  %3310 = vmatmul.mubr.msk.bf16.gmra.mxu1 %vm194_vm3, %v3588_v37  ;;  %v3613_v36 = vld [vmem:[%s4858_s0 + $0x1a0] sm:$0xff]  }
  0x81   :  { %3211 = vmatprep.mubr.msk.bf16.mxu0 %vm3659_vm2, %v4861_v0  ;;  %3313 = vmatprep.mubr.msk.bf16.mxu1 %vm3659_vm2, %v4861_v0  ;;  %v3614_v37 = vld [vmem:[%s4858_s0 + $0x264] sm:$0xff]  }
  0x88   :  { %3212 = vmatmul.mubr.msk.bf16.gmra.mxu0 %vm194_vm3, %v3589_v38  ;;  %3314 = vmatmul.mubr.msk.bf16.gmra.mxu1 %vm194_vm3, %v3590_v39 }
  0x89   :  { %3215 = vmatprep.mubr.msk.bf16.mxu0 %vm3659_vm2, %v4861_v0  ;;  %3317 = vmatprep.mubr.msk.bf16.mxu1 %vm3659_vm2, %v4861_v0 }
  0x90   :  { %3216 = vmatmul.mubr.msk.bf16.gmra.mxu0 %vm194_vm3, %v3591_v40  ;;  %3318 = vmatmul.mubr.msk.bf16.gmra.mxu1 %vm194_vm3, %v3592_v41 }
  0x91   :  { %3219 = vmatprep.mubr.msk.bf16.mxu0 %vm3659_vm2, %v4861_v0  ;;  %3321 = vmatprep.mubr.msk.bf16.mxu1 %vm3659_vm2, %v4861_v0 }
  0x98   :  { %3220 = vmatmul.mubr.msk.bf16.gmra.mxu0 %vm194_vm3, %v3593_v42  ;;  %3322 = vmatmul.mubr.msk.bf16.gmra.mxu1 %vm194_vm3, %v3594_v43 }
  0x99   :  { %3223 = vmatprep.mubr.msk.bf16.mxu0 %vm3659_vm2, %v4861_v0  ;;  %3325 = vmatprep.mubr.msk.bf16.mxu1 %vm3659_vm2, %v4861_v0 }
  0xa0   :  { %3224 = vmatmul.mubr.msk.bf16.gmra.mxu0 %vm194_vm3, %v3595_v44  ;;  %3326 = vmatmul.mubr.msk.bf16.gmra.mxu1 %vm194_vm3, %v3596_v45 }
  0xa1   :  { %3227 = vmatprep.mubr.msk.bf16.mxu0 %vm3659_vm2, %v4861_v0  ;;  %3329 = vmatprep.mubr.msk.bf16.mxu1 %vm3659_vm2, %v4861_v0 }
  0xa8   :  { %3228 = vmatmul.mubr.msk.bf16.gmra.mxu0 %vm194_vm3, %v3597_v46  ;;  %3330 = vmatmul.mubr.msk.bf16.gmra.mxu1 %vm194_vm3, %v3598_v47 }
  0xa9   :  { %3231 = vmatprep.mubr.msk.bf16.mxu0 %vm3659_vm2, %v4861_v0  ;;  %3333 = vmatprep.mubr.msk.bf16.mxu1 %vm3659_vm2, %v4861_v0 }
  0xb0   :  { %3232 = vmatmul.mubr.msk.bf16.gmra.mxu0 %vm194_vm3, %v3599_v48  ;;  %3334 = vmatmul.mubr.msk.bf16.gmra.mxu1 %vm194_vm3, %v3600_v49  ;;  %v3615_v48 = vld [vmem:[%s4858_s0 + $0x1a8] sm:$0xff]  }
  0xb1   :  { %3235 = vmatprep.mubr.msk.bf16.mxu0 %vm3659_vm2, %v4861_v0  ;;  %3337 = vmatprep.mubr.msk.bf16.mxu1 %vm3659_vm2, %v4861_v0  ;;  %v3616_v49 = vld [vmem:[%s4858_s0 + $0x26c] sm:$0xff]  }
  0xb8   :  { %3236 = vmatmul.mubr.msk.bf16.gmra.mxu0 %vm194_vm3, %v3601_v50  ;;  %3338 = vmatmul.mubr.msk.bf16.gmra.mxu1 %vm194_vm3, %v3602_v51 }
  0xb9   :  { %3239 = vmatprep.mubr.msk.bf16.mxu0 %vm3659_vm2, %v4861_v0  ;;  %3341 = vmatprep.mubr.msk.bf16.mxu1 %vm3659_vm2, %v4861_v0 }
  0xc0   :  { %3240 = vmatmul.mubr.msk.bf16.gmra.mxu0 %vm194_vm3, %v3603_v52  ;;  %3342 = vmatmul.mubr.msk.bf16.gmra.mxu1 %vm194_vm3, %v3604_v53 }
  0xc1   :  { %3243 = vmatprep.mubr.msk.bf16.mxu0 %vm3659_vm2, %v4861_v0  ;;  %3345 = vmatprep.mubr.msk.bf16.mxu1 %vm3659_vm2, %v4861_v0 }
  0xc8   :  { %v3985_v56 = vpop.f32.mrf.mxu0  ;;  %3244 = vmatmul.mubr.msk.bf16.gmra.mxu0 %vm194_vm3, %v3605_v54  ;;  %v3988_v57 = vpop.f32.mrf.mxu1  ;;  %3346 = vmatmul.mubr.msk.bf16.gmra.mxu1 %vm194_vm3, %v3606_v55 }
  0xc9   :  { %3351 = vmatprep.mubr.msk.bf16.mxu0 %vm3659_vm2, %v4861_v0  ;;  %3453 = vmatprep.mubr.msk.bf16.mxu1 %vm3659_vm2, %v4861_v0 }
  0xca   :  { %v3149_v59 = vpop.f32.mrf.mxu0  ;;  %v3251_v60 = vpop.f32.mrf.mxu1 }
  0xcc   :  { %v3997_v61 = vpop.f32.mrf.mxu0  ;;  %v3999_v62 = vpop.f32.mrf.mxu1 }
  0xce   :  { %v3150_v3 = vpop.f32.mrf.mxu0  ;;  %v3252_v4 = vpop.f32.mrf.mxu1 }
  0xcf   :  { %v3617_v3 = vld [vmem:[%s4858_s0 + $0x1b0] sm:$0xff]  }
  0xd0   :  { %v4009_v5 = vpop.f32.mrf.mxu0  ;;  %v4011_v6 = vpop.f32.mrf.mxu1  ;;  %3352 = vmatmul.mubr.msk.bf16.vlgmr.msra.gmra.mxu0 %vm194_vm3, %v3607_v63  ;;  %3454 = vmatmul.mubr.msk.bf16.vlgmr.msra.gmra.mxu1 %vm194_vm3, %v3608_v1  ;;  %v3618_v4 = vld [vmem:[%s4858_s0 + $0x274] sm:$0xff]  }
  0xd1   :  { %3355 = vmatprep.mubr.msk.bf16.mxu0 %vm3659_vm2, %v4861_v0  ;;  %3457 = vmatprep.mubr.msk.bf16.mxu1 %vm3659_vm2, %v4861_v0 }
  0xd2   :  { %v3153_v8 = vpop.f32.mrf.mxu0  ;;  %v3255_v9 = vpop.f32.mrf.mxu1 }
  0xd4   :  { %v4021_v10 = vpop.f32.mrf.mxu0  ;;  %v4023_v11 = vpop.f32.mrf.mxu1 }
  0xd6   :  { %v3154_v15 = vpop.f32.mrf.mxu0  ;;  %v3256_v16 = vpop.f32.mrf.mxu1 }
  0xd8   :  { %v4033_v17 = vpop.f32.mrf.mxu0  ;;  %v4035_v18 = vpop.f32.mrf.mxu1  ;;  %3356 = vmatmul.mubr.msk.bf16.gmra.mxu0 %vm194_vm3, %v3609_v12  ;;  %3458 = vmatmul.mubr.msk.bf16.gmra.mxu1 %vm194_vm3, %v3610_v13 }
  0xd9   :  { %3359 = vmatprep.mubr.msk.bf16.mxu0 %vm3659_vm2, %v4861_v0  ;;  %3461 = vmatprep.mubr.msk.bf16.mxu1 %vm3659_vm2, %v4861_v0 }
  0xda   :  { %v3157_v20 = vpop.f32.mrf.mxu0  ;;  %v3259_v21 = vpop.f32.mrf.mxu1 }
  0xdc   :  { %v4045_v22 = vpop.f32.mrf.mxu0  ;;  %v4047_v23 = vpop.f32.mrf.mxu1 }
  0xde   :  { %v3158_v27 = vpop.f32.mrf.mxu0  ;;  %v3260_v28 = vpop.f32.mrf.mxu1 }
  0xdf   :  { %v3619_v27 = vld [vmem:[%s4858_s0 + $0x1b8] sm:$0xff]  }
  0xe0   :  { %v4057_v29 = vpop.f32.mrf.mxu0  ;;  %v4059_v30 = vpop.f32.mrf.mxu1  ;;  %3360 = vmatmul.mubr.msk.bf16.gmra.mxu0 %vm194_vm3, %v3611_v24  ;;  %3462 = vmatmul.mubr.msk.bf16.gmra.mxu1 %vm194_vm3, %v3612_v25  ;;  %v3620_v28 = vld [vmem:[%s4858_s0 + $0x27c] sm:$0xff]  }
  0xe1   :  { %3363 = vmatprep.mubr.msk.bf16.mxu0 %vm3659_vm2, %v4861_v0  ;;  %3465 = vmatprep.mubr.msk.bf16.mxu1 %vm3659_vm2, %v4861_v0 }
  0xe2   :  { %v3161_v32 = vpop.f32.mrf.mxu0  ;;  %v3263_v33 = vpop.f32.mrf.mxu1 }
  0xe4   :  { %v4069_v34 = vpop.f32.mrf.mxu0  ;;  %v4071_v35 = vpop.f32.mrf.mxu1 }
  0xe6   :  { %v3162_v39 = vpop.f32.mrf.mxu0  ;;  %v3264_v40 = vpop.f32.mrf.mxu1 }
  0xe8   :  { %v4081_v41 = vpop.f32.mrf.mxu0  ;;  %v4083_v42 = vpop.f32.mrf.mxu1  ;;  %3364 = vmatmul.mubr.msk.bf16.gmra.mxu0 %vm194_vm3, %v3613_v36  ;;  %3466 = vmatmul.mubr.msk.bf16.gmra.mxu1 %vm194_vm3, %v3614_v37 }
  0xe9   :  { %3367 = vmatprep.mubr.msk.bf16.mxu0 %vm3659_vm2, %v4861_v0  ;;  %3469 = vmatprep.mubr.msk.bf16.mxu1 %vm3659_vm2, %v4861_v0 }
  0xea   :  { %v3165_v44 = vpop.f32.mrf.mxu0  ;;  %v3267_v45 = vpop.f32.mrf.mxu1 }
  0xec   :  { %v4093_v46 = vpop.f32.mrf.mxu0  ;;  %v4095_v47 = vpop.f32.mrf.mxu1 }
  0xee   :  { %v3166_v51 = vpop.f32.mrf.mxu0  ;;  %v3268_v52 = vpop.f32.mrf.mxu1 }
  0xef   :  { %v3621_v51 = vld [vmem:[%s4858_s0 + $0x1c0] sm:$0xff]  }
  0xf0   :  { %v4105_v53 = vpop.f32.mrf.mxu0  ;;  %v4107_v54 = vpop.f32.mrf.mxu1  ;;  %3368 = vmatmul.mubr.msk.bf16.gmra.mxu0 %vm194_vm3, %v3615_v48  ;;  %3470 = vmatmul.mubr.msk.bf16.gmra.mxu1 %vm194_vm3, %v3616_v49  ;;  %v3622_v52 = vld [vmem:[%s4858_s0 + $0x284] sm:$0xff]  }
  0xf1   :  { %3371 = vmatprep.mubr.msk.bf16.mxu0 %vm3659_vm2, %v4861_v0  ;;  %3473 = vmatprep.mubr.msk.bf16.mxu1 %vm3659_vm2, %v4861_v0 }
  0xf2   :  { %v3169_v59 = vpop.f32.mrf.mxu0  ;;  %v3271_v60 = vpop.f32.mrf.mxu1 }
  0xf4   :  { %v4117_v63 = vpop.f32.mrf.mxu0  ;;  %v4119_v1 = vpop.f32.mrf.mxu1 }
  0xf6   :  { %v3170_v9 = vpop.f32.mrf.mxu0  ;;  %v3272_v12 = vpop.f32.mrf.mxu1 }
  0xf8   :  { %v4129_v13 = vpop.f32.mrf.mxu0  ;;  %v4131_v15 = vpop.f32.mrf.mxu1  ;;  %3372 = vmatmul.mubr.msk.bf16.gmra.mxu0 %vm194_vm3, %v3617_v3  ;;  %3474 = vmatmul.mubr.msk.bf16.gmra.mxu1 %vm194_vm3, %v3618_v4 }
  0xf9   :  { %3375 = vmatprep.mubr.msk.bf16.mxu0 %vm3659_vm2, %v4861_v0  ;;  %3477 = vmatprep.mubr.msk.bf16.mxu1 %vm3659_vm2, %v4861_v0 }
  0xfa   :  { %v3173_v20 = vpop.f32.mrf.mxu0  ;;  %v3275_v21 = vpop.f32.mrf.mxu1 }
  0xfc   :  { %v4141_v24 = vpop.f32.mrf.mxu0  ;;  %v4143_v25 = vpop.f32.mrf.mxu1 }
  0xfe   :  { %v3174_v33 = vpop.f32.mrf.mxu0  ;;  %v3276_v36 = vpop.f32.mrf.mxu1 }
  0xff   :  { %v3623_v33 = vld [vmem:[%s4858_s0 + $0x1c8] sm:$0xff]  }
 0x100   :  { %v4153_v37 = vpop.f32.mrf.mxu0  ;;  %v4155_v39 = vpop.f32.mrf.mxu1  ;;  %3376 = vmatmul.mubr.msk.bf16.gmra.mxu0 %vm194_vm3, %v3619_v27  ;;  %3478 = vmatmul.mubr.msk.bf16.gmra.mxu1 %vm194_vm3, %v3620_v28  ;;  %v3624_v36 = vld [vmem:[%s4858_s0 + $0x28c] sm:$0xff]  }
 0x101   :  { %3379 = vmatprep.mubr.msk.bf16.mxu0 %vm3659_vm2, %v4861_v0  ;;  %3481 = vmatprep.mubr.msk.bf16.mxu1 %vm3659_vm2, %v4861_v0 }
 0x102   :  { %v3177_v44 = vpop.f32.mrf.mxu0  ;;  %v3279_v45 = vpop.f32.mrf.mxu1 }
 0x104   :  { %v4165_v48 = vpop.f32.mrf.mxu0  ;;  %v4167_v49 = vpop.f32.mrf.mxu1 }
 0x106   :  { %v3178_v60 = vpop.f32.mrf.mxu0  ;;  %v3280_v3 = vpop.f32.mrf.mxu1 }
 0x108   :  { %v4177_v4 = vpop.f32.mrf.mxu0  ;;  %v4179_v9 = vpop.f32.mrf.mxu1  ;;  %3380 = vmatmul.mubr.msk.bf16.gmra.mxu0 %vm194_vm3, %v3621_v51  ;;  %3482 = vmatmul.mubr.msk.bf16.gmra.mxu1 %vm194_vm3, %v3622_v52 }
 0x109   :  { %3383 = vmatprep.mubr.msk.bf16.mxu0 %vm3659_vm2, %v4861_v0  ;;  %3485 = vmatprep.mubr.msk.bf16.mxu1 %vm3659_vm2, %v4861_v0 }
 0x10a   :  { %v3181_v20 = vpop.f32.mrf.mxu0  ;;  %v3283_v21 = vpop.f32.mrf.mxu1 }
 0x10c   :  { %v4189_v27 = vpop.f32.mrf.mxu0  ;;  %v4191_v28 = vpop.f32.mrf.mxu1 }
 0x10e   :  { %v3182_v45 = vpop.f32.mrf.mxu0  ;;  %v3284_v51 = vpop.f32.mrf.mxu1 }
 0x110   :  { %v4201_v52 = vpop.f32.mrf.mxu0  ;;  %v4203_v60 = vpop.f32.mrf.mxu1  ;;  %3384 = vmatmul.mubr.msk.bf16.gmra.mxu0 %vm194_vm3, %v3623_v33  ;;  %3486 = vmatmul.mubr.msk.bf16.gmra.mxu1 %vm194_vm3, %v3624_v36  ;;  %v3625_v33 = vld [vmem:[%s4858_s0 + $0x1d0] sm:$0xff]  }
 0x111   :  { %3387 = vmatprep.mubr.msk.bf16.mxu0 %vm3659_vm2, %v4861_v0  ;;  %3489 = vmatprep.mubr.msk.bf16.mxu1 %vm3659_vm2, %v4861_v0  ;;  %v3626_v36 = vld [vmem:[%s4858_s0 + $0x294] sm:$0xff]  }
 0x112   :  { %v3185_v20 = vpop.f32.mrf.mxu0  ;;  %v3287_v21 = vpop.f32.mrf.mxu1 }
 0x114   :  { %v4213_v45 = vpop.f32.mrf.mxu0  ;;  %v4215_v51 = vpop.f32.mrf.mxu1 }
 0x116   :  { %v3186_v44 = vpop.f32.mrf.mxu0  ;;  %v3288_v12 = vpop.f32.mrf.mxu1 }
 0x118   :  { %v4225_v59 = vpop.f32.mrf.mxu0  ;;  %v4227_v20 = vpop.f32.mrf.mxu1  ;;  %3388 = vmatmul.mubr.msk.bf16.gmra.mxu0 %vm194_vm3, %v3625_v33  ;;  %3490 = vmatmul.mubr.msk.bf16.gmra.mxu1 %vm194_vm3, %v3626_v36  ;;  %v3627_v33 = vld [vmem:[%s4858_s0 + $0x1d8] sm:$0xff]  }
 0x119   :  { %3391 = vmatprep.mubr.msk.bf16.mxu0 %vm3659_vm2, %v4861_v0  ;;  %3493 = vmatprep.mubr.msk.bf16.mxu1 %vm3659_vm2, %v4861_v0  ;;  %v3628_v36 = vld [vmem:[%s4858_s0 + $0x29c] sm:$0xff]  }
 0x11a   :  { %v3189_v3 = vpop.f32.mrf.mxu0  ;;  %v3291_v44 = vpop.f32.mrf.mxu1 }
 0x11c   :  { %v4237_v12 = vpop.f32.mrf.mxu0  ;;  %v4239_v40 = vpop.f32.mrf.mxu1 }
 0x11e   :  { %v3190_v32 = vpop.f32.mrf.mxu0  ;;  %v3292_v16 = vpop.f32.mrf.mxu1 }
 0x120   :  { %v4249_v8 = vpop.f32.mrf.mxu0  ;;  %v4251_v3 = vpop.f32.mrf.mxu1  ;;  %3392 = vmatmul.mubr.msk.bf16.gmra.mxu0 %vm194_vm3, %v3627_v33  ;;  %3494 = vmatmul.mubr.msk.bf16.gmra.mxu1 %vm194_vm3, %v3628_v36  ;;  %v3629_v33 = vld [vmem:[%s4858_s0 + $0x1e0] sm:$0xff]  }
 0x121   :  { %3395 = vmatprep.mubr.msk.bf16.mxu0 %vm3659_vm2, %v4861_v0  ;;  %3497 = vmatprep.mubr.msk.bf16.mxu1 %vm3659_vm2, %v4861_v0  ;;  %v3630_v36 = vld [vmem:[%s4858_s0 + $0x2a4] sm:$0xff]  }
 0x122   :  { %v3193_v21 = vpop.f32.mrf.mxu0  ;;  %v3295_v32 = vpop.f32.mrf.mxu1 }
 0x124   :  { %v4261_v16 = vpop.f32.mrf.mxu0  ;;  %v4263_v55 = vpop.f32.mrf.mxu1 }
 0x125   :  { %4915 = vst [vmem:[#allocation2_spill] sm:$0xff] %v4261_v16  ;;  %4916 = vst [vmem:[#allocation3_spill] sm:$0xff] %v4263_v55 }
 0x126   :  { %v3194_v50 = vpop.f32.mrf.mxu0  ;;  %v3296_v43 = vpop.f32.mrf.mxu1 }
 0x128   :  { %v4273_v38 = vpop.f32.mrf.mxu0  ;;  %v4275_v21 = vpop.f32.mrf.mxu1  ;;  %3396 = vmatmul.mubr.msk.bf16.gmra.mxu0 %vm194_vm3, %v3629_v33  ;;  %3498 = vmatmul.mubr.msk.bf16.gmra.mxu1 %vm194_vm3, %v3630_v36  ;;  %v3631_v33 = vld [vmem:[%s4858_s0 + $0x1e8] sm:$0xff]  }
 0x129   :  { %4917 = vst [vmem:[#allocation4_spill] sm:$0xff] %v4273_v38  ;;  %4918 = vst [vmem:[#allocation5_spill] sm:$0xff] %v4275_v21  ;;  %3399 = vmatprep.mubr.msk.bf16.mxu0 %vm3659_vm2, %v4861_v0  ;;  %3501 = vmatprep.mubr.msk.bf16.mxu1 %vm3659_vm2, %v4861_v0  ;;  %v3632_v36 = vld [vmem:[%s4858_s0 + $0x2ac] sm:$0xff]  }
 0x12a   :  { %v3197_v44 = vpop.f32.mrf.mxu0  ;;  %v3299_v50 = vpop.f32.mrf.mxu1 }
 0x12c   :  { %v4285_v43 = vpop.f32.mrf.mxu0  ;;  %v4287_v31 = vpop.f32.mrf.mxu1 }
 0x12d   :  { %4919 = vst [vmem:[#allocation6_spill] sm:$0xff] %v4285_v43  ;;  %4920 = vst [vmem:[#allocation7_spill] sm:$0xff] %v4287_v31 }
 0x12e   :  { %v3198_v26 = vpop.f32.mrf.mxu0  ;;  %v3300_v19 = vpop.f32.mrf.mxu1 }
 0x130   :  { %v4297_v14 = vpop.f32.mrf.mxu0  ;;  %v4299_v44 = vpop.f32.mrf.mxu1  ;;  %3400 = vmatmul.mubr.msk.bf16.gmra.mxu0 %vm194_vm3, %v3631_v33  ;;  %3502 = vmatmul.mubr.msk.bf16.gmra.mxu1 %vm194_vm3, %v3632_v36  ;;  %v3633_v33 = vld [vmem:[%s4858_s0 + $0x1f0] sm:$0xff]  }
 0x131   :  { %4921 = vst [vmem:[#allocation8_spill] sm:$0xff] %v4297_v14  ;;  %4922 = vst [vmem:[#allocation9_spill] sm:$0xff] %v4299_v44  ;;  %3403 = vmatprep.mubr.msk.bf16.mxu0 %vm3659_vm2, %v4861_v0  ;;  %3505 = vmatprep.mubr.msk.bf16.mxu1 %vm3659_vm2, %v4861_v0  ;;  %v3634_v36 = vld [vmem:[%s4858_s0 + $0x2b4] sm:$0xff]   ;;  %v4927_v44 = vmov 0.0   ;;  %v4587_v14 = vld [vmem:[%s4859_s2] ss:$0 sm:$0xff] }
 0x132   :  { %v3201_v32 = vpop.f32.mrf.mxu0  ;;  %v3303_v26 = vpop.f32.mrf.mxu1 }
 0x134   :  { %v4309_v19 = vpop.f32.mrf.mxu0  ;;  %v4311_v7 = vpop.f32.mrf.mxu1 }
 0x135   :  { %4923 = vst [vmem:[#allocation10_spill] sm:$0xff] %v4309_v19  ;;  %4924 = vst [vmem:[#allocation11_spill] sm:$0xff] %v4311_v7 }
 0x136   :  { %v3202_v2 = vpop.f32.mrf.mxu0  ;;  %v3304_v58 = vpop.f32.mrf.mxu1 }
 0x138   :  { %v4321_v0 = vpop.f32.mrf.mxu0  ;;  %v4323_v32 = vpop.f32.mrf.mxu1  ;;  %3404 = vmatmul.mubr.msk.bf16.gmra.mxu0 %vm194_vm3, %v3633_v33  ;;  %3506 = vmatmul.mubr.msk.bf16.gmra.mxu1 %vm194_vm3, %v3634_v36  ;;  %v3635_v33 = vld [vmem:[%s4858_s0 + $0x1f8] sm:$0xff]  }
 0x139   :  { %4925 = vst [vmem:[#allocation12_spill] sm:$0xff] %v4321_v0  ;;  %4926 = vst [vmem:[#allocation13_spill] sm:$0xff] %v4323_v32  ;;  %3407 = vmatprep.mubr.msk.bf16.mxu0 %vm3659_vm2, %v4927_v44  ;;  %3509 = vmatprep.mubr.msk.bf16.mxu1 %vm3659_vm2, %v4927_v44  ;;  %v3636_v36 = vld [vmem:[%s4858_s0 + $0x2bc] sm:$0xff]  }
 0x13a   :  { %v3205_v50 = vpop.f32.mrf.mxu0  ;;  %v3307_v2 = vpop.f32.mrf.mxu1 }
 0x13c   :  { %v4333_v58 = vpop.f32.mrf.mxu0  ;;  %v4335_v7 = vpop.f32.mrf.mxu1 }
 0x13d   :  { %4928 = vst [vmem:[#allocation14_spill] sm:$0xff] %v4333_v58  ;;  %4929 = vst [vmem:[#allocation15_spill] sm:$0xff] %v4335_v7 }
 0x13e   :  { %v3206_v32 = vpop.f32.mrf.mxu0  ;;  %v3308_v0 = vpop.f32.mrf.mxu1 }
 0x140   :  { %v4345_v19 = vpop.f32.mrf.mxu0  ;;  %v4347_v50 = vpop.f32.mrf.mxu1  ;;  %3408 = vmatmul.mubr.msk.bf16.gmra.mxu0 %vm194_vm3, %v3635_v33  ;;  %3510 = vmatmul.mubr.msk.bf16.gmra.mxu1 %vm194_vm3, %v3636_v36  ;;  %v3637_v33 = vld [vmem:[%s4858_s0 + $0x200] sm:$0xff]  }
 0x141   :  { %4930 = vst [vmem:[#allocation16_spill] sm:$0xff] %v4345_v19  ;;  %4931 = vst [vmem:[#allocation17_spill] sm:$0xff] %v4347_v50  ;;  %3411 = vmatprep.mubr.msk.bf16.mxu0 %vm3659_vm2, %v4927_v44  ;;  %3513 = vmatprep.mubr.msk.bf16.mxu1 %vm3659_vm2, %v4927_v44  ;;  %v3638_v36 = vld [vmem:[%s4858_s0 + $0x2c4] sm:$0xff]  }
 0x142   :  { %v3209_v26 = vpop.f32.mrf.mxu0  ;;  %v3311_v32 = vpop.f32.mrf.mxu1 }
 0x144   :  { %v4357_v0 = vpop.f32.mrf.mxu0  ;;  %v4359_v7 = vpop.f32.mrf.mxu1 }
 0x145   :  { %4932 = vst [vmem:[#allocation18_spill] sm:$0xff] %v4357_v0  ;;  %4933 = vst [vmem:[#allocation19_spill] sm:$0xff] %v4359_v7 }
 0x146   :  { %v3210_v50 = vpop.f32.mrf.mxu0  ;;  %v3312_v19 = vpop.f32.mrf.mxu1 }
 0x148   :  { %v4369_v58 = vpop.f32.mrf.mxu0  ;;  %v4371_v26 = vpop.f32.mrf.mxu1  ;;  %3412 = vmatmul.mubr.msk.bf16.gmra.mxu0 %vm194_vm3, %v3637_v33  ;;  %3514 = vmatmul.mubr.msk.bf16.gmra.mxu1 %vm194_vm3, %v3638_v36  ;;  %v3639_v33 = vld [vmem:[%s4858_s0 + $0x208] sm:$0xff]  }
 0x149   :  { %4934 = vst [vmem:[#allocation20_spill] sm:$0xff] %v4369_v58  ;;  %4935 = vst [vmem:[#allocation21_spill] sm:$0xff] %v4371_v26  ;;  %3415 = vmatprep.mubr.msk.bf16.mxu0 %vm3659_vm2, %v4927_v44  ;;  %3517 = vmatprep.mubr.msk.bf16.mxu1 %vm3659_vm2, %v4927_v44  ;;  %v3640_v36 = vld [vmem:[%s4858_s0 + $0x2cc] sm:$0xff]  }
 0x14a   :  { %v3213_v2 = vpop.f32.mrf.mxu0  ;;  %v3315_v50 = vpop.f32.mrf.mxu1 }
 0x14c   :  { %v4381_v19 = vpop.f32.mrf.mxu0  ;;  %v4383_v7 = vpop.f32.mrf.mxu1 }
 0x14d   :  { %4936 = vst [vmem:[#allocation22_spill] sm:$0xff] %v4381_v19  ;;  %4937 = vst [vmem:[#allocation23_spill] sm:$0xff] %v4383_v7 }
 0x14e   :  { %v3214_v26 = vpop.f32.mrf.mxu0  ;;  %v3316_v58 = vpop.f32.mrf.mxu1 }
 0x150   :  { %v4393_v0 = vpop.f32.mrf.mxu0  ;;  %v4395_v2 = vpop.f32.mrf.mxu1  ;;  %3416 = vmatmul.mubr.msk.bf16.gmra.mxu0 %vm194_vm3, %v3639_v33  ;;  %3518 = vmatmul.mubr.msk.bf16.gmra.mxu1 %vm194_vm3, %v3640_v36  ;;  %v3641_v33 = vld [vmem:[%s4858_s0 + $0x210] sm:$0xff]  }
 0x151   :  { %4938 = vst [vmem:[#allocation24_spill] sm:$0xff] %v4393_v0  ;;  %4939 = vst [vmem:[#allocation25_spill] sm:$0xff] %v4395_v2  ;;  %3419 = vmatprep.mubr.msk.bf16.mxu0 %vm3659_vm2, %v4927_v44  ;;  %3521 = vmatprep.mubr.msk.bf16.mxu1 %vm3659_vm2, %v4927_v44  ;;  %v3642_v36 = vld [vmem:[%s4858_s0 + $0x2d4] sm:$0xff]  }
 0x152   :  { %v3217_v32 = vpop.f32.mrf.mxu0  ;;  %v3319_v26 = vpop.f32.mrf.mxu1 }
 0x154   :  { %v4405_v58 = vpop.f32.mrf.mxu0  ;;  %v4407_v7 = vpop.f32.mrf.mxu1 }
 0x155   :  { %4940 = vst [vmem:[#allocation26_spill] sm:$0xff] %v4405_v58  ;;  %4941 = vst [vmem:[#allocation27_spill] sm:$0xff] %v4407_v7 }
 0x156   :  { %v3218_v2 = vpop.f32.mrf.mxu0  ;;  %v3320_v0 = vpop.f32.mrf.mxu1 }
 0x158   :  { %v4417_v19 = vpop.f32.mrf.mxu0  ;;  %v4419_v32 = vpop.f32.mrf.mxu1  ;;  %3420 = vmatmul.mubr.msk.bf16.gmra.mxu0 %vm194_vm3, %v3641_v33  ;;  %3522 = vmatmul.mubr.msk.bf16.gmra.mxu1 %vm194_vm3, %v3642_v36  ;;  %v3643_v33 = vld [vmem:[%s4858_s0 + $0x218] sm:$0xff]  }
 0x159   :  { %4942 = vst [vmem:[#allocation28_spill] sm:$0xff] %v4417_v19  ;;  %4943 = vst [vmem:[#allocation29_spill] sm:$0xff] %v4419_v32  ;;  %3423 = vmatprep.mubr.msk.bf16.mxu0 %vm3659_vm2, %v4927_v44  ;;  %3525 = vmatprep.mubr.msk.bf16.mxu1 %vm3659_vm2, %v4927_v44  ;;  %v3644_v36 = vld [vmem:[%s4858_s0 + $0x2dc] sm:$0xff]  }
 0x15a   :  { %v3221_v50 = vpop.f32.mrf.mxu0  ;;  %v3323_v2 = vpop.f32.mrf.mxu1 }
 0x15c   :  { %v4429_v0 = vpop.f32.mrf.mxu0  ;;  %v4431_v7 = vpop.f32.mrf.mxu1 }
 0x15d   :  { %4944 = vst [vmem:[#allocation30_spill] sm:$0xff] %v4429_v0  ;;  %4945 = vst [vmem:[#allocation31_spill] sm:$0xff] %v4431_v7 }
 0x15e   :  { %v3222_v32 = vpop.f32.mrf.mxu0  ;;  %v3324_v19 = vpop.f32.mrf.mxu1 }
 0x160   :  { %v4441_v58 = vpop.f32.mrf.mxu0  ;;  %v4443_v50 = vpop.f32.mrf.mxu1  ;;  %3424 = vmatmul.mubr.msk.bf16.gmra.mxu0 %vm194_vm3, %v3643_v33  ;;  %3526 = vmatmul.mubr.msk.bf16.gmra.mxu1 %vm194_vm3, %v3644_v36  ;;  %v3645_v33 = vld [vmem:[%s4858_s0 + $0x220] sm:$0xff]  }
 0x161   :  { %4946 = vst [vmem:[#allocation32_spill] sm:$0xff] %v4441_v58  ;;  %4947 = vst [vmem:[#allocation33_spill] sm:$0xff] %v4443_v50  ;;  %3427 = vmatprep.mubr.msk.bf16.mxu0 %vm3659_vm2, %v4927_v44  ;;  %3529 = vmatprep.mubr.msk.bf16.mxu1 %vm3659_vm2, %v4927_v44  ;;  %v3646_v36 = vld [vmem:[%s4858_s0 + $0x2e4] sm:$0xff]  }
 0x162   :  { %v3225_v26 = vpop.f32.mrf.mxu0  ;;  %v3327_v32 = vpop.f32.mrf.mxu1 }
 0x164   :  { %v4453_v19 = vpop.f32.mrf.mxu0  ;;  %v4455_v7 = vpop.f32.mrf.mxu1 }
 0x165   :  { %4948 = vst [vmem:[#allocation34_spill] sm:$0xff] %v4453_v19  ;;  %4949 = vst [vmem:[#allocation35_spill] sm:$0xff] %v4455_v7 }
 0x166   :  { %v3226_v50 = vpop.f32.mrf.mxu0  ;;  %v3328_v58 = vpop.f32.mrf.mxu1 }
 0x168   :  { %v4465_v0 = vpop.f32.mrf.mxu0  ;;  %v4467_v26 = vpop.f32.mrf.mxu1  ;;  %3428 = vmatmul.mubr.msk.bf16.gmra.mxu0 %vm194_vm3, %v3645_v33  ;;  %3530 = vmatmul.mubr.msk.bf16.gmra.mxu1 %vm194_vm3, %v3646_v36  ;;  %v3647_v33 = vld [vmem:[%s4858_s0 + $0x228] sm:$0xff]  }
 0x169   :  { %4950 = vst [vmem:[#allocation36_spill] sm:$0xff] %v4465_v0  ;;  %4951 = vst [vmem:[#allocation37_spill] sm:$0xff] %v4467_v26  ;;  %3431 = vmatprep.mubr.msk.bf16.mxu0 %vm3659_vm2, %v4927_v44  ;;  %3533 = vmatprep.mubr.msk.bf16.mxu1 %vm3659_vm2, %v4927_v44  ;;  %v3648_v36 = vld [vmem:[%s4858_s0 + $0x2ec] sm:$0xff]  }
 0x16a   :  { %v3229_v2 = vpop.f32.mrf.mxu0  ;;  %v3331_v50 = vpop.f32.mrf.mxu1 }
 0x16c   :  { %v4477_v58 = vpop.f32.mrf.mxu0  ;;  %v4479_v7 = vpop.f32.mrf.mxu1 }
 0x16d   :  { %4952 = vst [vmem:[#allocation38_spill] sm:$0xff] %v4477_v58  ;;  %4953 = vst [vmem:[#allocation39_spill] sm:$0xff] %v4479_v7 }
 0x16e   :  { %v3230_v26 = vpop.f32.mrf.mxu0  ;;  %v3332_v0 = vpop.f32.mrf.mxu1 }
 0x170   :  { %v4489_v19 = vpop.f32.mrf.mxu0  ;;  %v4491_v2 = vpop.f32.mrf.mxu1  ;;  %3432 = vmatmul.mubr.msk.bf16.gmra.mxu0 %vm194_vm3, %v3647_v33  ;;  %3534 = vmatmul.mubr.msk.bf16.gmra.mxu1 %vm194_vm3, %v3648_v36  ;;  %v3649_v33 = vld [vmem:[%s4858_s0 + $0x230] sm:$0xff]  }
 0x171   :  { %4954 = vst [vmem:[#allocation40_spill] sm:$0xff] %v4489_v19  ;;  %4955 = vst [vmem:[#allocation41_spill] sm:$0xff] %v4491_v2  ;;  %3435 = vmatprep.mubr.msk.bf16.mxu0 %vm3659_vm2, %v4927_v44  ;;  %3537 = vmatprep.mubr.msk.bf16.mxu1 %vm3659_vm2, %v4927_v44  ;;  %v3650_v36 = vld [vmem:[%s4858_s0 + $0x2f4] sm:$0xff]  }
 0x172   :  { %v3233_v32 = vpop.f32.mrf.mxu0  ;;  %v3335_v26 = vpop.f32.mrf.mxu1 }
 0x174   :  { %v4501_v0 = vpop.f32.mrf.mxu0  ;;  %v4503_v7 = vpop.f32.mrf.mxu1 }
 0x175   :  { %4956 = vst [vmem:[#allocation42_spill] sm:$0xff] %v4501_v0  ;;  %4957 = vst [vmem:[#allocation43_spill] sm:$0xff] %v4503_v7 }
 0x176   :  { %v3234_v2 = vpop.f32.mrf.mxu0  ;;  %v3336_v19 = vpop.f32.mrf.mxu1 }
 0x178   :  { %v4513_v58 = vpop.f32.mrf.mxu0  ;;  %v4515_v32 = vpop.f32.mrf.mxu1  ;;  %3436 = vmatmul.mubr.msk.bf16.gmra.mxu0 %vm194_vm3, %v3649_v33  ;;  %3538 = vmatmul.mubr.msk.bf16.gmra.mxu1 %vm194_vm3, %v3650_v36  ;;  %v3651_v33 = vld [vmem:[%s4858_s0 + $0x238] sm:$0xff]  }
 0x179   :  { %4958 = vst [vmem:[#allocation44_spill] sm:$0xff] %v4513_v58  ;;  %4959 = vst [vmem:[#allocation45_spill] sm:$0xff] %v4515_v32  ;;  %3439 = vmatprep.mubr.msk.bf16.mxu0 %vm3659_vm2, %v4927_v44  ;;  %3541 = vmatprep.mubr.msk.bf16.mxu1 %vm3659_vm2, %v4927_v44  ;;  %v3652_v36 = vld [vmem:[%s4858_s0 + $0x2fc] sm:$0xff]  }
 0x17a   :  { %v3237_v50 = vpop.f32.mrf.mxu0  ;;  %v3339_v2 = vpop.f32.mrf.mxu1 }
 0x17c   :  { %v4525_v19 = vpop.f32.mrf.mxu0  ;;  %v4527_v7 = vpop.f32.mrf.mxu1 }
 0x17d   :  { %4960 = vst [vmem:[#allocation46_spill] sm:$0xff] %v4525_v19  ;;  %4961 = vst [vmem:[#allocation47_spill] sm:$0xff] %v4527_v7 }
 0x17e   :  { %v3238_v32 = vpop.f32.mrf.mxu0  ;;  %v3340_v58 = vpop.f32.mrf.mxu1 }
 0x180   :  { %v4537_v0 = vpop.f32.mrf.mxu0  ;;  %v4539_v50 = vpop.f32.mrf.mxu1  ;;  %3440 = vmatmul.mubr.msk.bf16.gmra.mxu0 %vm194_vm3, %v3651_v33  ;;  %3542 = vmatmul.mubr.msk.bf16.gmra.mxu1 %vm194_vm3, %v3652_v36  ;;  %v3653_v33 = vld [vmem:[%s4858_s0 + $0x240] sm:$0xff]  }
 0x181   :  { %4962 = vst [vmem:[#allocation48_spill] sm:$0xff] %v4537_v0  ;;  %4963 = vst [vmem:[#allocation49_spill] sm:$0xff] %v4539_v50  ;;  %3443 = vmatprep.mubr.msk.bf16.mxu0 %vm3659_vm2, %v4927_v44  ;;  %3545 = vmatprep.mubr.msk.bf16.mxu1 %vm3659_vm2, %v4927_v44  ;;  %v3654_v36 = vld [vmem:[%s4858_s0 + $0x304] sm:$0xff]  }
 0x182   :  { %v3241_v26 = vpop.f32.mrf.mxu0  ;;  %v3343_v32 = vpop.f32.mrf.mxu1 }
 0x184   :  { %v4549_v58 = vpop.f32.mrf.mxu0  ;;  %v4551_v7 = vpop.f32.mrf.mxu1 }
 0x185   :  { %4964 = vst [vmem:[#allocation50_spill] sm:$0xff] %v4549_v58  ;;  %4965 = vst [vmem:[#allocation51_spill] sm:$0xff] %v4551_v7  ;;  %v3655_v58 = vld [vmem:[%s4858_s0 + $0x248] ss:$0 sps:$4 sm:$0xff]  }
 0x186   :  { %v3242_v50 = vpop.f32.mrf.mxu0  ;;  %v3344_v0 = vpop.f32.mrf.mxu1 }
 0x188   :  { %v4561_v19 = vpop.f32.mrf.mxu0  ;;  %v4563_v26 = vpop.f32.mrf.mxu1  ;;  %3444 = vmatmul.mubr.msk.bf16.gmra.mxu0 %vm194_vm3, %v3653_v33  ;;  %3546 = vmatmul.mubr.msk.bf16.gmra.mxu1 %vm194_vm3, %v3654_v36  ;;  %v3656_v33 = vld [vmem:[%s4858_s0 + $0x30c] ss:$0 sps:$4 sm:$0xff]  }
 0x189   :  { %4966 = vst [vmem:[#allocation52_spill] sm:$0xff] %v4561_v19  ;;  %4967 = vst [vmem:[#allocation53_spill] sm:$0xff] %v4563_v26  ;;  %3447 = vmatprep.mubr.msk.bf16.mxu0 %vm3659_vm2, %v4927_v44  ;;  %3549 = vmatprep.mubr.msk.bf16.mxu1 %vm3659_vm2, %v4927_v44  ;;  %v4968_v44 = vmax.f32 %v3985_v56, %v3988_v57 }
 0x18a   :  { %v3245_v2 = vpop.f32.mrf.mxu0  ;;  %v3347_v50 = vpop.f32.mrf.mxu1 }
 0x18c   :  { %v506_v0 = vpop.f32.mrf.mxu0  ;;  %v986_v7 = vpop.f32.mrf.mxu1 }
 0x18e   :  { %v3246_v36 = vpop.f32.mrf.mxu0  ;;  %v3348_v32 = vpop.f32.mrf.mxu1 }
 0x190   :  { %v1320_v26 = vpop.f32.mrf.mxu0  ;;  %3448 = vmatmul.mubr.msk.bf16.gmra.mxu0 %vm194_vm3, %v3655_v58  ;;  %v1849_v19 = vpop.f32.mrf.mxu1  ;;  %3550 = vmatmul.mubr.msk.bf16.gmra.mxu1 %vm194_vm3, %v3656_v33  ;;  %v4969_v58 = vmax.f32 %v3997_v61, %v3999_v62 }
 0x191   :  { %v1518_v7 = vmax.f32 %v4968_v44, %v1320_v26  ;;  %v4970_v44 = vmax.f32 %v4009_v5, %v4011_v6 }
 0x192   :  { %v3353_v2 = vpop.f32.mrf.mxu0  ;;  %v3455_v50 = vpop.f32.mrf.mxu1 }
 0x193   :  { %v2047_v0 = vmax.f32 %v1518_v7, %v1849_v19 }
 0x194   :  { %v1323_v36 = vpop.f32.mrf.mxu0  ;;  %v1852_v32 = vpop.f32.mrf.mxu1 }
 0x195   :  { %v1519_v31 = vmax.f32 %v4969_v58, %v1323_v36  ;;  %v2103_v21 = vadd.f32 %v4587_v14, %v2047_v0  ;;  %v4971_v0 = vmax.f32 %v4021_v10, %v4023_v11 }
 0x196   :  { %v3354_v43 = vpop.f32.mrf.mxu0  ;;  %v3456_v33 = vpop.f32.mrf.mxu1 }
 0x197   :  { %v2048_v56 = vmax.f32 %v1519_v31, %v1852_v32  ;;  %v2152_v38 = vmax.f32 %v2103_v21, 0.0 }
 0x198   :  { %v1328_v57 = vpop.f32.mrf.mxu0  ;;  %v1857_v26 = vpop.f32.mrf.mxu1 }
 0x199   :  { %v2104_v19 = vadd.f32 %v4587_v14, %v2048_v56  ;;  %v1520_v7 = vmax.f32 %v4970_v44, %v1328_v57 }
 0x19a   :  { %v3357_v2 = vpop.f32.mrf.mxu0  ;;  %v3459_v50 = vpop.f32.mrf.mxu1 }
 0x19b   :  { %v2153_v55 = vmax.f32 %v2104_v19, 0.0  ;;  %v2049_v16 = vmax.f32 %v1520_v7, %v1857_v26 }
 0x19c   :  { %v1331_v61 = vpop.f32.mrf.mxu0  ;;  %v1860_v62 = vpop.f32.mrf.mxu1 }
 0x19d   :  { %v2901_v43 = vpack.c.bf16 %v2153_v55, %v2152_v38  ;;  %v1521_v31 = vmax.f32 %v4971_v0, %v1331_v61  ;;  %v2105_v5 = vadd.f32 %v4587_v14, %v2049_v16  ;;  %v4972_v38 = vmax.f32 %v4033_v17, %v4035_v18 }
 0x19e   :  { %v3358_v36 = vpop.f32.mrf.mxu0  ;;  %v3460_v32 = vpop.f32.mrf.mxu1  ;;  %v4973_v16 = vmax.f32 %v4045_v22, %v4047_v23 }
 0x19f   :  { %2902 = vst [vmem:[%s4860_s3] sm:$0xff] %v2901_v43   ;;  %v2050_v6 = vmax.f32 %v1521_v31, %v1860_v62  ;;  %v2154_v11 = vmax.f32 %v2105_v5, 0.0  ;;  %v4974_v31 = vmax.f32 %v4057_v29, %v4059_v30 }
 0x1a0   :  { %v1336_v58 = vpop.f32.mrf.mxu0  ;;  %v1865_v21 = vpop.f32.mrf.mxu1 }
 0x1a1   :  { %v2106_v33 = vadd.f32 %v4587_v14, %v2050_v6  ;;  %v1522_v55 = vmax.f32 %v4972_v38, %v1336_v58  ;;  %v4975_v38 = vmax.f32 %v4069_v34, %v4071_v35 }
 0x1a2   :  { %v3361_v56 = vpop.f32.mrf.mxu0  ;;  %v3463_v10 = vpop.f32.mrf.mxu1 }
 0x1a3   :  { %v2155_v57 = vmax.f32 %v2106_v33, 0.0  ;;  %v2051_v26 = vmax.f32 %v1522_v55, %v1865_v21 }
 0x1a4   :  { %v1339_v19 = vpop.f32.mrf.mxu0  ;;  %v1868_v44 = vpop.f32.mrf.mxu1 }
 0x1a5   :  { %v2906_v7 = vpack.c.bf16 %v2155_v57, %v2154_v11  ;;  %v1523_v2 = vmax.f32 %v4973_v16, %v1339_v19  ;;  %v2107_v17 = vadd.f32 %v4587_v14, %v2051_v26  ;;  %v4976_v19 = vmax.f32 %v4081_v41, %v4083_v42 }
 0x1a6   :  { %v3362_v50 = vpop.f32.mrf.mxu0  ;;  %v3464_v61 = vpop.f32.mrf.mxu1 }
 0x1a7   :  { %3018 = vst [vmem:[%s4860_s3 + $0x8] sm:$0xff] %v2906_v7   ;;  %v2052_v18 = vmax.f32 %v1523_v2, %v1868_v44  ;;  %v2156_v23 = vmax.f32 %v2107_v17, 0.0 }
 0x1a8   :  { %v1344_v62 = vpop.f32.mrf.mxu0  ;;  %v1873_v43 = vpop.f32.mrf.mxu1 }
 0x1a9   :  { %v2108_v0 = vadd.f32 %v4587_v14, %v2052_v18  ;;  %v1524_v36 = vmax.f32 %v4974_v31, %v1344_v62  ;;  %v4977_v18 = vmax.f32 %v4093_v46, %v4095_v47 }
 0x1aa   :  { %v3365_v32 = vpop.f32.mrf.mxu0  ;;  %v3467_v22 = vpop.f32.mrf.mxu1 }
 0x1ab   :  { %v2157_v5 = vmax.f32 %v2108_v0, 0.0  ;;  %v2053_v6 = vmax.f32 %v1524_v36, %v1873_v43  ;;  %v4978_v22 = vmax.f32 %v4105_v53, %v4107_v54 }
 0x1ac   :  { %v1347_v58 = vpop.f32.mrf.mxu0  ;;  %v1876_v21 = vpop.f32.mrf.mxu1 }
 0x1ad   :  { %v2911_v33 = vpack.c.bf16 %v2157_v5, %v2156_v23  ;;  %v1525_v55 = vmax.f32 %v4975_v38, %v1347_v58  ;;  %v2109_v29 = vadd.f32 %v4587_v14, %v2053_v6 }
 0x1ae   :  { %v3366_v56 = vpop.f32.mrf.mxu0  ;;  %v3468_v10 = vpop.f32.mrf.mxu1 }
 0x1af   :  { %3019 = vst [vmem:[%s4860_s3 + $0x10] sm:$0xff] %v2911_v33   ;;  %v2054_v30 = vmax.f32 %v1525_v55, %v1876_v21  ;;  %v2158_v35 = vmax.f32 %v2109_v29, 0.0  ;;  %v4979_v55 = vmax.f32 %v4117_v63, %v4119_v1 }
 0x1b0   :  { %v1352_v11 = vpop.f32.mrf.mxu0  ;;  %v1881_v57 = vpop.f32.mrf.mxu1 }
 0x1b1   :  { %v2110_v26 = vadd.f32 %v4587_v14, %v2054_v30  ;;  %v1526_v44 = vmax.f32 %v4976_v19, %v1352_v11 }
 0x1b2   :  { %v3369_v7 = vpop.f32.mrf.mxu0  ;;  %v3471_v34 = vpop.f32.mrf.mxu1 }
 0x1b3   :  { %v2159_v16 = vmax.f32 %v2110_v26, 0.0  ;;  %v2055_v2 = vmax.f32 %v1526_v44, %v1881_v57  ;;  %v4980_v26 = vmax.f32 %v4129_v13, %v4131_v15 }
 0x1b4   :  { %v1355_v50 = vpop.f32.mrf.mxu0  ;;  %v1884_v61 = vpop.f32.mrf.mxu1 }
 0x1b5   :  { %v2916_v17 = vpack.c.bf16 %v2159_v16, %v2158_v35  ;;  %v1527_v62 = vmax.f32 %v4977_v18, %v1355_v50  ;;  %v2111_v41 = vadd.f32 %v4587_v14, %v2055_v2  ;;  %v4981_v50 = vmax.f32 %v4141_v24, %v4143_v25 }
 0x1b6   :  { %v3370_v43 = vpop.f32.mrf.mxu0  ;;  %v3472_v0 = vpop.f32.mrf.mxu1 }
 0x1b7   :  { %3020 = vst [vmem:[%s4860_s3 + $0x18] sm:$0xff] %v2916_v17   ;;  %v2056_v42 = vmax.f32 %v1527_v62, %v1884_v61  ;;  %v2160_v47 = vmax.f32 %v2111_v41, 0.0  ;;  %v4982_v41 = vmax.f32 %v4153_v37, %v4155_v39 }
 0x1b8   :  { %v1360_v31 = vpop.f32.mrf.mxu0  ;;  %v1889_v36 = vpop.f32.mrf.mxu1 }
 0x1b9   :  { %v2112_v32 = vadd.f32 %v4587_v14, %v2056_v42  ;;  %v1528_v23 = vmax.f32 %v4978_v22, %v1360_v31 }
 0x1ba   :  { %v3373_v5 = vpop.f32.mrf.mxu0  ;;  %v3475_v46 = vpop.f32.mrf.mxu1 }
 0x1bb   :  { %v2161_v6 = vmax.f32 %v2112_v32, 0.0  ;;  %v2057_v58 = vmax.f32 %v1528_v23, %v1889_v36  ;;  %v4983_v46 = vmax.f32 %v4165_v48, %v4167_v49 }
 0x1bc   :  { %v1363_v21 = vpop.f32.mrf.mxu0  ;;  %v1892_v33 = vpop.f32.mrf.mxu1 }
 0x1bd   :  { %v2921_v38 = vpack.c.bf16 %v2161_v6, %v2160_v47  ;;  %v1529_v56 = vmax.f32 %v4979_v55, %v1363_v21  ;;  %v2113_v53 = vadd.f32 %v4587_v14, %v2057_v58  ;;  %v4984_v55 = vmax.f32 %v4177_v4, %v4179_v9 }
 0x1be   :  { %v3374_v10 = vpop.f32.mrf.mxu0  ;;  %v3476_v29 = vpop.f32.mrf.mxu1 }
 0x1bf   :  { %3021 = vst [vmem:[%s4860_s3 + $0x20] sm:$0xff] %v2921_v38   ;;  %v2058_v54 = vmax.f32 %v1529_v56, %v1892_v33  ;;  %v2162_v1 = vmax.f32 %v2113_v53, 0.0 }
 0x1c0   :  { %v1368_v30 = vpop.f32.mrf.mxu0  ;;  %v1897_v11 = vpop.f32.mrf.mxu1 }
 0x1c1   :  { %v2114_v57 = vadd.f32 %v4587_v14, %v2058_v54  ;;  %v1530_v19 = vmax.f32 %v4980_v26, %v1368_v30 }
 0x1c2   :  { %v3377_v44 = vpop.f32.mrf.mxu0  ;;  %v3479_v63 = vpop.f32.mrf.mxu1 }
 0x1c3   :  { %v2163_v7 = vmax.f32 %v2114_v57, 0.0  ;;  %v2059_v34 = vmax.f32 %v1530_v19, %v1897_v11  ;;  %v4985_v57 = vmax.f32 %v4189_v27, %v4191_v28 }
 0x1c4   :  { %v1371_v35 = vpop.f32.mrf.mxu0  ;;  %v1900_v16 = vpop.f32.mrf.mxu1 }
 0x1c5   :  { %v2926_v2 = vpack.c.bf16 %v2163_v7, %v2162_v1  ;;  %v1531_v61 = vmax.f32 %v4981_v50, %v1371_v35  ;;  %v2115_v13 = vadd.f32 %v4587_v14, %v2059_v34  ;;  %v4986_v34 = vmax.f32 %v4201_v52, %v4203_v60 }
 0x1c6   :  { %v3378_v17 = vpop.f32.mrf.mxu0  ;;  %v3480_v18 = vpop.f32.mrf.mxu1 }
 0x1c7   :  { %3022 = vst [vmem:[%s4860_s3 + $0x28] sm:$0xff] %v2926_v2   ;;  %v2060_v15 = vmax.f32 %v1531_v61, %v1900_v16  ;;  %v2164_v25 = vmax.f32 %v2115_v13, 0.0  ;;  %v4987_v13 = vmax.f32 %v4213_v45, %v4215_v51 }
 0x1c8   :  { %v1376_v62 = vpop.f32.mrf.mxu0  ;;  %v1905_v43 = vpop.f32.mrf.mxu1 }
 0x1c9   :  { %v2116_v0 = vadd.f32 %v4587_v14, %v2060_v15  ;;  %v1532_v42 = vmax.f32 %v4982_v41, %v1376_v62 }
 0x1ca   :  { %v3381_v31 = vpop.f32.mrf.mxu0  ;;  %v3483_v24 = vpop.f32.mrf.mxu1 }
 0x1cb   :  { %v2165_v36 = vmax.f32 %v2116_v0, 0.0  ;;  %v2061_v32 = vmax.f32 %v1532_v42, %v1905_v43  ;;  %v4988_v31 = vmax.f32 %v4225_v59, %v4227_v20 }
 0x1cc   :  { %v1379_v22 = vpop.f32.mrf.mxu0  ;;  %v1908_v23 = vpop.f32.mrf.mxu1 }
 0x1cd   :  { %v2931_v5 = vpack.c.bf16 %v2165_v36, %v2164_v25  ;;  %v1533_v47 = vmax.f32 %v4983_v46, %v1379_v22  ;;  %v2117_v37 = vadd.f32 %v4587_v14, %v2061_v32  ;;  %v4989_v46 = vmax.f32 %v4237_v12, %v4239_v40 }
 0x1ce   :  { %v3382_v6 = vpop.f32.mrf.mxu0  ;;  %v3484_v58 = vpop.f32.mrf.mxu1 }
 0x1cf   :  { %3023 = vst [vmem:[%s4860_s3 + $0x30] sm:$0xff] %v2931_v5   ;;  %v2062_v39 = vmax.f32 %v1533_v47, %v1908_v23  ;;  %v2166_v49 = vmax.f32 %v2117_v37, 0.0 }
 0x1d0   :  { %v1384_v21 = vpop.f32.mrf.mxu0  ;;  %v1913_v33 = vpop.f32.mrf.mxu1 }
 0x1d1   :  { %v2118_v38 = vadd.f32 %v4587_v14, %v2062_v39  ;;  %v1534_v56 = vmax.f32 %v4984_v55, %v1384_v21 }
 0x1d2   :  { %v3385_v10 = vpop.f32.mrf.mxu0  ;;  %v3487_v48 = vpop.f32.mrf.mxu1 }
 0x1d3   :  { %v2167_v29 = vmax.f32 %v2118_v38, 0.0  ;;  %v2063_v53 = vmax.f32 %v1534_v56, %v1913_v33  ;;  %v4990_v33 = vmax.f32 %v4249_v8, %v4251_v3 }
 0x1d4   :  { %v1387_v54 = vpop.f32.mrf.mxu0  ;;  %v1916_v30 = vpop.f32.mrf.mxu1 }
 0x1d5   :  { %v2936_v11 = vpack.c.bf16 %v2167_v29, %v2166_v49  ;;  %v1535_v26 = vmax.f32 %v4985_v57, %v1387_v54  ;;  %v2119_v4 = vadd.f32 %v4587_v14, %v2063_v53  ;;  %v4991_v53 = vld [vmem:[#allocation2_spill] sm:$0xff]  ;;  %v4992_v54 = vld [vmem:[#allocation3_spill] sm:$0xff] }
 0x1d6   :  { %v3386_v19 = vpop.f32.mrf.mxu0  ;;  %v3488_v44 = vpop.f32.mrf.mxu1 }
 0x1d7   :  { %3024 = vst [vmem:[%s4860_s3 + $0x38] sm:$0xff] %v2936_v11   ;;  %v2064_v9 = vmax.f32 %v1535_v26, %v1916_v30  ;;  %v2168_v28 = vmax.f32 %v2119_v4, 0.0  ;;  %v4993_v30 = vmax.f32 %v4991_v53, %v4992_v54 }
 0x1d8   :  { %v1392_v63 = vpop.f32.mrf.mxu0  ;;  %v1921_v1 = vpop.f32.mrf.mxu1 }
 0x1d9   :  { %v2120_v7 = vadd.f32 %v4587_v14, %v2064_v9  ;;  %v1536_v35 = vmax.f32 %v4986_v34, %v1392_v63  ;;  %v4994_v9 = vld [vmem:[#allocation4_spill] sm:$0xff]  ;;  %v4995_v63 = vld [vmem:[#allocation5_spill] sm:$0xff] }
 0x1da   :  { %v3389_v16 = vpop.f32.mrf.mxu0  ;;  %v3491_v27 = vpop.f32.mrf.mxu1 }
 0x1db   :  { %v2169_v2 = vmax.f32 %v2120_v7, 0.0  ;;  %v2065_v50 = vmax.f32 %v1536_v35, %v1921_v1  ;;  %v4996_v1 = vmax.f32 %v4994_v9, %v4995_v63 }
 0x1dc   :  { %v1395_v61 = vpop.f32.mrf.mxu0  ;;  %v1924_v17 = vpop.f32.mrf.mxu1 }
 0x1dd   :  { %v2941_v18 = vpack.c.bf16 %v2169_v2, %v2168_v28  ;;  %v1537_v15 = vmax.f32 %v4987_v13, %v1395_v61  ;;  %v2121_v52 = vadd.f32 %v4587_v14, %v2065_v50 }
 0x1de   :  { %v3390_v62 = vpop.f32.mrf.mxu0  ;;  %v3492_v43 = vpop.f32.mrf.mxu1 }
 0x1df   :  { %3025 = vst [vmem:[%s4860_s3 + $0x40] sm:$0xff] %v2941_v18   ;;  %v2066_v60 = vmax.f32 %v1537_v15, %v1924_v17  ;;  %v2170_v51 = vmax.f32 %v2121_v52, 0.0  ;;  %v4997_v17 = vld [vmem:[#allocation6_spill] sm:$0xff]  ;;  %v4998_v18 = vld [vmem:[#allocation7_spill] sm:$0xff] }
 0x1e0   :  { %v1400_v0 = vpop.f32.mrf.mxu0  ;;  %v1929_v41 = vpop.f32.mrf.mxu1  ;;  %v4999_v13 = vmax.f32 %v4997_v17, %v4998_v18 }
 0x1e1   :  { %v2122_v42 = vadd.f32 %v4587_v14, %v2066_v60  ;;  %v1538_v24 = vmax.f32 %v4988_v31, %v1400_v0  ;;  %v5000_v31 = vld [vmem:[#allocation8_spill] sm:$0xff] }
 0x1e2   :  { %v3393_v25 = vpop.f32.mrf.mxu0  ;;  %v3495_v45 = vpop.f32.mrf.mxu1 }
 0x1e3   :  { %v2171_v36 = vmax.f32 %v2122_v42, 0.0  ;;  %v2067_v32 = vmax.f32 %v1538_v24, %v1929_v41  ;;  %v5001_v24 = vld [vmem:[#allocation9_spill] sm:$0xff] }
 0x1e4   :  { %v1403_v22 = vpop.f32.mrf.mxu0  ;;  %v1932_v23 = vpop.f32.mrf.mxu1  ;;  %v5002_v25 = vmax.f32 %v5000_v31, %v5001_v24 }
 0x1e5   :  { %v2946_v5 = vpack.c.bf16 %v2171_v36, %v2170_v51  ;;  %v1539_v47 = vmax.f32 %v4989_v46, %v1403_v22  ;;  %v2123_v59 = vadd.f32 %v4587_v14, %v2067_v32 }
 0x1e6   :  { %v3394_v6 = vpop.f32.mrf.mxu0  ;;  %v3496_v58 = vpop.f32.mrf.mxu1 }
 0x1e7   :  { %3026 = vst [vmem:[%s4860_s3 + $0x48] sm:$0xff] %v2946_v5   ;;  %v2068_v20 = vmax.f32 %v1539_v47, %v1932_v23  ;;  %v2172_v12 = vmax.f32 %v2123_v59, 0.0  ;;  %v5003_v6 = vld [vmem:[#allocation10_spill] sm:$0xff]  ;;  %v5004_v58 = vld [vmem:[#allocation11_spill] sm:$0xff] }
 0x1e8   :  { %v1408_v37 = vpop.f32.mrf.mxu0  ;;  %v1937_v39 = vpop.f32.mrf.mxu1  ;;  %v5005_v59 = vmax.f32 %v5003_v6, %v5004_v58 }
 0x1e9   :  { %v2124_v21 = vadd.f32 %v4587_v14, %v2068_v20  ;;  %v1540_v38 = vmax.f32 %v4990_v33, %v1408_v37 }
 0x1ea   :  { %v3397_v55 = vpop.f32.mrf.mxu0  ;;  %v3499_v40 = vpop.f32.mrf.mxu1 }
 0x1eb   :  { %v2173_v56 = vmax.f32 %v2124_v21, 0.0  ;;  %v2069_v10 = vmax.f32 %v1540_v38, %v1937_v39 }
 0x1ec   :  { %v1411_v48 = vpop.f32.mrf.mxu0  ;;  %v1940_v49 = vpop.f32.mrf.mxu1 }
 0x1ed   :  { %v2951_v29 = vpack.c.bf16 %v2173_v56, %v2172_v12  ;;  %v1541_v11 = vmax.f32 %v4993_v30, %v1411_v48  ;;  %v2125_v8 = vadd.f32 %v4587_v14, %v2069_v10  ;;  %v5006_v12 = vld [vmem:[#allocation12_spill] sm:$0xff]  ;;  %v5007_v56 = vld [vmem:[#allocation13_spill] sm:$0xff] }
 0x1ee   :  { %v3398_v57 = vpop.f32.mrf.mxu0  ;;  %v3500_v26 = vpop.f32.mrf.mxu1  ;;  %v5008_v10 = vmax.f32 %v5006_v12, %v5007_v56 }
 0x1ef   :  { %3027 = vst [vmem:[%s4860_s3 + $0x50] sm:$0xff] %v2951_v29   ;;  %v2070_v3 = vmax.f32 %v1541_v11, %v1940_v49  ;;  %v2174_v16 = vmax.f32 %v2125_v8, 0.0  ;;  %v5009_v8 = vld [vmem:[#allocation14_spill] sm:$0xff] }
 0x1f0   :  { %v1416_v19 = vpop.f32.mrf.mxu0  ;;  %v1945_v44 = vpop.f32.mrf.mxu1 }
 0x1f1   :  { %v2126_v4 = vadd.f32 %v4587_v14, %v2070_v3  ;;  %v1542_v7 = vmax.f32 %v4996_v1, %v1416_v19  ;;  %v5010_v3 = vld [vmem:[#allocation15_spill] sm:$0xff] }
 0x1f2   :  { %v3401_v34 = vpop.f32.mrf.mxu0  ;;  %v3503_v35 = vpop.f32.mrf.mxu1  ;;  %v5011_v19 = vmax.f32 %v5009_v8, %v5010_v3 }
 0x1f3   :  { %v2175_v27 = vmax.f32 %v2126_v4, 0.0  ;;  %v2071_v28 = vmax.f32 %v1542_v7, %v1945_v44 }
 0x1f4   :  { %v1419_v2 = vpop.f32.mrf.mxu0  ;;  %v1948_v50 = vpop.f32.mrf.mxu1 }
 0x1f5   :  { %v2956_v61 = vpack.c.bf16 %v2175_v27, %v2174_v16  ;;  %v1543_v15 = vmax.f32 %v4999_v13, %v1419_v2  ;;  %v2127_v52 = vadd.f32 %v4587_v14, %v2071_v28  ;;  %v5012_v16 = vld [vmem:[#allocation16_spill] sm:$0xff]  ;;  %v5013_v27 = vld [vmem:[#allocation17_spill] sm:$0xff] }
 0x1f6   :  { %v3402_v62 = vpop.f32.mrf.mxu0  ;;  %v3504_v43 = vpop.f32.mrf.mxu1  ;;  %v5014_v28 = vmax.f32 %v5012_v16, %v5013_v27 }
 0x1f7   :  { %3028 = vst [vmem:[%s4860_s3 + $0x58] sm:$0xff] %v2956_v61   ;;  %v2072_v60 = vmax.f32 %v1543_v15, %v1948_v50  ;;  %v2176_v32 = vmax.f32 %v2127_v52, 0.0  ;;  %v5015_v52 = vld [vmem:[#allocation18_spill] sm:$0xff] }
 0x1f8   :  { %v1424_v0 = vpop.f32.mrf.mxu0  ;;  %v1953_v41 = vpop.f32.mrf.mxu1 }
 0x1f9   :  { %v2128_v42 = vadd.f32 %v4587_v14, %v2072_v60  ;;  %v1544_v45 = vmax.f32 %v5002_v25, %v1424_v0  ;;  %v5016_v60 = vld [vmem:[#allocation19_spill] sm:$0xff] }
 0x1fa   :  { %v3405_v51 = vpop.f32.mrf.mxu0  ;;  %v3507_v36 = vpop.f32.mrf.mxu1  ;;  %v5017_v0 = vmax.f32 %v5015_v52, %v5016_v60 }
 0x1fb   :  { %v2177_v22 = vmax.f32 %v2128_v42, 0.0  ;;  %v2073_v23 = vmax.f32 %v1544_v45, %v1953_v41 }
 0x1fc   :  { %v1427_v5 = vpop.f32.mrf.mxu0  ;;  %v1956_v46 = vpop.f32.mrf.mxu1 }
 0x1fd   :  { %v2961_v47 = vpack.c.bf16 %v2177_v22, %v2176_v32  ;;  %v1545_v20 = vmax.f32 %v5005_v59, %v1427_v5  ;;  %v2129_v21 = vadd.f32 %v4587_v14, %v2073_v23  ;;  %v5018_v32 = vld [vmem:[#allocation20_spill] sm:$0xff]  ;;  %v5019_v22 = vld [vmem:[#allocation21_spill] sm:$0xff] }
 0x1fe   :  { %v3406_v37 = vpop.f32.mrf.mxu0  ;;  %v3508_v39 = vpop.f32.mrf.mxu1  ;;  %v5020_v23 = vmax.f32 %v5018_v32, %v5019_v22 }
 0x1ff   :  { %3029 = vst [vmem:[%s4860_s3 + $0x60] sm:$0xff] %v2961_v47   ;;  %v2074_v33 = vmax.f32 %v1545_v20, %v1956_v46  ;;  %v2178_v53 = vmax.f32 %v2129_v21, 0.0  ;;  %v5021_v21 = vld [vmem:[#allocation22_spill] sm:$0xff] }
 0x200   :  { %v1432_v38 = vpop.f32.mrf.mxu0  ;;  %v1961_v55 = vpop.f32.mrf.mxu1 }
 0x201   :  { %v2130_v40 = vadd.f32 %v4587_v14, %v2074_v33  ;;  %v1546_v48 = vmax.f32 %v5008_v10, %v1432_v38  ;;  %v5022_v33 = vld [vmem:[#allocation23_spill] sm:$0xff] }
 0x202   :  { %v3409_v49 = vpop.f32.mrf.mxu0  ;;  %v3511_v29 = vpop.f32.mrf.mxu1  ;;  %v5023_v38 = vmax.f32 %v5021_v21, %v5022_v33 }
 0x203   :  { %v2179_v54 = vmax.f32 %v2130_v40, 0.0  ;;  %v2075_v30 = vmax.f32 %v1546_v48, %v1961_v55 }
 0x204   :  { %v1435_v11 = vpop.f32.mrf.mxu0  ;;  %v1964_v57 = vpop.f32.mrf.mxu1 }
 0x205   :  { %v2966_v26 = vpack.c.bf16 %v2179_v54, %v2178_v53  ;;  %v1547_v44 = vmax.f32 %v5011_v19, %v1435_v11  ;;  %v2131_v63 = vadd.f32 %v4587_v14, %v2075_v30  ;;  %v5024_v53 = vld [vmem:[#allocation24_spill] sm:$0xff]  ;;  %v5025_v54 = vld [vmem:[#allocation25_spill] sm:$0xff] }
 0x206   :  { %v3410_v4 = vpop.f32.mrf.mxu0  ;;  %v3512_v9 = vpop.f32.mrf.mxu1  ;;  %v5026_v30 = vmax.f32 %v5024_v53, %v5025_v54 }
 0x207   :  { %3030 = vst [vmem:[%s4860_s3 + $0x68] sm:$0xff] %v2966_v26   ;;  %v2076_v1 = vmax.f32 %v1547_v44, %v1964_v57  ;;  %v2180_v17 = vmax.f32 %v2131_v63, 0.0  ;;  %v5027_v63 = vld [vmem:[#allocation26_spill] sm:$0xff] }
 0x208   :  { %v1440_v7 = vpop.f32.mrf.mxu0  ;;  %v1969_v34 = vpop.f32.mrf.mxu1 }
 0x209   :  { %v2132_v35 = vadd.f32 %v4587_v14, %v2076_v1  ;;  %v1548_v2 = vmax.f32 %v5014_v28, %v1440_v7  ;;  %v5028_v1 = vld [vmem:[#allocation27_spill] sm:$0xff] }
 0x20a   :  { %v3413_v50 = vpop.f32.mrf.mxu0  ;;  %v3515_v61 = vpop.f32.mrf.mxu1  ;;  %v5029_v7 = vmax.f32 %v5027_v63, %v5028_v1 }
 0x20b   :  { %v2181_v18 = vmax.f32 %v2132_v35, 0.0  ;;  %v2077_v13 = vmax.f32 %v1548_v2, %v1969_v34 }
 0x20c   :  { %v1443_v15 = vpop.f32.mrf.mxu0  ;;  %v1972_v62 = vpop.f32.mrf.mxu1 }
 0x20d   :  { %v2971_v43 = vpack.c.bf16 %v2181_v18, %v2180_v17  ;;  %v1549_v41 = vmax.f32 %v5017_v0, %v1443_v15  ;;  %v2133_v24 = vadd.f32 %v4587_v14, %v2077_v13  ;;  %v5030_v17 = vld [vmem:[#allocation28_spill] sm:$0xff]  ;;  %v5031_v18 = vld [vmem:[#allocation29_spill] sm:$0xff] }
 0x20e   :  { %v3414_v42 = vpop.f32.mrf.mxu0  ;;  %v3516_v31 = vpop.f32.mrf.mxu1  ;;  %v5032_v13 = vmax.f32 %v5030_v17, %v5031_v18 }
 0x20f   :  { %3031 = vst [vmem:[%s4860_s3 + $0x70] sm:$0xff] %v2971_v43   ;;  %v2078_v25 = vmax.f32 %v1549_v41, %v1972_v62  ;;  %v2182_v6 = vmax.f32 %v2133_v24, 0.0  ;;  %v5033_v24 = vld [vmem:[#allocation30_spill] sm:$0xff] }
 0x210   :  { %v1448_v45 = vpop.f32.mrf.mxu0  ;;  %v1977_v51 = vpop.f32.mrf.mxu1 }
 0x211   :  { %v2134_v36 = vadd.f32 %v4587_v14, %v2078_v25  ;;  %v1550_v5 = vmax.f32 %v5020_v23, %v1448_v45  ;;  %v5034_v25 = vld [vmem:[#allocation31_spill] sm:$0xff] }
 0x212   :  { %v3417_v46 = vpop.f32.mrf.mxu0  ;;  %v3519_v47 = vpop.f32.mrf.mxu1  ;;  %v5035_v45 = vmax.f32 %v5033_v24, %v5034_v25 }
 0x213   :  { %v2183_v58 = vmax.f32 %v2134_v36, 0.0  ;;  %v2079_v59 = vmax.f32 %v1550_v5, %v1977_v51 }
 0x214   :  { %v1451_v20 = vpop.f32.mrf.mxu0  ;;  %v1980_v37 = vpop.f32.mrf.mxu1 }
 0x215   :  { %v2976_v39 = vpack.c.bf16 %v2183_v58, %v2182_v6  ;;  %v1551_v55 = vmax.f32 %v5023_v38, %v1451_v20  ;;  %v2135_v56 = vadd.f32 %v4587_v14, %v2079_v59  ;;  %v5036_v6 = vld [vmem:[#allocation32_spill] sm:$0xff]  ;;  %v5037_v58 = vld [vmem:[#allocation33_spill] sm:$0xff] }
 0x216   :  { %v3418_v40 = vpop.f32.mrf.mxu0  ;;  %v3520_v12 = vpop.f32.mrf.mxu1  ;;  %v5038_v59 = vmax.f32 %v5036_v6, %v5037_v58 }
 0x217   :  { %3032 = vst [vmem:[%s4860_s3 + $0x78] sm:$0xff] %v2976_v39   ;;  %v2080_v10 = vmax.f32 %v1551_v55, %v1980_v37  ;;  %v2184_v8 = vmax.f32 %v2135_v56, 0.0  ;;  %v5039_v56 = vld [vmem:[#allocation34_spill] sm:$0xff] }
 0x218   :  { %v1456_v48 = vpop.f32.mrf.mxu0  ;;  %v1985_v49 = vpop.f32.mrf.mxu1 }
 0x219   :  { %v2136_v29 = vadd.f32 %v4587_v14, %v2080_v10  ;;  %v1552_v11 = vmax.f32 %v5026_v30, %v1456_v48  ;;  %v5040_v10 = vld [vmem:[#allocation35_spill] sm:$0xff] }
 0x21a   :  { %v3421_v57 = vpop.f32.mrf.mxu0  ;;  %v3523_v26 = vpop.f32.mrf.mxu1  ;;  %v5041_v48 = vmax.f32 %v5039_v56, %v5040_v10 }
 0x21b   :  { %v2185_v3 = vmax.f32 %v2136_v29, 0.0  ;;  %v2081_v19 = vmax.f32 %v1552_v11, %v1985_v49 }
 0x21c   :  { %v1459_v44 = vpop.f32.mrf.mxu0  ;;  %v1988_v4 = vpop.f32.mrf.mxu1 }
 0x21d   :  { %v2981_v9 = vpack.c.bf16 %v2185_v3, %v2184_v8  ;;  %v1553_v34 = vmax.f32 %v5029_v7, %v1459_v44  ;;  %v2137_v27 = vadd.f32 %v4587_v14, %v2081_v19  ;;  %v5042_v8 = vld [vmem:[#allocation36_spill] sm:$0xff]  ;;  %v5043_v3 = vld [vmem:[#allocation37_spill] sm:$0xff] }
 0x21e   :  { %v3422_v35 = vpop.f32.mrf.mxu0  ;;  %v3524_v16 = vpop.f32.mrf.mxu1  ;;  %v5044_v19 = vmax.f32 %v5042_v8, %v5043_v3 }
 0x21f   :  { %3033 = vst [vmem:[%s4860_s3 + $0x80] sm:$0xff] %v2981_v9   ;;  %v2082_v28 = vmax.f32 %v1553_v34, %v1988_v4  ;;  %v2186_v52 = vmax.f32 %v2137_v27, 0.0  ;;  %v5045_v27 = vld [vmem:[#allocation38_spill] sm:$0xff] }
 0x220   :  { %v1464_v2 = vpop.f32.mrf.mxu0  ;;  %v1993_v50 = vpop.f32.mrf.mxu1 }
 0x221   :  { %v2138_v61 = vadd.f32 %v4587_v14, %v2082_v28  ;;  %v1554_v15 = vmax.f32 %v5032_v13, %v1464_v2  ;;  %v5046_v28 = vld [vmem:[#allocation39_spill] sm:$0xff] }
 0x222   :  { %v3425_v62 = vpop.f32.mrf.mxu0  ;;  %v3527_v43 = vpop.f32.mrf.mxu1  ;;  %v5047_v2 = vmax.f32 %v5045_v27, %v5046_v28 }
 0x223   :  { %v2187_v60 = vmax.f32 %v2138_v61, 0.0  ;;  %v2083_v0 = vmax.f32 %v1554_v15, %v1993_v50 }
 0x224   :  { %v1467_v41 = vpop.f32.mrf.mxu0  ;;  %v1996_v42 = vpop.f32.mrf.mxu1 }
 0x225   :  { %v2986_v31 = vpack.c.bf16 %v2187_v60, %v2186_v52  ;;  %v1555_v51 = vmax.f32 %v5035_v45, %v1467_v41  ;;  %v2139_v22 = vadd.f32 %v4587_v14, %v2083_v0  ;;  %v5048_v52 = vld [vmem:[#allocation40_spill] sm:$0xff]  ;;  %v5049_v60 = vld [vmem:[#allocation41_spill] sm:$0xff] }
 0x226   :  { %v3426_v36 = vpop.f32.mrf.mxu0  ;;  %v3528_v32 = vpop.f32.mrf.mxu1  ;;  %v5050_v0 = vmax.f32 %v5048_v52, %v5049_v60 }
 0x227   :  { %3034 = vst [vmem:[%s4860_s3 + $0x88] sm:$0xff] %v2986_v31   ;;  %v2084_v23 = vmax.f32 %v1555_v51, %v1996_v42  ;;  %v2188_v21 = vmax.f32 %v2139_v22, 0.0  ;;  %v5051_v22 = vld [vmem:[#allocation42_spill] sm:$0xff] }
 0x228   :  { %v1472_v5 = vpop.f32.mrf.mxu0  ;;  %v2001_v46 = vpop.f32.mrf.mxu1 }
 0x229   :  { %v2140_v47 = vadd.f32 %v4587_v14, %v2084_v23  ;;  %v1556_v20 = vmax.f32 %v5038_v59, %v1472_v5  ;;  %v5052_v23 = vld [vmem:[#allocation43_spill] sm:$0xff] }
 0x22a   :  { %v3429_v37 = vpop.f32.mrf.mxu0  ;;  %v3531_v39 = vpop.f32.mrf.mxu1  ;;  %v5053_v5 = vmax.f32 %v5051_v22, %v5052_v23 }
 0x22b   :  { %v2189_v33 = vmax.f32 %v2140_v47, 0.0  ;;  %v2085_v38 = vmax.f32 %v1556_v20, %v2001_v46 }
 0x22c   :  { %v1475_v55 = vpop.f32.mrf.mxu0  ;;  %v2004_v40 = vpop.f32.mrf.mxu1 }
 0x22d   :  { %v2991_v12 = vpack.c.bf16 %v2189_v33, %v2188_v21  ;;  %v1557_v49 = vmax.f32 %v5041_v48, %v1475_v55  ;;  %v2141_v54 = vadd.f32 %v4587_v14, %v2085_v38  ;;  %v5054_v21 = vld [vmem:[#allocation44_spill] sm:$0xff]  ;;  %v5055_v33 = vld [vmem:[#allocation45_spill] sm:$0xff] }
 0x22e   :  { %v3430_v29 = vpop.f32.mrf.mxu0  ;;  %v3532_v53 = vpop.f32.mrf.mxu1  ;;  %v5056_v38 = vmax.f32 %v5054_v21, %v5055_v33 }
 0x22f   :  { %3035 = vst [vmem:[%s4860_s3 + $0x90] sm:$0xff] %v2991_v12   ;;  %v2086_v30 = vmax.f32 %v1557_v49, %v2004_v40  ;;  %v2190_v63 = vmax.f32 %v2141_v54, 0.0  ;;  %v5057_v54 = vld [vmem:[#allocation46_spill] sm:$0xff] }
 0x230   :  { %v1480_v11 = vpop.f32.mrf.mxu0  ;;  %v2009_v57 = vpop.f32.mrf.mxu1 }
 0x231   :  { %v2142_v26 = vadd.f32 %v4587_v14, %v2086_v30  ;;  %v1558_v44 = vmax.f32 %v5044_v19, %v1480_v11  ;;  %v5058_v30 = vld [vmem:[#allocation47_spill] sm:$0xff] }
 0x232   :  { %v3433_v4 = vpop.f32.mrf.mxu0  ;;  %v3535_v9 = vpop.f32.mrf.mxu1  ;;  %v5059_v11 = vmax.f32 %v5057_v54, %v5058_v30 }
 0x233   :  { %v2191_v1 = vmax.f32 %v2142_v26, 0.0  ;;  %v2087_v7 = vmax.f32 %v1558_v44, %v2009_v57 }
 0x234   :  { %v1483_v34 = vpop.f32.mrf.mxu0  ;;  %v2012_v35 = vpop.f32.mrf.mxu1 }
 0x235   :  { %v2996_v16 = vpack.c.bf16 %v2191_v1, %v2190_v63  ;;  %v1559_v50 = vmax.f32 %v5047_v2, %v1483_v34  ;;  %v2143_v18 = vadd.f32 %v4587_v14, %v2087_v7  ;;  %v5060_v63 = vld [vmem:[#allocation48_spill] sm:$0xff]  ;;  %v5061_v1 = vld [vmem:[#allocation49_spill] sm:$0xff] }
 0x236   :  { %v3434_v61 = vpop.f32.mrf.mxu0  ;;  %v3536_v17 = vpop.f32.mrf.mxu1  ;;  %v5062_v7 = vmax.f32 %v5060_v63, %v5061_v1 }
 0x237   :  { %3036 = vst [vmem:[%s4860_s3 + $0x98] sm:$0xff] %v2996_v16   ;;  %v2088_v13 = vmax.f32 %v1559_v50, %v2012_v35  ;;  %v2192_v24 = vmax.f32 %v2143_v18, 0.0  ;;  %v5063_v18 = vld [vmem:[#allocation50_spill] sm:$0xff] }
 0x238   :  { %v1488_v15 = vpop.f32.mrf.mxu0  ;;  %v2017_v62 = vpop.f32.mrf.mxu1 }
 0x239   :  { %v2144_v43 = vadd.f32 %v4587_v14, %v2088_v13  ;;  %v1560_v41 = vmax.f32 %v5050_v0, %v1488_v15  ;;  %v5064_v13 = vld [vmem:[#allocation51_spill] sm:$0xff] }
 0x23a   :  { %v3437_v42 = vpop.f32.mrf.mxu0  ;;  %v3539_v31 = vpop.f32.mrf.mxu1  ;;  %v5065_v15 = vmax.f32 %v5063_v18, %v5064_v13 }
 0x23b   :  { %v2193_v25 = vmax.f32 %v2144_v43, 0.0  ;;  %v2089_v45 = vmax.f32 %v1560_v41, %v2017_v62 }
 0x23c   :  { %v1491_v51 = vpop.f32.mrf.mxu0  ;;  %v2020_v36 = vpop.f32.mrf.mxu1 }
 0x23d   :  { %v3001_v32 = vpack.c.bf16 %v2193_v25, %v2192_v24  ;;  %v1561_v46 = vmax.f32 %v5053_v5, %v1491_v51  ;;  %v2145_v58 = vadd.f32 %v4587_v14, %v2089_v45  ;;  %v5066_v24 = vld [vmem:[#allocation52_spill] sm:$0xff]  ;;  %v5067_v25 = vld [vmem:[#allocation53_spill] sm:$0xff] }
 0x23e   :  { %v3438_v47 = vpop.f32.mrf.mxu0  ;;  %v3540_v6 = vpop.f32.mrf.mxu1  ;;  %v5068_v45 = vmax.f32 %v5066_v24, %v5067_v25 }
 0x23f   :  { %3037 = vst [vmem:[%s4860_s3 + $0xa0] sm:$0xff] %v3001_v32   ;;  %v2090_v59 = vmax.f32 %v1561_v46, %v2020_v36  ;;  %v2194_v56 = vmax.f32 %v2145_v58, 0.0 }
 0x240   :  { %v1496_v20 = vpop.f32.mrf.mxu0  ;;  %v2025_v37 = vpop.f32.mrf.mxu1 }
 0x241   :  { %v2146_v39 = vadd.f32 %v4587_v14, %v2090_v59  ;;  %v1562_v55 = vmax.f32 %v5056_v38, %v1496_v20 }
 0x242   :  { %v3441_v40 = vpop.f32.mrf.mxu0  ;;  %v3543_v12 = vpop.f32.mrf.mxu1 }
 0x243   :  { %v2195_v10 = vmax.f32 %v2146_v39, 0.0  ;;  %v2091_v48 = vmax.f32 %v1562_v55, %v2025_v37 }
 0x244   :  { %v1499_v49 = vpop.f32.mrf.mxu0  ;;  %v2028_v29 = vpop.f32.mrf.mxu1 }
 0x245   :  { %v3006_v53 = vpack.c.bf16 %v2195_v10, %v2194_v56  ;;  %v1563_v57 = vmax.f32 %v5059_v11, %v1499_v49  ;;  %v2147_v3 = vadd.f32 %v4587_v14, %v2091_v48 }
 0x246   :  { %v3442_v26 = vpop.f32.mrf.mxu0  ;;  %v3544_v8 = vpop.f32.mrf.mxu1 }
 0x247   :  { %3038 = vst [vmem:[%s4860_s3 + $0xa8] sm:$0xff] %v3006_v53   ;;  %v2092_v19 = vmax.f32 %v1563_v57, %v2028_v29  ;;  %v2196_v27 = vmax.f32 %v2147_v3, 0.0 }
 0x248   :  { %v1504_v44 = vpop.f32.mrf.mxu0  ;;  %v2033_v4 = vpop.f32.mrf.mxu1 }
 0x249   :  { %v2148_v9 = vadd.f32 %v4587_v14, %v2092_v19  ;;  %v1564_v34 = vmax.f32 %v5062_v7, %v1504_v44 }
 0x24a   :  { %v3445_v35 = vpop.f32.mrf.mxu0  ;;  %v3547_v16 = vpop.f32.mrf.mxu1 }
 0x24b   :  { %v2197_v28 = vmax.f32 %v2148_v9, 0.0  ;;  %v2093_v2 = vmax.f32 %v1564_v34, %v2033_v4 }
 0x24c   :  { %v1507_v50 = vpop.f32.mrf.mxu0  ;;  %v2036_v61 = vpop.f32.mrf.mxu1 }
 0x24d   :  { %v3011_v17 = vpack.c.bf16 %v2197_v28, %v2196_v27  ;;  %v1565_v62 = vmax.f32 %v5065_v15, %v1507_v50  ;;  %v2149_v60 = vadd.f32 %v4587_v14, %v2093_v2 }
 0x24e   :  { %v3446_v43 = vpop.f32.mrf.mxu0  ;;  %v3548_v52 = vpop.f32.mrf.mxu1 }
 0x24f   :  { %3039 = vst [vmem:[%s4860_s3 + $0xb0] sm:$0xff] %v3011_v17   ;;  %v2094_v0 = vmax.f32 %v1565_v62, %v2036_v61  ;;  %v2198_v22 = vmax.f32 %v2149_v60, 0.0 }
 0x250   :  { %v1512_v41 = vpop.f32.mrf.mxu0  ;;  %v2041_v42 = vpop.f32.mrf.mxu1 }
 0x251   :  { %v2150_v31 = vadd.f32 %v4587_v14, %v2094_v0  ;;  %v1566_v51 = vmax.f32 %v5068_v45, %v1512_v41 }
 0x252   :  { %v3449_v36 = vpop.f32.mrf.mxu0  ;;  %v3551_v32 = vpop.f32.mrf.mxu1 }
 0x253   :  { %v2199_v23 = vmax.f32 %v2150_v31, 0.0  ;;  %v2095_v5 = vmax.f32 %v1566_v51, %v2041_v42 }
 0x254   :  { %v1515_v46 = vpop.f32.mrf.mxu0  ;;  %v2044_v47 = vpop.f32.mrf.mxu1 }
 0x255   :  { %v3016_v6 = vpack.c.bf16 %v2199_v23, %v2198_v22  ;;  %v2151_v58 = vadd.f32 %v4587_v14, %v2095_v5 }
 0x256   :  { %v3450_v59 = vpop.f32.mrf.mxu0  ;;  %v3552_v20 = vpop.f32.mrf.mxu1 }
 0x257   :  { %3040 = vst [vmem:[%s4860_s3 + $0xb8] sm:$0xff] %v3016_v6   ;;  %v2200_v37 = vmax.f32 %v2151_v58, 0.0 }
 0x259   :  { %v2897_v39 = vpack.c.bf16 %v2200_v37, %v2200_v37 }
 0x25b   :  { %2446 = vst [vmem:[%s4860_s3 + $0xc0] sm:$0xf] %v2897_v39 }

// kernel: forward.4
= control target key start
LH: loop header
LB: loop body
LE: loop exit
PB: predicated region body
PF: predicated region fallthrough
CT: control target
= control target key end

     0   :  { %v2395_v0 = vmov 0.0   ;;  %vm2396_vm0 = vmmov 0   ;;  %vm285_vm1 = vcmask 261120   ;;  %s3125_s1 = inlined_call_operand.vmem [shape: bf16[288,128], index: 1, kind: input, shape index: {}]   ;;  %s3126_s0 = inlined_call_operand.vmem [shape: bf16[4,104,288], index: 0, kind: input, shape index: {}]   ;;  %s3127_s2 = inlined_call_operand.vmem [shape: f32[1,128], index: 2, kind: input, shape index: {}]   ;;  %s3128_s3 = inlined_call_operand.vmem [shape: bf16[104,128], index: 3, kind: output, shape index: {}]  }
   0x1   :  { %2135 = vmatprep.subr.bf16.mxu1 %v2395_v0  ;;  %v2421_v1 = vld [vmem:[%s3125_s1 + $0x78] sm:$0xff]   ;;  %2139 = vmatprep.mubr.msk.bf16.mxu1 %vm2396_vm0, %v2395_v0  ;;  %v2428_v2 = vld [vmem:[%s3125_s1 + $0x88] sm:$0xff]   ;;  %v2440_v4 = vld [vmem:[%s3125_s1 + $0x70] sm:$0xff]  }
   0x2   :  { %1867 = vmatprep.subr.bf16.mxu0 %v2421_v1  ;;  %v2434_v3 = vld [vmem:[%s3125_s1 + $0x38] sm:$0xff]   ;;  %2136 = vmatpush3.bf16.msra.mxu1 %v2428_v2  ;;  %v2447_v5 = vld [vmem:[%s3125_s1 + $0x80] sm:$0xff]   ;;  %v2453_v6 = vld [vmem:[%s3125_s1 + $0x30] sm:$0xff]  }
   0x3   :  { %1868 = vmatpush3.bf16.msra.mxu0 %v2434_v3  ;;  %2137 = vmatprep.subr.bf16.mxu1 %v2395_v0  ;;  %v2275_v7 = vld [vmem:[%s3126_s0 + $0x8] ss:$12 sps:$4 sm:$0xff]   ;;  %v2475_v10 = vld [vmem:[%s3125_s1 + $0x60] sm:$0xff]   ;;  %v2492_v12 = vld [vmem:[%s3125_s1 + $0x58] sm:$0xff]  }
   0x4   :  { %1869 = vmatprep.subr.bf16.mxu0 %v2440_v4  ;;  %v2462_v8 = vld [vmem:[%s3125_s1 + $0x68] sm:$0xff]   ;;  %v2485_v11 = vld [vmem:[%s3125_s1 + $0x20] sm:$0xff]   ;;  %v2502_v14 = vld [vmem:[%s3125_s1 + $0x18] sm:$0xff]  }
   0x5   :  { %v2468_v9 = vld [vmem:[%s3125_s1 + $0x28] sm:$0xff]   ;;  %v2509_v15 = vld [vmem:[%s3125_s1 + $0x50] sm:$0xff]   ;;  %v2285_v17 = vld [vmem:[%s3126_s0 + $0x38] ss:$12 sps:$4 sm:$0xff]  }
   0x6   :  { %2138 = vmatpush3.bf16.msra.mxu1 %v2447_v5  ;;  %v2280_v13 = vld [vmem:[%s3126_s0 + $0x20] ss:$12 sps:$4 sm:$0xff]   ;;  %v2515_v16 = vld [vmem:[%s3125_s1 + $0x10] sm:$0xff]   ;;  %v2294_v25 = vld [vmem:[%s3126_s0 + $0x1c] ss:$12 sps:$4 sm:$0xff]  }
   0x7   :  { %1870 = vmatpush3.bf16.msra.mxu0 %v2453_v6  ;;  %1934 = vmatprep.subr.bf16.mxu1 %v2421_v1  ;;  %v2529_v18 = vld [vmem:[%s3125_s1 + $0x48] sm:$0xff]   ;;  %v2292_v19 = vld [vmem:[%s3126_s0 + $0x4] ss:$12 sps:$4 sm:$0xff]   ;;  %v2298_v28 = vld [vmem:[%s3126_s0 + $0x34] ss:$12 sps:$4 sm:$0xff]  }
   0x8   :  { %1871 = vmatprep.subr.bf16.mxu0 %v2462_v8  ;;  %v2539_v20 = vld [vmem:[%s3125_s1 + $0x8] sm:$0xff]   ;;  %339 = vmatprep.mubr.bf16.mxu0 %v2292_v19  ;;  %v2545_v21 = vld [vmem:[%s3125_s1 + $0x40] sm:$0xff]   ;;  %v2293_v23 = vld [vmem:[%s3126_s0 + $0x50] ss:$12 sps:$4 sm:$0xff]  }
   0x9   :  { %2140 = vmatmul.mubr.msk.bf16.vlgmr.msra.gmra.mxu1 %vm285_vm1, %v2275_v7  ;;  %v2556_v22 = vld [vmem:[%s3125_s1] sm:$0xff]   ;;  %v2296_v26 = vld [vmem:[%s3126_s0 + $0x68] ss:$12 sps:$4 sm:$0xff]   ;;  %v2301_v30 = vld [vmem:[%s3126_s0 + $0x30] ss:$12 sps:$4 sm:$0xff]  }
   0xa   :  { %2143 = vmatprep.mubr.msk.bf16.mxu1 %vm2396_vm0, %v2395_v0  ;;  %1935 = vmatpush3.bf16.msra.mxu1 %v2434_v3  ;;  %v2290_v24 = vld [vmem:[%s3126_s0] ss:$12 sps:$4 sm:$0xff]   ;;  %v2297_v27 = vld [vmem:[%s3126_s0 + $0x18] ss:$12 sps:$4 sm:$0xff]   ;;  %v2305_v33 = vld [vmem:[%s3126_s0 + $0x48] ss:$12 sps:$4 sm:$0xff]  }
   0xb   :  { %1872 = vmatpush3.bf16.msra.mxu0 %v2468_v9  ;;  %1936 = vmatprep.subr.bf16.mxu1 %v2440_v4  ;;  %v2300_v29 = vld [vmem:[%s3126_s0 + $0x80] ss:$12 sps:$4 sm:$0xff]   ;;  %v2304_v32 = vld [vmem:[%s3126_s0 + $0x98] ss:$0 sps:$4 sm:$0xff]   ;;  %v2309_v35 = vld [vmem:[%s3126_s0 + $0x64] ss:$12 sps:$4 sm:$0xff]  }
   0xc   :  { %1873 = vmatprep.subr.bf16.mxu0 %v2475_v10  ;;  %v2302_v31 = vld [vmem:[%s3126_s0 + $0x4c] ss:$12 sps:$4 sm:$0xff]   ;;  %v2306_v36 = vld [vmem:[%s3126_s0 + $0x9c] ss:$12 sps:$4 sm:$0xff]   ;;  %v75_v40 = vld [vmem:[%s3126_s0 + $0x90] sm:$0xff] }
   0xd   :  { %v2308_v34 = vld [vmem:[%s3126_s0 + $0xa0] ss:$12 sps:$4 sm:$0xff]   ;;  %v2312_v38 = vld [vmem:[%s3126_s0 + $0xb8] ss:$12 sps:$4 sm:$0xff]   ;;  %v2314_v39 = vld [vmem:[%s3126_s0 + $0x7c] ss:$12 sps:$4 sm:$0xff]   ;;  %v1616_v44 = vcombine.high %v75_v40, %v75_v40  ;;  %v1615_v46 = vcombine.low %v75_v40, %v75_v40 }
   0xe   :  { %1937 = vmatpush3.bf16.msra.mxu1 %v2453_v6  ;;  %v2311_v37 = vld [vmem:[%s3126_s0 + $0x60] ss:$12 sps:$4 sm:$0xff]   ;;  %v2317_v42 = vld [vmem:[%s3126_s0 + $0x78] ss:$12 sps:$4 sm:$0xff]   ;;  %v2318_v43 = vld [vmem:[%s3126_s0 + $0xd0] ss:$12 sps:$4 sm:$0xff]  }
   0xf   :  { %1874 = vmatpush3.bf16.msra.mxu0 %v2485_v11  ;;  %1938 = vmatprep.subr.bf16.mxu1 %v2462_v8  ;;  %v2316_v41 = vld [vmem:[%s3126_s0 + $0xb4] ss:$12 sps:$4 sm:$0xff]   ;;  %v2321_v45 = vld [vmem:[%s3126_s0 + $0xcc] ss:$12 sps:$4 sm:$0xff]   ;;  %v2325_v48 = vld [vmem:[%s3126_s0 + $0xe4] ss:$12 sps:$4 sm:$0xff]  }
  0x10   :  { %1875 = vmatprep.subr.bf16.mxu0 %v2492_v12  ;;  %v2323_v47 = vld [vmem:[%s3126_s0 + $0xe8] ss:$12 sps:$4 sm:$0xff]   ;;  %v2326_v49 = vld [vmem:[%s3126_s0 + $0xa4] ss:$12 sps:$4 sm:$0xff]   ;;  %v2327_v50 = vld [vmem:[%s3126_s0 + $0x100] ss:$12 sps:$4 sm:$0xff]  }
  0x11   :  { %2144 = vmatmul.mubr.msk.bf16.gmra.mxu1 %vm285_vm1, %v2280_v13  ;;  %v2329_v51 = vld [vmem:[%s3126_s0 + $0xfc] ss:$12 sps:$4 sm:$0xff]   ;;  %v2331_v53 = vld [vmem:[%s3126_s0 + $0x118] ss:$12 sps:$4 sm:$0xff]   ;;  %v1667_v54 = vld [vmem:[%s3126_s0 + $0x12c] sm:$0xff] }
  0x12   :  { %2147 = vmatprep.mubr.msk.bf16.mxu1 %vm2396_vm0, %v2395_v0  ;;  %1939 = vmatpush3.bf16.msra.mxu1 %v2468_v9  ;;  %v2330_v52 = vld [vmem:[%s3126_s0 + $0xbc] ss:$12 sps:$4 sm:$0xff]   ;;  %v2333_v55 = vld [vmem:[%s3126_s0 + $0x114] ss:$12 sps:$4 sm:$0xff]   ;;  %v1688_v57 = vcombine.high %v1667_v54, %v1667_v54  ;;  %v1687_v58 = vcombine.low %v1667_v54, %v1667_v54  ;;  %v2337_v59 = vld [vmem:[%s3126_s0 + $0xec] ss:$12 sps:$4 sm:$0xff]  }
  0x13   :  { %1876 = vmatpush3.bf16.msra.mxu0 %v2502_v14  ;;  %1940 = vmatprep.subr.bf16.mxu1 %v2475_v10  ;;  %v2334_v56 = vld [vmem:[%s3126_s0 + $0xd4] ss:$12 sps:$4 sm:$0xff]   ;;  %v2340_v60 = vld [vmem:[%s3126_s0 + $0x13c] ss:$12 sps:$4 sm:$0xff]   ;;  %v2338_v61 = vld [vmem:[%s3126_s0 + $0x138] ss:$12 sps:$4 sm:$0xff]  }
  0x14   :  { %1877 = vmatprep.subr.bf16.mxu0 %v2509_v15  ;;  %v2341_v62 = vld [vmem:[%s3126_s0 + $0x104] ss:$12 sps:$4 sm:$0xff]   ;;  %v2342_v63 = vld [vmem:[%s3126_s0 + $0x154] ss:$12 sps:$4 sm:$0xff]   ;;  %v2345_v7 = vld [vmem:[%s3126_s0 + $0x11c] ss:$12 sps:$4 sm:$0xff]  }
  0x15   :  { %v2346_v13 = vld [vmem:[%s3126_s0 + $0x16c] ss:$12 sps:$4 sm:$0xff]  }
  0x16   :  { %1941 = vmatpush3.bf16.msra.mxu1 %v2485_v11 }
  0x17   :  { %1878 = vmatpush3.bf16.msra.mxu0 %v2515_v16  ;;  %1942 = vmatprep.subr.bf16.mxu1 %v2492_v12 }
  0x18   :  { %1879 = vmatprep.subr.bf16.mxu0 %v2529_v18 }
  0x19   :  { %2148 = vmatmul.mubr.msk.bf16.gmra.mxu1 %vm285_vm1, %v2285_v17  ;;  %v2361_v17 = vld [vmem:[%s3126_s0 + $0x170] ss:$12 sps:$4 sm:$0xff]  }
  0x1a   :  { %2151 = vmatprep.mubr.msk.bf16.mxu1 %vm2396_vm0, %v2395_v0  ;;  %1943 = vmatpush3.bf16.msra.mxu1 %v2502_v14 }
  0x1b   :  { %1880 = vmatpush3.bf16.msra.mxu0 %v2539_v20  ;;  %1944 = vmatprep.subr.bf16.mxu1 %v2509_v15 }
  0x1c   :  { %1881 = vmatprep.subr.bf16.mxu0 %v2545_v21 }
  0x1e   :  { %1945 = vmatpush3.bf16.msra.mxu1 %v2515_v16 }
  0x1f   :  { %1882 = vmatpush3.bf16.msra.mxu0 %v2556_v22  ;;  %1946 = vmatprep.subr.bf16.mxu1 %v2529_v18 }
  0x20   :  { %2167 = vmatprep.subr.bf16.mxu0 %v2395_v0 }
  0x21   :  { %2152 = vmatmul.mubr.msk.bf16.gmra.mxu1 %vm285_vm1, %v2293_v23  ;;  %v2368_v23 = vld [vmem:[%s3126_s0 + $0x1a0] ss:$12 sps:$4 sm:$0xff]  }
  0x22   :  { %340 = vmatmul.mubr.bf16.vlgmr.msra.gmra.mxu0 %v2290_v24  ;;  %2155 = vmatprep.mubr.msk.bf16.mxu1 %vm2396_vm0, %v2395_v0  ;;  %v2369_v24 = vld [vmem:[%s3126_s0 + $0x1f0] ss:$12 sps:$4 sm:$0xff]  }
  0x23   :  { %2168 = vmatpush3.bf16.msra.mxu0 %v2428_v2  ;;  %347 = vmatprep.mubr.bf16.mxu0 %v2294_v25  ;;  %v2371_v25 = vld [vmem:[%s3126_s0 + $0x1ec] ss:$12 sps:$4 sm:$0xff]  }
  0x24   :  { %1947 = vmatpush3.bf16.msra.mxu1 %v2539_v20  ;;  %2169 = vmatprep.subr.bf16.mxu0 %v2395_v0 }
  0x25   :  { %1948 = vmatprep.subr.bf16.mxu1 %v2545_v21 }
  0x27   :  { %2170 = vmatpush3.bf16.msra.mxu0 %v2447_v5 }
  0x28   :  { %1949 = vmatpush3.bf16.msra.mxu1 %v2556_v22  ;;  %2199 = vmatprep.subr.bf16.mxu0 %v2395_v0 }
  0x29   :  { %2156 = vmatmul.mubr.msk.bf16.gmra.mxu1 %vm285_vm1, %v2296_v26  ;;  %2001 = vmatprep.subr.bf16.mxu1 %v2421_v1  ;;  %v2372_v26 = vld [vmem:[%s3126_s0 + $0x1b8] ss:$12 sps:$4 sm:$0xff]  }
  0x2a   :  { %348 = vmatmul.mubr.bf16.gmra.mxu0 %v2297_v27  ;;  %2159 = vmatprep.mubr.msk.bf16.mxu1 %vm2396_vm0, %v2395_v0  ;;  %v2373_v27 = vld [vmem:[%s3126_s0 + $0x208] ss:$12 sps:$4 sm:$0xff]  }
  0x2b   :  { %355 = vmatprep.mubr.bf16.mxu0 %v2298_v28  ;;  %v2376_v28 = vld [vmem:[%s3126_s0 + $0x1d0] ss:$0 sps:$4 sm:$0xff]  }
  0x31   :  { %2160 = vmatmul.mubr.msk.bf16.gmra.mxu1 %vm285_vm1, %v2300_v29  ;;  %v2377_v29 = vld [vmem:[%s3126_s0 + $0x220] ss:$12 sps:$4 sm:$0xff]  }
  0x32   :  { %356 = vmatmul.mubr.bf16.gmra.mxu0 %v2301_v30  ;;  %2163 = vmatprep.mubr.msk.bf16.mxu1 %vm2396_vm0, %v2395_v0  ;;  %v2380_v30 = vld [vmem:[%s3126_s0 + $0x1dc] ss:$12 sps:$4 sm:$0xff]  }
  0x33   :  { %363 = vmatprep.mubr.bf16.mxu0 %v2302_v31  ;;  %v2381_v31 = vld [vmem:[%s3126_s0 + $0x238] ss:$12 sps:$4 sm:$0xff]  }
  0x39   :  { %2164 = vmatmul.mubr.msk.bf16.gmra.mxu1 %vm285_vm1, %v2304_v32 }
  0x3a   :  { %364 = vmatmul.mubr.bf16.gmra.mxu0 %v2305_v33  ;;  %663 = vmatprep.mubr.bf16.mxu1 %v2308_v34 }
  0x3b   :  { %371 = vmatprep.mubr.bf16.mxu0 %v2309_v35  ;;  %v2383_v35 = vld [vmem:[%s3126_s0 + $0x234] ss:$12 sps:$4 sm:$0xff]  }
  0x41   :  { %664 = vmatmul.mubr.bf16.vlgmr.msra.gmra.mxu1 %v2306_v36  ;;  %v2384_v36 = vld [vmem:[%s3126_s0 + $0x1f4] ss:$12 sps:$4 sm:$0xff]  }
  0x42   :  { %372 = vmatmul.mubr.bf16.gmra.mxu0 %v2311_v37  ;;  %671 = vmatprep.mubr.bf16.mxu1 %v2312_v38  ;;  %v2385_v37 = vld [vmem:[%s3126_s0 + $0x250] ss:$12 sps:$4 sm:$0xff]  }
  0x43   :  { %379 = vmatprep.mubr.bf16.mxu0 %v2314_v39  ;;  %2002 = vmatpush3.bf16.msra.mxu1 %v2434_v3 }
  0x44   :  { %2003 = vmatprep.subr.bf16.mxu1 %v2440_v4 }
  0x47   :  { %2004 = vmatpush3.bf16.msra.mxu1 %v2453_v6 }
  0x48   :  { %2005 = vmatprep.subr.bf16.mxu1 %v2462_v8 }
  0x49   :  { %672 = vmatmul.mubr.bf16.gmra.mxu1 %v2316_v41  ;;  %v1775_v41 = vld [vmem:[%s3126_s0 + $0x264] sm:$0xff] }
  0x4a   :  { %380 = vmatmul.mubr.bf16.gmra.mxu0 %v2317_v42  ;;  %679 = vmatprep.mubr.bf16.mxu1 %v2318_v43  ;;  %v2387_v43 = vld [vmem:[%s3126_s0 + $0x24c] ss:$12 sps:$4 sm:$0xff]  }
  0x4b   :  { %387 = vmatprep.mubr.bf16.mxu0 %v1616_v44  ;;  %2006 = vmatpush3.bf16.msra.mxu1 %v2468_v9  ;;  %v2388_v44 = vld [vmem:[%s3126_s0 + $0x20c] ss:$12 sps:$4 sm:$0xff]  }
  0x4c   :  { %2007 = vmatprep.subr.bf16.mxu1 %v2475_v10 }
  0x4f   :  { %2008 = vmatpush3.bf16.msra.mxu1 %v2485_v11 }
  0x50   :  { %2009 = vmatprep.subr.bf16.mxu1 %v2492_v12 }
  0x51   :  { %680 = vmatmul.mubr.bf16.gmra.mxu1 %v2321_v45  ;;  %v1796_v45 = vcombine.high %v1775_v41, %v1775_v41 }
  0x52   :  { %388 = vmatmul.mubr.bf16.gmra.mxu0 %v1615_v46  ;;  %687 = vmatprep.mubr.bf16.mxu1 %v2323_v47 }
  0x53   :  { %2171 = vmatprep.mubr.msk.bf16.mxu0 %vm2396_vm0, %v2395_v0  ;;  %2010 = vmatpush3.bf16.msra.mxu1 %v2502_v14 }
  0x54   :  { %2011 = vmatprep.subr.bf16.mxu1 %v2509_v15 }
  0x57   :  { %2012 = vmatpush3.bf16.msra.mxu1 %v2515_v16 }
  0x58   :  { %2013 = vmatprep.subr.bf16.mxu1 %v2529_v18 }
  0x59   :  { %688 = vmatmul.mubr.bf16.gmra.mxu1 %v2325_v48 }
  0x5a   :  { %2172 = vmatmul.mubr.msk.bf16.vlgmr.msra.gmra.mxu0 %vm285_vm1, %v2326_v49  ;;  %695 = vmatprep.mubr.bf16.mxu1 %v2327_v50  ;;  %v1795_v50 = vcombine.low %v1775_v41, %v1775_v41 }
  0x5b   :  { %2200 = vmatpush3.bf16.msra.mxu0 %v2428_v2  ;;  %2175 = vmatprep.mubr.msk.bf16.mxu0 %vm2396_vm0, %v2395_v0 }
  0x5c   :  { %2014 = vmatpush3.bf16.msra.mxu1 %v2539_v20  ;;  %2201 = vmatprep.subr.bf16.mxu0 %v2395_v0 }
  0x5d   :  { %2015 = vmatprep.subr.bf16.mxu1 %v2545_v21 }
  0x5f   :  { %2202 = vmatpush3.bf16.msra.mxu0 %v2447_v5 }
  0x60   :  { %2016 = vmatpush3.bf16.msra.mxu1 %v2556_v22  ;;  %2231 = vmatprep.subr.bf16.mxu0 %v2395_v0 }
  0x61   :  { %696 = vmatmul.mubr.bf16.gmra.mxu1 %v2329_v51  ;;  %2068 = vmatprep.subr.bf16.mxu1 %v2421_v1  ;;  %v2344_v1 = vld [vmem:[%s3126_s0 + $0x150] ss:$12 sps:$4 sm:$0xff]  }
  0x62   :  { %2176 = vmatmul.mubr.msk.bf16.gmra.mxu0 %vm285_vm1, %v2330_v52  ;;  %703 = vmatprep.mubr.bf16.mxu1 %v2331_v53  ;;  %v2391_v51 = vld [vmem:[%s3126_s0 + $0x224] ss:$12 sps:$4 sm:$0xff]  }
  0x63   :  { %2179 = vmatprep.mubr.msk.bf16.mxu0 %vm2396_vm0, %v2395_v0 }
  0x69   :  { %704 = vmatmul.mubr.bf16.gmra.mxu1 %v2333_v55 }
  0x6a   :  { %2180 = vmatmul.mubr.msk.bf16.gmra.mxu0 %vm285_vm1, %v2334_v56  ;;  %711 = vmatprep.mubr.bf16.mxu1 %v1688_v57 }
  0x6b   :  { %2183 = vmatprep.mubr.msk.bf16.mxu0 %vm2396_vm0, %v2395_v0 }
  0x71   :  { %712 = vmatmul.mubr.bf16.gmra.mxu1 %v1687_v58 }
  0x72   :  { %2184 = vmatmul.mubr.msk.bf16.gmra.mxu0 %vm285_vm1, %v2337_v59  ;;  %1000 = vmatprep.mubr.bf16.mxu1 %v2340_v60  ;;  %v2392_v59 = vld [vmem:[%s3126_s0 + $0x26c] ss:$0 sps:$4 sm:$0xff]  }
  0x73   :  { %2187 = vmatprep.mubr.msk.bf16.mxu0 %vm2396_vm0, %v2395_v0 }
  0x79   :  { %1001 = vmatmul.mubr.bf16.vlgmr.msra.gmra.mxu1 %v2338_v61  ;;  %v2393_v61 = vld [vmem:[%s3126_s0 + $0x23c] ss:$12 sps:$4 sm:$0xff]  }
  0x7a   :  { %2188 = vmatmul.mubr.msk.bf16.gmra.mxu0 %vm285_vm1, %v2341_v62  ;;  %1008 = vmatprep.mubr.bf16.mxu1 %v2342_v63 }
  0x7b   :  { %2191 = vmatprep.mubr.msk.bf16.mxu0 %vm2396_vm0, %v2395_v0  ;;  %2069 = vmatpush3.bf16.msra.mxu1 %v2434_v3  ;;  %v2348_v3 = vld [vmem:[%s3126_s0 + $0x168] ss:$12 sps:$4 sm:$0xff]  }
  0x7c   :  { %2070 = vmatprep.subr.bf16.mxu1 %v2440_v4  ;;  %v2349_v4 = vld [vmem:[%s3126_s0 + $0x134] ss:$0 sps:$4 sm:$0xff]  }
  0x7f   :  { %2071 = vmatpush3.bf16.msra.mxu1 %v2453_v6  ;;  %v2350_v6 = vld [vmem:[%s3126_s0 + $0x184] ss:$12 sps:$4 sm:$0xff]  }
  0x80   :  { %2072 = vmatprep.subr.bf16.mxu1 %v2462_v8  ;;  %v2352_v8 = vld [vmem:[%s3126_s0 + $0x180] ss:$12 sps:$4 sm:$0xff]  }
  0x81   :  { %1009 = vmatmul.mubr.bf16.gmra.mxu1 %v2344_v1 }
  0x82   :  { %2192 = vmatmul.mubr.msk.bf16.gmra.mxu0 %vm285_vm1, %v2345_v7  ;;  %1016 = vmatprep.mubr.bf16.mxu1 %v2346_v13 }
  0x83   :  { %2195 = vmatprep.mubr.msk.bf16.mxu0 %vm2396_vm0, %v2395_v0  ;;  %2073 = vmatpush3.bf16.msra.mxu1 %v2468_v9  ;;  %v2353_v9 = vld [vmem:[%s3126_s0 + $0x140] ss:$12 sps:$4 sm:$0xff]  }
  0x84   :  { %2074 = vmatprep.subr.bf16.mxu1 %v2475_v10  ;;  %v2354_v10 = vld [vmem:[%s3126_s0 + $0x19c] ss:$12 sps:$4 sm:$0xff]  }
  0x87   :  { %2075 = vmatpush3.bf16.msra.mxu1 %v2485_v11  ;;  %v2356_v11 = vld [vmem:[%s3126_s0 + $0x198] ss:$12 sps:$4 sm:$0xff]  }
  0x88   :  { %2076 = vmatprep.subr.bf16.mxu1 %v2492_v12  ;;  %v2357_v12 = vld [vmem:[%s3126_s0 + $0x158] ss:$12 sps:$4 sm:$0xff]  }
  0x89   :  { %1017 = vmatmul.mubr.bf16.gmra.mxu1 %v2348_v3 }
  0x8a   :  { %2196 = vmatmul.mubr.msk.bf16.gmra.mxu0 %vm285_vm1, %v2349_v4  ;;  %1024 = vmatprep.mubr.bf16.mxu1 %v2350_v6 }
  0x8b   :  { %2203 = vmatprep.mubr.msk.bf16.mxu0 %vm2396_vm0, %v2395_v0  ;;  %2077 = vmatpush3.bf16.msra.mxu1 %v2502_v14  ;;  %v2358_v14 = vld [vmem:[%s3126_s0 + $0x1b4] ss:$12 sps:$4 sm:$0xff]  }
  0x8c   :  { %2078 = vmatprep.subr.bf16.mxu1 %v2509_v15  ;;  %v1721_v15 = vld [vmem:[%s3126_s0 + $0x1c8] sm:$0xff] }
  0x8d   :  { %v1741_v19 = vcombine.low %v1721_v15, %v1721_v15 }
  0x8f   :  { %2079 = vmatpush3.bf16.msra.mxu1 %v2515_v16  ;;  %v2360_v16 = vld [vmem:[%s3126_s0 + $0x1b0] ss:$12 sps:$4 sm:$0xff]  }
  0x90   :  { %2080 = vmatprep.subr.bf16.mxu1 %v2529_v18  ;;  %v1742_v18 = vcombine.high %v1721_v15, %v1721_v15 }
  0x91   :  { %1025 = vmatmul.mubr.bf16.gmra.mxu1 %v2352_v8 }
  0x92   :  { %2204 = vmatmul.mubr.msk.bf16.vlgmr.msra.gmra.mxu0 %vm285_vm1, %v2353_v9  ;;  %1032 = vmatprep.mubr.bf16.mxu1 %v2354_v10 }
  0x93   :  { %2232 = vmatpush3.bf16.msra.mxu0 %v2428_v2  ;;  %2207 = vmatprep.mubr.msk.bf16.mxu0 %vm2396_vm0, %v2395_v0 }
  0x94   :  { %2081 = vmatpush3.bf16.msra.mxu1 %v2539_v20  ;;  %2233 = vmatprep.subr.bf16.mxu0 %v2395_v0  ;;  %v2364_v20 = vld [vmem:[%s3126_s0 + $0x188] ss:$12 sps:$4 sm:$0xff]  }
  0x95   :  { %2082 = vmatprep.subr.bf16.mxu1 %v2545_v21  ;;  %v2367_v21 = vld [vmem:[%s3126_s0 + $0x1d8] ss:$12 sps:$4 sm:$0xff]  }
  0x97   :  { %2234 = vmatpush3.bf16.msra.mxu0 %v2447_v5 }
  0x98   :  { %2083 = vmatpush3.bf16.msra.mxu1 %v2556_v22  ;;  %v2365_v22 = vld [vmem:[%s3126_s0 + $0x1d4] ss:$12 sps:$4 sm:$0xff]  }
  0x99   :  { %1033 = vmatmul.mubr.bf16.gmra.mxu1 %v2356_v11  ;;  %2263 = vmatprep.subr.bf16.mxu1 %v2395_v0 }
  0x9a   :  { %2208 = vmatmul.mubr.msk.bf16.gmra.mxu0 %vm285_vm1, %v2357_v12  ;;  %1040 = vmatprep.mubr.bf16.mxu1 %v2358_v14  ;;  %v2394_v12 = vld [vmem:[%s3126_s0 + $0x254] ss:$12 sps:$4 sm:$0xff]  }
  0x9b   :  { %2211 = vmatprep.mubr.msk.bf16.mxu0 %vm2396_vm0, %v2395_v0 }
  0xa1   :  { %1041 = vmatmul.mubr.bf16.gmra.mxu1 %v2360_v16 }
  0xa2   :  { %2212 = vmatmul.mubr.msk.bf16.gmra.mxu0 %vm285_vm1, %v2361_v17  ;;  %1048 = vmatprep.mubr.bf16.mxu1 %v1742_v18 }
  0xa3   :  { %2215 = vmatprep.mubr.msk.bf16.mxu0 %vm2396_vm0, %v2395_v0 }
  0xa9   :  { %1049 = vmatmul.mubr.bf16.gmra.mxu1 %v1741_v19 }
  0xaa   :  { %2216 = vmatmul.mubr.msk.bf16.gmra.mxu0 %vm285_vm1, %v2364_v20  ;;  %1337 = vmatprep.mubr.bf16.mxu1 %v2367_v21 }
  0xab   :  { %2219 = vmatprep.mubr.msk.bf16.mxu0 %vm2396_vm0, %v2395_v0 }
  0xb1   :  { %1338 = vmatmul.mubr.bf16.vlgmr.msra.gmra.mxu1 %v2365_v22 }
  0xb2   :  { %2220 = vmatmul.mubr.msk.bf16.gmra.mxu0 %vm285_vm1, %v2368_v23  ;;  %1345 = vmatprep.mubr.bf16.mxu1 %v2369_v24 }
  0xb3   :  { %2223 = vmatprep.mubr.msk.bf16.mxu0 %vm2396_vm0, %v2395_v0  ;;  %2265 = vmatpush3.bf16.msra.mxu1 %v2428_v2  ;;  %v2375_v2 = vld [vmem:[%s3126_s0 + $0x204] ss:$12 sps:$4 sm:$0xff]  }
  0xb4   :  { %2264 = vmatprep.subr.bf16.mxu1 %v2395_v0 }
  0xb7   :  { %2266 = vmatpush3.bf16.msra.mxu1 %v2447_v5  ;;  %v2379_v5 = vld [vmem:[%s3126_s0 + $0x21c] ss:$12 sps:$4 sm:$0xff]  }
  0xb9   :  { %1346 = vmatmul.mubr.bf16.gmra.mxu1 %v2371_v25 }
  0xba   :  { %2224 = vmatmul.mubr.msk.bf16.gmra.mxu0 %vm285_vm1, %v2372_v26  ;;  %1353 = vmatprep.mubr.bf16.mxu1 %v2373_v27 }
  0xbb   :  { %2227 = vmatprep.mubr.msk.bf16.mxu0 %vm2396_vm0, %v2395_v0 }
  0xc1   :  { %1354 = vmatmul.mubr.bf16.gmra.mxu1 %v2375_v2 }
  0xc2   :  { %2228 = vmatmul.mubr.msk.bf16.gmra.mxu0 %vm285_vm1, %v2376_v28  ;;  %1361 = vmatprep.mubr.bf16.mxu1 %v2377_v29 }
  0xc3   :  { %2235 = vmatprep.mubr.msk.bf16.mxu0 %vm2396_vm0, %v2395_v0 }
  0xc9   :  { %v429_v32 = vpop.f32.mrf.mxu1  ;;  %1362 = vmatmul.mubr.bf16.gmra.mxu1 %v2379_v5 }
  0xca   :  { %2236 = vmatmul.mubr.msk.bf16.vlgmr.msra.gmra.mxu0 %vm285_vm1, %v2380_v30  ;;  %1369 = vmatprep.mubr.bf16.mxu1 %v2381_v31 }
  0xcb   :  { %v2141_v33 = vpop.f32.mrf.mxu1  ;;  %2239 = vmatprep.mubr.msk.bf16.mxu0 %vm2396_vm0, %v2395_v0 }
  0xcd   :  { %v432_v34 = vpop.f32.mrf.mxu1 }
  0xcf   :  { %v2142_v38 = vpop.f32.mrf.mxu1 }
  0xd1   :  { %v437_v39 = vpop.f32.mrf.mxu1  ;;  %1370 = vmatmul.mubr.bf16.gmra.mxu1 %v2383_v35 }
  0xd2   :  { %2240 = vmatmul.mubr.msk.bf16.gmra.mxu0 %vm285_vm1, %v2384_v36  ;;  %1377 = vmatprep.mubr.bf16.mxu1 %v2385_v37 }
  0xd3   :  { %v2145_v40 = vpop.f32.mrf.mxu1  ;;  %2243 = vmatprep.mubr.msk.bf16.mxu0 %vm2396_vm0, %v2395_v0 }
  0xd5   :  { %v440_v42 = vpop.f32.mrf.mxu1 }
  0xd7   :  { %v2146_v46 = vpop.f32.mrf.mxu1 }
  0xd9   :  { %v445_v47 = vpop.f32.mrf.mxu1  ;;  %1378 = vmatmul.mubr.bf16.gmra.mxu1 %v2387_v43 }
  0xda   :  { %2244 = vmatmul.mubr.msk.bf16.gmra.mxu0 %vm285_vm1, %v2388_v44  ;;  %1385 = vmatprep.mubr.bf16.mxu1 %v1796_v45 }
  0xdb   :  { %v2149_v48 = vpop.f32.mrf.mxu1  ;;  %2247 = vmatprep.mubr.msk.bf16.mxu0 %vm2396_vm0, %v2395_v0 }
  0xdd   :  { %v448_v49 = vpop.f32.mrf.mxu1 }
  0xdf   :  { %v2150_v52 = vpop.f32.mrf.mxu1 }
  0xe1   :  { %v453_v53 = vpop.f32.mrf.mxu1  ;;  %1386 = vmatmul.mubr.bf16.gmra.mxu1 %v1795_v50 }
  0xe2   :  { %v1883_v54 = vpop.f32.mrf.mxu0  ;;  %2248 = vmatmul.mubr.msk.bf16.gmra.mxu0 %vm285_vm1, %v2391_v51  ;;  %2259 = vmatprep.mubr.msk.bf16.mxu1 %vm2396_vm0, %v2395_v0 }
  0xe3   :  { %v2153_v55 = vpop.f32.mrf.mxu1  ;;  %2251 = vmatprep.mubr.msk.bf16.mxu0 %vm2396_vm0, %v2395_v0 }
  0xe4   :  { %v1884_v56 = vpop.f32.mrf.mxu0 }
  0xe5   :  { %v1885_v57 = vadd.f32 %v1884_v56, %v1883_v54  ;;  %v456_v58 = vpop.f32.mrf.mxu1 }
  0xe6   :  { %v1886_v60 = vpop.f32.mrf.mxu0 }
  0xe7   :  { %v2907_v62 = vadd.f32 %v1885_v57, %v429_v32  ;;  %v2154_v63 = vpop.f32.mrf.mxu1 }
  0xe8   :  { %v1887_v1 = vpop.f32.mrf.mxu0 }
  0xe9   :  { %v1888_v7 = vadd.f32 %v1887_v1, %v1886_v60  ;;  %v461_v13 = vpop.f32.mrf.mxu1  ;;  %2260 = vmatmul.mubr.msk.bf16.vlgmr.msra.gmra.mxu1 %vm285_vm1, %v2392_v59 }
  0xea   :  { %v1889_v3 = vpop.f32.mrf.mxu0  ;;  %2252 = vmatmul.mubr.msk.bf16.gmra.mxu0 %vm285_vm1, %v2393_v61 }
  0xeb   :  { %v2911_v4 = vadd.f32 %v1888_v7, %v432_v34  ;;  %v2157_v6 = vpop.f32.mrf.mxu1  ;;  %2255 = vmatprep.mubr.msk.bf16.mxu0 %vm2396_vm0, %v2395_v0 }
  0xec   :  { %v1890_v8 = vpop.f32.mrf.mxu0 }
  0xed   :  { %v1891_v9 = vadd.f32 %v1890_v8, %v1889_v3  ;;  %v464_v10 = vpop.f32.mrf.mxu1 }
  0xee   :  { %v1892_v11 = vpop.f32.mrf.mxu0 }
  0xef   :  { %v2918_v14 = vadd.f32 %v1891_v9, %v437_v39  ;;  %v2158_v15 = vpop.f32.mrf.mxu1 }
  0xf0   :  { %v1893_v16 = vpop.f32.mrf.mxu0 }
  0xf1   :  { %v1894_v17 = vadd.f32 %v1893_v16, %v1892_v11  ;;  %v469_v18 = vpop.f32.mrf.mxu1 }
  0xf2   :  { %v1895_v19 = vpop.f32.mrf.mxu0  ;;  %2256 = vmatmul.mubr.msk.bf16.gmra.mxu0 %vm285_vm1, %v2394_v12 }
  0xf3   :  { %v2921_v20 = vadd.f32 %v1894_v17, %v440_v42  ;;  %v2161_v0 = vpop.f32.mrf.mxu1 }
  0xf4   :  { %v1896_v21 = vpop.f32.mrf.mxu0 }
  0xf5   :  { %v1897_v22 = vadd.f32 %v1896_v21, %v1895_v19  ;;  %v472_v23 = vpop.f32.mrf.mxu1 }
  0xf6   :  { %v1898_v24 = vpop.f32.mrf.mxu0 }
  0xf7   :  { %v2923_v25 = vadd.f32 %v1897_v22, %v445_v47  ;;  %v2162_v26 = vpop.f32.mrf.mxu1 }
  0xf8   :  { %v1899_v27 = vpop.f32.mrf.mxu0 }
  0xf9   :  { %v1900_v2 = vadd.f32 %v1899_v27, %v1898_v24  ;;  %v477_v28 = vpop.f32.mrf.mxu1 }
  0xfa   :  { %v1901_v29 = vpop.f32.mrf.mxu0 }
  0xfb   :  { %v2925_v5 = vadd.f32 %v1900_v2, %v448_v49  ;;  %v2165_v30 = vpop.f32.mrf.mxu1 }
  0xfc   :  { %v1902_v31 = vpop.f32.mrf.mxu0 }
  0xfd   :  { %v1903_v32 = vadd.f32 %v1902_v31, %v1901_v29  ;;  %v480_v33 = vpop.f32.mrf.mxu1 }
  0xfe   :  { %v1904_v34 = vpop.f32.mrf.mxu0 }
  0xff   :  { %v2927_v35 = vadd.f32 %v1903_v32, %v453_v53  ;;  %v2166_v36 = vpop.f32.mrf.mxu1 }
 0x100   :  { %v1905_v37 = vpop.f32.mrf.mxu0 }
 0x101   :  { %v1906_v38 = vadd.f32 %v1905_v37, %v1904_v34  ;;  %v1950_v39 = vpop.f32.mrf.mxu1 }
 0x102   :  { %v1907_v40 = vpop.f32.mrf.mxu0 }
 0x103   :  { %v2929_v41 = vadd.f32 %v1906_v38, %v456_v58  ;;  %v1951_v42 = vpop.f32.mrf.mxu1 }
 0x104   :  { %v1952_v43 = vadd.f32 %v1951_v42, %v1950_v39  ;;  %v1908_v44 = vpop.f32.mrf.mxu0 }
 0x105   :  { %v1909_v45 = vadd.f32 %v1908_v44, %v1907_v40  ;;  %v1953_v46 = vpop.f32.mrf.mxu1 }
 0x106   :  { %v1910_v47 = vpop.f32.mrf.mxu0 }
 0x107   :  { %v2931_v48 = vadd.f32 %v1909_v45, %v461_v13  ;;  %v1954_v49 = vpop.f32.mrf.mxu1 }
 0x108   :  { %v1955_v50 = vadd.f32 %v1954_v49, %v1953_v46  ;;  %v1911_v51 = vpop.f32.mrf.mxu0 }
 0x109   :  { %v1912_v52 = vadd.f32 %v1911_v51, %v1910_v47  ;;  %v1956_v53 = vpop.f32.mrf.mxu1 }
 0x10a   :  { %v1913_v54 = vpop.f32.mrf.mxu0 }
 0x10b   :  { %v2933_v55 = vadd.f32 %v1912_v52, %v464_v10  ;;  %v1957_v56 = vpop.f32.mrf.mxu1 }
 0x10c   :  { %v1958_v57 = vadd.f32 %v1957_v56, %v1956_v53  ;;  %v1914_v58 = vpop.f32.mrf.mxu0 }
 0x10d   :  { %v1915_v59 = vadd.f32 %v1914_v58, %v1913_v54  ;;  %v1959_v60 = vpop.f32.mrf.mxu1 }
 0x10e   :  { %v1916_v61 = vpop.f32.mrf.mxu0 }
 0x10f   :  { %v2935_v63 = vadd.f32 %v1915_v59, %v469_v18  ;;  %v1960_v1 = vpop.f32.mrf.mxu1 }
 0x110   :  { %v1961_v7 = vadd.f32 %v1960_v1, %v1959_v60  ;;  %v1917_v13 = vpop.f32.mrf.mxu0 }
 0x111   :  { %v1918_v3 = vadd.f32 %v1917_v13, %v1916_v61  ;;  %v1962_v6 = vpop.f32.mrf.mxu1 }
 0x112   :  { %v1919_v8 = vpop.f32.mrf.mxu0 }
 0x113   :  { %v2937_v9 = vadd.f32 %v1918_v3, %v472_v23  ;;  %v1963_v11 = vpop.f32.mrf.mxu1 }
 0x114   :  { %v1964_v12 = vadd.f32 %v1963_v11, %v1962_v6  ;;  %v1920_v10 = vpop.f32.mrf.mxu0 }
 0x115   :  { %v1921_v15 = vadd.f32 %v1920_v10, %v1919_v8  ;;  %v1965_v16 = vpop.f32.mrf.mxu1 }
 0x116   :  { %v1922_v17 = vpop.f32.mrf.mxu0 }
 0x117   :  { %v2939_v19 = vadd.f32 %v1921_v15, %v477_v28  ;;  %v1966_v0 = vpop.f32.mrf.mxu1 }
 0x118   :  { %v1967_v21 = vadd.f32 %v1966_v0, %v1965_v16  ;;  %v1923_v18 = vpop.f32.mrf.mxu0 }
 0x119   :  { %v1968_v22 = vpop.f32.mrf.mxu1 }
 0x11a   :  { %v753_v24 = vpop.f32.mrf.mxu0 }
 0x11b   :  { %v2941_v26 = vadd.f32 %v1952_v43, %v753_v24  ;;  %v1969_v27 = vpop.f32.mrf.mxu1 }
 0x11c   :  { %v1970_v2 = vadd.f32 %v1969_v27, %v1968_v22  ;;  %v2173_v29 = vpop.f32.mrf.mxu0 }
 0x11d   :  { %v807_v23 = vmax.f32 %v2907_v62, %v2941_v26  ;;  %v1971_v30 = vpop.f32.mrf.mxu1 }
 0x11e   :  { %v756_v31 = vpop.f32.mrf.mxu0 }
 0x11f   :  { %v2945_v32 = vadd.f32 %v1955_v50, %v756_v31  ;;  %v1972_v33 = vpop.f32.mrf.mxu1 }
 0x120   :  { %v1973_v28 = vadd.f32 %v1972_v33, %v1971_v30  ;;  %v2174_v34 = vpop.f32.mrf.mxu0 }
 0x121   :  { %v808_v36 = vmax.f32 %v2911_v4, %v2945_v32  ;;  %v1974_v37 = vpop.f32.mrf.mxu1 }
 0x122   :  { %v761_v38 = vpop.f32.mrf.mxu0 }
 0x123   :  { %v2949_v39 = vadd.f32 %v1958_v57, %v761_v38  ;;  %v1975_v40 = vpop.f32.mrf.mxu1 }
 0x124   :  { %v1976_v42 = vadd.f32 %v1975_v40, %v1974_v37  ;;  %v2177_v43 = vpop.f32.mrf.mxu0 }
 0x125   :  { %v809_v44 = vmax.f32 %v2918_v14, %v2949_v39  ;;  %v1977_v45 = vpop.f32.mrf.mxu1 }
 0x126   :  { %v764_v46 = vpop.f32.mrf.mxu0 }
 0x127   :  { %v2953_v47 = vadd.f32 %v1961_v7, %v764_v46  ;;  %v1978_v49 = vpop.f32.mrf.mxu1 }
 0x128   :  { %v1979_v50 = vadd.f32 %v1978_v49, %v1977_v45  ;;  %v2178_v51 = vpop.f32.mrf.mxu0 }
 0x129   :  { %v810_v52 = vmax.f32 %v2921_v20, %v2953_v47  ;;  %v1980_v53 = vpop.f32.mrf.mxu1 }
 0x12a   :  { %v769_v54 = vpop.f32.mrf.mxu0 }
 0x12b   :  { %v2957_v56 = vadd.f32 %v1964_v12, %v769_v54  ;;  %v1981_v57 = vpop.f32.mrf.mxu1 }
 0x12c   :  { %v1982_v58 = vadd.f32 %v1981_v57, %v1980_v53  ;;  %v2181_v59 = vpop.f32.mrf.mxu0 }
 0x12d   :  { %v811_v60 = vmax.f32 %v2923_v25, %v2957_v56  ;;  %v1983_v61 = vpop.f32.mrf.mxu1 }
 0x12e   :  { %v772_v1 = vpop.f32.mrf.mxu0 }
 0x12f   :  { %v2961_v7 = vadd.f32 %v1967_v21, %v772_v1  ;;  %v1984_v13 = vpop.f32.mrf.mxu1 }
 0x130   :  { %v1985_v3 = vadd.f32 %v1984_v13, %v1983_v61  ;;  %v2182_v6 = vpop.f32.mrf.mxu0 }
 0x131   :  { %v812_v8 = vmax.f32 %v2925_v5, %v2961_v7  ;;  %v1986_v11 = vpop.f32.mrf.mxu1 }
 0x132   :  { %v777_v10 = vpop.f32.mrf.mxu0 }
 0x133   :  { %v2965_v12 = vadd.f32 %v1970_v2, %v777_v10  ;;  %v1987_v15 = vpop.f32.mrf.mxu1 }
 0x134   :  { %v1988_v16 = vadd.f32 %v1987_v15, %v1986_v11  ;;  %v2185_v17 = vpop.f32.mrf.mxu0 }
 0x135   :  { %v813_v0 = vmax.f32 %v2927_v35, %v2965_v12  ;;  %v1989_v18 = vpop.f32.mrf.mxu1 }
 0x136   :  { %v780_v22 = vpop.f32.mrf.mxu0 }
 0x137   :  { %v2969_v21 = vadd.f32 %v1973_v28, %v780_v22  ;;  %v1990_v24 = vpop.f32.mrf.mxu1 }
 0x138   :  { %v2186_v27 = vpop.f32.mrf.mxu0 }
 0x139   :  { %v814_v29 = vmax.f32 %v2929_v41, %v2969_v21  ;;  %v2017_v30 = vpop.f32.mrf.mxu1 }
 0x13a   :  { %v785_v31 = vpop.f32.mrf.mxu0 }
 0x13b   :  { %v2973_v33 = vadd.f32 %v1976_v42, %v785_v31  ;;  %v2018_v2 = vpop.f32.mrf.mxu1 }
 0x13c   :  { %v2019_v34 = vadd.f32 %v2018_v2, %v2017_v30  ;;  %v2189_v37 = vpop.f32.mrf.mxu0 }
 0x13d   :  { %v815_v38 = vmax.f32 %v2931_v48, %v2973_v33  ;;  %v2020_v40 = vpop.f32.mrf.mxu1 }
 0x13e   :  { %v788_v43 = vpop.f32.mrf.mxu0 }
 0x13f   :  { %v2977_v45 = vadd.f32 %v1979_v50, %v788_v43  ;;  %v2021_v28 = vpop.f32.mrf.mxu1 }
 0x140   :  { %v2022_v46 = vadd.f32 %v2021_v28, %v2020_v40  ;;  %v2190_v49 = vpop.f32.mrf.mxu0 }
 0x141   :  { %v816_v51 = vmax.f32 %v2933_v55, %v2977_v45  ;;  %v2023_v53 = vpop.f32.mrf.mxu1 }
 0x142   :  { %v793_v54 = vpop.f32.mrf.mxu0 }
 0x143   :  { %v2981_v42 = vadd.f32 %v1982_v58, %v793_v54  ;;  %v2024_v57 = vpop.f32.mrf.mxu1 }
 0x144   :  { %v2025_v59 = vadd.f32 %v2024_v57, %v2023_v53  ;;  %v2193_v61 = vpop.f32.mrf.mxu0 }
 0x145   :  { %v817_v1 = vmax.f32 %v2935_v63, %v2981_v42  ;;  %v2026_v13 = vpop.f32.mrf.mxu1 }
 0x146   :  { %v796_v6 = vpop.f32.mrf.mxu0 }
 0x147   :  { %v2985_v50 = vadd.f32 %v1985_v3, %v796_v6  ;;  %v2027_v11 = vpop.f32.mrf.mxu1 }
 0x148   :  { %v2028_v10 = vadd.f32 %v2027_v11, %v2026_v13  ;;  %v2194_v15 = vpop.f32.mrf.mxu0 }
 0x149   :  { %v818_v17 = vmax.f32 %v2937_v9, %v2985_v50  ;;  %v2029_v18 = vpop.f32.mrf.mxu1 }
 0x14a   :  { %v801_v22 = vpop.f32.mrf.mxu0 }
 0x14b   :  { %v2989_v58 = vadd.f32 %v1988_v16, %v801_v22  ;;  %v2030_v24 = vpop.f32.mrf.mxu1 }
 0x14c   :  { %v2031_v27 = vadd.f32 %v2030_v24, %v2029_v18  ;;  %v2197_v30 = vpop.f32.mrf.mxu0 }
 0x14d   :  { %v819_v31 = vmax.f32 %v2939_v19, %v2989_v58  ;;  %v2032_v2 = vpop.f32.mrf.mxu1 }
 0x14e   :  { %v804_v37 = vpop.f32.mrf.mxu0 }
 0x14f   :  { %v2033_v3 = vpop.f32.mrf.mxu1 }
 0x150   :  { %v2034_v40 = vadd.f32 %v2033_v3, %v2032_v2  ;;  %v2198_v43 = vpop.f32.mrf.mxu0 }
 0x151   :  { %v2035_v28 = vpop.f32.mrf.mxu1 }
 0x152   :  { %v1090_v49 = vpop.f32.mrf.mxu0 }
 0x153   :  { %v1091_v53 = vadd.f32 %v2019_v34, %v1090_v49  ;;  %v2036_v54 = vpop.f32.mrf.mxu1 }
 0x154   :  { %v2037_v57 = vadd.f32 %v2036_v54, %v2035_v28  ;;  %v2205_v61 = vpop.f32.mrf.mxu0 }
 0x155   :  { %v2996_v16 = vmax.f32 %v807_v23, %v1091_v53  ;;  %v2038_v13 = vpop.f32.mrf.mxu1 }
 0x156   :  { %v1093_v6 = vpop.f32.mrf.mxu0 }
 0x157   :  { %v1094_v11 = vadd.f32 %v2022_v46, %v1093_v6  ;;  %v2039_v15 = vpop.f32.mrf.mxu1 }
 0x158   :  { %v2040_v18 = vadd.f32 %v2039_v15, %v2038_v13  ;;  %v2206_v22 = vpop.f32.mrf.mxu0 }
 0x159   :  { %v3001_v24 = vmax.f32 %v808_v36, %v1094_v11  ;;  %v2041_v34 = vpop.f32.mrf.mxu1 }
 0x15a   :  { %v1098_v30 = vpop.f32.mrf.mxu0 }
 0x15b   :  { %v1099_v2 = vadd.f32 %v2025_v59, %v1098_v30  ;;  %v2042_v37 = vpop.f32.mrf.mxu1 }
 0x15c   :  { %v2043_v3 = vadd.f32 %v2042_v37, %v2041_v34  ;;  %v2209_v43 = vpop.f32.mrf.mxu0 }
 0x15d   :  { %v3006_v62 = vmax.f32 %v809_v44, %v1099_v2  ;;  %v2044_v26 = vpop.f32.mrf.mxu1 }
 0x15e   :  { %v1101_v23 = vpop.f32.mrf.mxu0 }
 0x15f   :  { %v1102_v46 = vadd.f32 %v2028_v10, %v1101_v23  ;;  %v2045_v28 = vpop.f32.mrf.mxu1 }
 0x160   :  { %v2046_v49 = vadd.f32 %v2045_v28, %v2044_v26  ;;  %v2210_v53 = vpop.f32.mrf.mxu0 }
 0x161   :  { %v3011_v4 = vmax.f32 %v810_v52, %v1102_v46  ;;  %v2047_v32 = vpop.f32.mrf.mxu1 }
 0x162   :  { %v1106_v36 = vpop.f32.mrf.mxu0 }
 0x163   :  { %v1107_v59 = vadd.f32 %v2031_v27, %v1106_v36  ;;  %v2048_v54 = vpop.f32.mrf.mxu1 }
 0x164   :  { %v2049_v61 = vadd.f32 %v2048_v54, %v2047_v32  ;;  %v2213_v13 = vpop.f32.mrf.mxu0 }
 0x165   :  { %v3016_v14 = vmax.f32 %v811_v60, %v1107_v59  ;;  %v2050_v39 = vpop.f32.mrf.mxu1 }
 0x166   :  { %v1109_v44 = vpop.f32.mrf.mxu0 }
 0x167   :  { %v1110_v10 = vadd.f32 %v2034_v40, %v1109_v44  ;;  %v2051_v6 = vpop.f32.mrf.mxu1 }
 0x168   :  { %v2052_v11 = vadd.f32 %v2051_v6, %v2050_v39  ;;  %v2214_v15 = vpop.f32.mrf.mxu0 }
 0x169   :  { %v3021_v20 = vmax.f32 %v812_v8, %v1110_v10  ;;  %v3023_v47 = vpop.f32.mrf.mxu1 }
 0x16a   :  { %v1114_v52 = vpop.f32.mrf.mxu0 }
 0x16b   :  { %v1115_v27 = vadd.f32 %v2037_v57, %v1114_v52  ;;  %v3025_v22 = vpop.f32.mrf.mxu1 }
 0x16c   :  { %v2217_v25 = vpop.f32.mrf.mxu0 }
 0x16d   :  { %v3030_v56 = vmax.f32 %v813_v0, %v1115_v27  ;;  %v2056_v60 = vpop.f32.mrf.mxu1 }
 0x16e   :  { %v1117_v40 = vpop.f32.mrf.mxu0 }
 0x16f   :  { %v1118_v34 = vadd.f32 %v2040_v18, %v1117_v40  ;;  %v2057_v30 = vpop.f32.mrf.mxu1 }
 0x170   :  { %v2218_v2 = vpop.f32.mrf.mxu0 }
 0x171   :  { %v3035_v5 = vmax.f32 %v814_v29, %v1118_v34  ;;  %v2084_v7 = vpop.f32.mrf.mxu1 }
 0x172   :  { %v1122_v8 = vpop.f32.mrf.mxu0 }
 0x173   :  { %v1123_v57 = vadd.f32 %v2043_v3, %v1122_v8  ;;  %v2085_v37 = vpop.f32.mrf.mxu1 }
 0x174   :  { %v2221_v43 = vpop.f32.mrf.mxu0 }
 0x175   :  { %v3040_v35 = vmax.f32 %v815_v38, %v1123_v57  ;;  %v2087_v12 = vpop.f32.mrf.mxu1 }
 0x176   :  { %v1125_v0 = vpop.f32.mrf.mxu0 }
 0x177   :  { %v1126_v18 = vadd.f32 %v2046_v49, %v1125_v0  ;;  %v2088_v26 = vpop.f32.mrf.mxu1 }
 0x178   :  { %v2222_v23 = vpop.f32.mrf.mxu0 }
 0x179   :  { %v3045_v41 = vmax.f32 %v816_v51, %v1126_v18  ;;  %v2090_v21 = vpop.f32.mrf.mxu1 }
 0x17a   :  { %v1130_v29 = vpop.f32.mrf.mxu0 }
 0x17b   :  { %v1131_v3 = vadd.f32 %v2049_v61, %v1130_v29  ;;  %v2091_v46 = vpop.f32.mrf.mxu1 }
 0x17c   :  { %v2225_v28 = vpop.f32.mrf.mxu0  ;;  %v2092_v60 = vadd.f32 %v2091_v46, %v2090_v21 }
 0x17d   :  { %v3050_v48 = vmax.f32 %v817_v1, %v1131_v3  ;;  %v2093_v33 = vpop.f32.mrf.mxu1  ;;  %v2086_v1 = vadd.f32 %v2085_v37, %v2084_v7 }
 0x17e   :  { %v1133_v38 = vpop.f32.mrf.mxu0 }
 0x17f   :  { %v1134_v49 = vadd.f32 %v2052_v11, %v1133_v38  ;;  %v2094_v53 = vpop.f32.mrf.mxu1  ;;  %v2089_v11 = vadd.f32 %v2088_v26, %v2087_v12 }
 0x180   :  { %v2226_v32 = vpop.f32.mrf.mxu0  ;;  %v2095_v37 = vadd.f32 %v2094_v53, %v2093_v33 }
 0x181   :  { %v3055_v55 = vmax.f32 %v818_v17, %v1134_v49  ;;  %v2096_v45 = vpop.f32.mrf.mxu1  ;;  %v3063_v17 = vld [vmem:[%s3127_s2] ss:$0 sm:$0xff] }
 0x182   :  { %v3057_v51 = vpop.f32.mrf.mxu0 }
 0x183   :  { %v2097_v36 = vpop.f32.mrf.mxu1 }
 0x184   :  { %v2229_v59 = vpop.f32.mrf.mxu0 }
 0x185   :  { %v2099_v54 = vpop.f32.mrf.mxu1 }
 0x186   :  { %v1141_v61 = vpop.f32.mrf.mxu0 }
 0x187   :  { %v2100_v63 = vpop.f32.mrf.mxu1 }
 0x188   :  { %v2230_v42 = vpop.f32.mrf.mxu0  ;;  %v2101_v59 = vadd.f32 %v2100_v63, %v2099_v54 }
 0x189   :  { %v2102_v13 = vpop.f32.mrf.mxu1 }
 0x18a   :  { %v1427_v39 = vpop.f32.mrf.mxu0 }
 0x18b   :  { %v1428_v44 = vadd.f32 %v2086_v1, %v1427_v39  ;;  %v2103_v10 = vpop.f32.mrf.mxu1 }
 0x18c   :  { %v2237_v6 = vpop.f32.mrf.mxu0 }
 0x18d   :  { %v1481_v9 = vmax.f32 %v2996_v16, %v1428_v44  ;;  %v2105_v50 = vpop.f32.mrf.mxu1 }
 0x18e   :  { %v1430_v15 = vpop.f32.mrf.mxu0 }
 0x18f   :  { %v1431_v52 = vadd.f32 %v2089_v11, %v1430_v15  ;;  %v2106_v27 = vpop.f32.mrf.mxu1  ;;  %v1501_v40 = vadd.f32 %v3063_v17, %v1481_v9  ;;  %v2104_v11 = vadd.f32 %v2103_v10, %v2102_v13 }
 0x190   :  { %v2238_v25 = vpop.f32.mrf.mxu0 }
 0x191   :  { %v1482_v34 = vmax.f32 %v3001_v24, %v1431_v52  ;;  %v2108_v30 = vpop.f32.mrf.mxu1  ;;  %v1514_v43 = vmax.f32 %v1501_v40, 0.0  ;;  %v2098_v24 = vadd.f32 %v2097_v36, %v2096_v45 }
 0x192   :  { %v1435_v2 = vpop.f32.mrf.mxu0 }
 0x193   :  { %v1502_v7 = vadd.f32 %v3063_v17, %v1482_v34  ;;  %v1436_v16 = vadd.f32 %v2092_v60, %v1435_v2  ;;  %v2109_v8 = vpop.f32.mrf.mxu1  ;;  %v2055_v60 = vadd.f32 %v3025_v22, %v3023_v47  ;;  %v2107_v34 = vadd.f32 %v2106_v27, %v2105_v50 }
 0x194   :  { %v2241_v57 = vpop.f32.mrf.mxu0 }
 0x195   :  { %v1515_v12 = vmax.f32 %v1502_v7, 0.0  ;;  %v1483_v0 = vmax.f32 %v3006_v62, %v1436_v16  ;;  %v3069_v18 = vpop.f32.mrf.mxu1  ;;  %v1139_v16 = vadd.f32 %v2055_v60, %v3057_v51 }
 0x196   :  { %v1438_v26 = vpop.f32.mrf.mxu0 }
 0x197   :  { %v1835_v23 = vpack.c.bf16 %v1515_v12, %v1514_v43  ;;  %v1439_v21 = vadd.f32 %v2095_v37, %v1438_v26  ;;  %v2112_v29 = vpop.f32.mrf.mxu1  ;;  %v1503_v46 = vadd.f32 %v3063_v17, %v1483_v0  ;;  %v2110_v26 = vadd.f32 %v2109_v8, %v2108_v30 }
 0x198   :  { %v2242_v3 = vpop.f32.mrf.mxu0 }
 0x199   :  { %1836 = vst [vmem:[%s3128_s3] sm:$0xff] %v1835_v23   ;;  %v1484_v28 = vmax.f32 %v3011_v4, %v1439_v21  ;;  %v3076_v33 = vpop.f32.mrf.mxu1  ;;  %v1516_v61 = vmax.f32 %v1503_v46, 0.0 }
 0x19a   :  { %v1443_v38 = vpop.f32.mrf.mxu0 }
 0x19b   :  { %v1504_v62 = vadd.f32 %v3063_v17, %v1484_v28  ;;  %v1444_v49 = vadd.f32 %v2098_v24, %v1443_v38  ;;  %v2115_v53 = vpop.f32.mrf.mxu1  ;;  %v2113_v24 = vadd.f32 %v2112_v29, %v3069_v18 }
 0x19c   :  { %v2245_v32 = vpop.f32.mrf.mxu0 }
 0x19d   :  { %v1517_v42 = vmax.f32 %v1504_v62, 0.0  ;;  %v1485_v45 = vmax.f32 %v3016_v14, %v1444_v49  ;;  %v3080_v36 = vpop.f32.mrf.mxu1 }
 0x19e   :  { %v1446_v1 = vpop.f32.mrf.mxu0 }
 0x19f   :  { %v1840_v39 = vpack.c.bf16 %v1517_v42, %v1516_v61  ;;  %v1447_v44 = vadd.f32 %v2101_v59, %v1446_v1  ;;  %v2118_v6 = vpop.f32.mrf.mxu1  ;;  %v1505_v9 = vadd.f32 %v3063_v17, %v1485_v45  ;;  %v2116_v61 = vadd.f32 %v2115_v53, %v3076_v33 }
 0x1a0   :  { %v2246_v4 = vpop.f32.mrf.mxu0  ;;  %v2119_v33 = vadd.f32 %v2118_v6, %v3080_v36 }
 0x1a1   :  { %1862 = vst [vmem:[%s3128_s3 + $0x8] sm:$0xff] %v1840_v39   ;;  %v1486_v54 = vmax.f32 %v3021_v20, %v1447_v44  ;;  %v2120_v63 = vpop.f32.mrf.mxu1  ;;  %v1518_v13 = vmax.f32 %v1505_v9, 0.0 }
 0x1a2   :  { %v1451_v15 = vpop.f32.mrf.mxu0 }
 0x1a3   :  { %v1506_v14 = vadd.f32 %v3063_v17, %v1486_v54  ;;  %v1452_v52 = vadd.f32 %v2104_v11, %v1451_v15  ;;  %v2121_v25 = vpop.f32.mrf.mxu1 }
 0x1a4   :  { %v2249_v40 = vpop.f32.mrf.mxu0  ;;  %v2122_v57 = vadd.f32 %v2121_v25, %v2120_v63 }
 0x1a5   :  { %v1519_v10 = vmax.f32 %v1506_v14, 0.0  ;;  %v1487_v2 = vmax.f32 %v3030_v56, %v1452_v52  ;;  %v2123_v7 = vpop.f32.mrf.mxu1  ;;  %v1156_v56 = vmax.f32 %v819_v31, %v1139_v16 }
 0x1a6   :  { %v1454_v20 = vpop.f32.mrf.mxu0 }
 0x1a7   :  { %v1845_v37 = vpack.c.bf16 %v1519_v10, %v1518_v13  ;;  %v1455_v43 = vadd.f32 %v2107_v34, %v1454_v20  ;;  %v2124_v12 = vpop.f32.mrf.mxu1  ;;  %v1507_v47 = vadd.f32 %v3063_v17, %v1487_v2 }
 0x1a8   :  { %v2250_v0 = vpop.f32.mrf.mxu0 }
 0x1a9   :  { %1863 = vst [vmem:[%s3128_s3 + $0x10] sm:$0xff] %v1845_v37   ;;  %v1488_v22 = vmax.f32 %v3035_v5, %v1455_v43  ;;  %v1475_v50 = vpop.f32.mrf.mxu1  ;;  %v1520_v46 = vmax.f32 %v1507_v47, 0.0 }
 0x1aa   :  { %v1476_v51 = vadd.f32 %v2122_v57, %v1475_v50  ;;  %v1459_v27 = vpop.f32.mrf.mxu0 }
 0x1ab   :  { %v1508_v23 = vadd.f32 %v3063_v17, %v1488_v22  ;;  %v1460_v21 = vadd.f32 %v2110_v26, %v1459_v27  ;;  %v2261_v3 = vpop.f32.mrf.mxu1 }
 0x1ac   :  { %v1493_v30 = vmax.f32 %v1156_v56, %v1476_v51  ;;  %v2253_v8 = vpop.f32.mrf.mxu0 }
 0x1ad   :  { %v1521_v28 = vmax.f32 %v1508_v23, 0.0  ;;  %v1489_v38 = vmax.f32 %v3040_v35, %v1460_v21  ;;  %v1478_v5 = vpop.f32.mrf.mxu1 }
 0x1ae   :  { %v1513_v62 = vadd.f32 %v3063_v17, %v1493_v30  ;;  %v1462_v49 = vpop.f32.mrf.mxu0 }
 0x1af   :  { %v1850_v19 = vpack.c.bf16 %v1521_v28, %v1520_v46  ;;  %v1463_v58 = vadd.f32 %v2113_v24, %v1462_v49  ;;  %v2262_v31 = vpop.f32.mrf.mxu1  ;;  %v1509_v18 = vadd.f32 %v3063_v17, %v1489_v38 }
 0x1b0   :  { %v1526_v32 = vmax.f32 %v1513_v62, 0.0  ;;  %v2254_v59 = vpop.f32.mrf.mxu0 }
 0x1b1   :  { %1864 = vst [vmem:[%s3128_s3 + $0x18] sm:$0xff] %v1850_v19   ;;  %v1490_v29 = vmax.f32 %v3045_v41, %v1463_v58  ;;  %v1522_v53 = vmax.f32 %v1509_v18, 0.0 }
 0x1b2   :  { %v1831_v35 = vpack.c.bf16 %v1526_v32, %v1526_v32  ;;  %v1467_v42 = vpop.f32.mrf.mxu0 }
 0x1b3   :  { %v1510_v45 = vadd.f32 %v3063_v17, %v1490_v29  ;;  %v1468_v1 = vadd.f32 %v2116_v61, %v1467_v42 }
 0x1b4   :  { %1592 = vst [vmem:[%s3128_s3 + $0x30] sm:$0xf] %v1831_v35  ;;  %v2257_v39 = vpop.f32.mrf.mxu0 }
 0x1b5   :  { %v1523_v44 = vmax.f32 %v1510_v45, 0.0  ;;  %v1491_v4 = vmax.f32 %v3050_v48, %v1468_v1 }
 0x1b6   :  { %v1470_v11 = vpop.f32.mrf.mxu0 }
 0x1b7   :  { %v1855_v9 = vpack.c.bf16 %v1523_v44, %v1522_v53  ;;  %v1471_v54 = vadd.f32 %v2119_v33, %v1470_v11  ;;  %v1511_v63 = vadd.f32 %v3063_v17, %v1491_v4 }
 0x1b8   :  { %v2258_v41 = vpop.f32.mrf.mxu0 }
 0x1b9   :  { %1865 = vst [vmem:[%s3128_s3 + $0x20] sm:$0xff] %v1855_v9   ;;  %v1492_v15 = vmax.f32 %v3055_v55, %v1471_v54  ;;  %v1524_v52 = vmax.f32 %v1511_v63, 0.0 }
 0x1bb   :  { %v1512_v14 = vadd.f32 %v3063_v17, %v1492_v15 }
 0x1bd   :  { %v1525_v36 = vmax.f32 %v1512_v14, 0.0 }
 0x1bf   :  { %v1860_v6 = vpack.c.bf16 %v1525_v36, %v1524_v52 }
 0x1c1   :  { %1866 = vst [vmem:[%s3128_s3 + $0x28] sm:$0xff] %v1860_v6  }

// kernel: forward.5
= control target key start
LH: loop header
LB: loop body
LE: loop exit
PB: predicated region body
PF: predicated region fallthrough
CT: control target
= control target key end

     0   :  { %vm5968_vm0 = vmmov 0   ;;  %s7316_s1 = inlined_call_operand.vmem [shape: bf16[6272,128], index: 1, kind: input, shape index: {}]   ;;  %s7317_s0 = inlined_call_operand.vmem [shape: bf16[8,6272], index: 0, kind: input, shape index: {}]   ;;  %s7318_s2 = inlined_call_operand.vmem [shape: f32[1,128], index: 2, kind: input, shape index: {}]   ;;  %s7319_s3 = inlined_call_operand.vmem [shape: bf16[128,128], index: 3, kind: input, shape index: {}]   ;;  %s7320_s4 = inlined_call_operand.vmem [shape: f32[1,128], index: 4, kind: input, shape index: {}]   ;;  %s7321_s5 = inlined_call_operand.vmem [shape: f32[8,128], index: 5, kind: output, shape index: {}]  }
   0x1   :  { %v5518_v0 = vld [vmem:[%s7316_s1 + $0x78] sm:$0xff]   ;;  %v5522_v4 = vld [vmem:[%s7316_s1 + $0x70] sm:$0xff]   ;;  %v5526_v8 = vld [vmem:[%s7316_s1 + $0x68] sm:$0xff]  }
   0x2   :  { %v5519_v1 = vld [vmem:[%s7316_s1 + $0x38] sm:$0xff]   ;;  %4930 = vmatprep.subr.bf16.mxu0 %v5518_v0  ;;  %v5523_v5 = vld [vmem:[%s7316_s1 + $0x30] sm:$0xff]   ;;  %v5527_v9 = vld [vmem:[%s7316_s1 + $0x28] sm:$0xff]  }
   0x3   :  { %v5520_v2 = vld [vmem:[%s7316_s1 + $0xf8] sm:$0xff]   ;;  %4931 = vmatpush3.bf16.msra.mxu0 %v5519_v1  ;;  %v5524_v6 = vld [vmem:[%s7316_s1 + $0xf0] sm:$0xff]   ;;  %v5528_v10 = vld [vmem:[%s7316_s1 + $0xe8] sm:$0xff]  }
   0x4   :  { %v5521_v3 = vld [vmem:[%s7316_s1 + $0xb8] sm:$0xff]   ;;  %4952 = vmatprep.subr.bf16.mxu1 %v5520_v2  ;;  %4932 = vmatprep.subr.bf16.mxu0 %v5522_v4  ;;  %v5525_v7 = vld [vmem:[%s7316_s1 + $0xb0] sm:$0xff]   ;;  %v5529_v11 = vld [vmem:[%s7316_s1 + $0xa8] sm:$0xff]  }
   0x5   :  { %4953 = vmatpush3.bf16.msra.mxu1 %v5521_v3  ;;  %v5530_v12 = vld [vmem:[%s7316_s1 + $0x60] sm:$0xff]   ;;  %v5534_v16 = vld [vmem:[%s7316_s1 + $0x58] sm:$0xff]   ;;  %v5538_v20 = vld [vmem:[%s7316_s1 + $0x50] sm:$0xff]  }
   0x6   :  { %4954 = vmatprep.subr.bf16.mxu1 %v5524_v6  ;;  %v5531_v13 = vld [vmem:[%s7316_s1 + $0x20] sm:$0xff]   ;;  %v5535_v17 = vld [vmem:[%s7316_s1 + $0x18] sm:$0xff]   ;;  %v5539_v21 = vld [vmem:[%s7316_s1 + $0x10] sm:$0xff]  }
   0x7   :  { %4933 = vmatpush3.bf16.msra.mxu0 %v5523_v5  ;;  %v5532_v14 = vld [vmem:[%s7316_s1 + $0xe0] sm:$0xff]   ;;  %v5536_v18 = vld [vmem:[%s7316_s1 + $0xd8] sm:$0xff]   ;;  %v5540_v22 = vld [vmem:[%s7316_s1 + $0xd0] sm:$0xff]  }
   0x8   :  { %4934 = vmatprep.subr.bf16.mxu0 %v5526_v8  ;;  %v5533_v15 = vld [vmem:[%s7316_s1 + $0xa0] sm:$0xff]   ;;  %v5537_v19 = vld [vmem:[%s7316_s1 + $0x98] sm:$0xff]   ;;  %v5541_v23 = vld [vmem:[%s7316_s1 + $0x90] sm:$0xff]  }
   0x9   :  { %4955 = vmatpush3.bf16.msra.mxu1 %v5525_v7  ;;  %v5542_v24 = vld [vmem:[%s7316_s1 + $0x48] sm:$0xff]   ;;  %v5546_v28 = vld [vmem:[%s7316_s1 + $0x40] sm:$0xff]   ;;  %v5552_v35 = vld [vmem:[%s7316_s1 + $0x178] sm:$0xff]  }
   0xa   :  { %4956 = vmatprep.subr.bf16.mxu1 %v5528_v10  ;;  %v5543_v25 = vld [vmem:[%s7316_s1 + $0x8] sm:$0xff]   ;;  %v5547_v29 = vld [vmem:[%s7316_s1] sm:$0xff]   ;;  %v5555_v39 = vld [vmem:[%s7316_s1 + $0x138] sm:$0xff]  }
   0xb   :  { %4935 = vmatpush3.bf16.msra.mxu0 %v5527_v9  ;;  %v5544_v26 = vld [vmem:[%s7316_s1 + $0xc8] sm:$0xff]   ;;  %v5548_v30 = vld [vmem:[%s7316_s1 + $0xc0] sm:$0xff]   ;;  %v5556_v40 = vld [vmem:[%s7316_s1 + $0x1f8] sm:$0xff]  }
   0xc   :  { %4936 = vmatprep.subr.bf16.mxu0 %v5530_v12  ;;  %v5545_v27 = vld [vmem:[%s7316_s1 + $0x88] sm:$0xff]   ;;  %v21_v31 = vld [vmem:[%s7317_s0] sm:$0xff]  ;;  %v5557_v41 = vld [vmem:[%s7316_s1 + $0x1b8] sm:$0xff]  }
   0xd   :  { %4957 = vmatpush3.bf16.msra.mxu1 %v5529_v11  ;;  %v4480_v32 = vcombine.low %v21_v31, %v21_v31  ;;  %v4481_v33 = vcombine.high %v21_v31, %v21_v31  ;;  %v5551_v34 = vld [vmem:[%s7316_s1 + $0x80] sm:$0xff]   ;;  %v22_v36 = vld [vmem:[%s7317_s0 + $0x8] sm:$0xff]  ;;  %v5558_v42 = vld [vmem:[%s7316_s1 + $0x170] sm:$0xff]  }
   0xe   :  { %4958 = vmatprep.subr.bf16.mxu1 %v5532_v14  ;;  %v4482_v37 = vcombine.low %v22_v36, %v22_v36  ;;  %v4483_v38 = vcombine.high %v22_v36, %v22_v36  ;;  %v5559_v43 = vld [vmem:[%s7316_s1 + $0x130] sm:$0xff]   ;;  %v5562_v46 = vld [vmem:[%s7316_s1 + $0x168] sm:$0xff]   ;;  %v5566_v50 = vld [vmem:[%s7316_s1 + $0x160] sm:$0xff]  }
   0xf   :  { %4937 = vmatpush3.bf16.msra.mxu0 %v5531_v13  ;;  %3393 = vmatprep.mubr.bf16.mxu0 %v4481_v33  ;;  %v5560_v44 = vld [vmem:[%s7316_s1 + $0x1f0] sm:$0xff]   ;;  %v5563_v47 = vld [vmem:[%s7316_s1 + $0x128] sm:$0xff]   ;;  %v5567_v51 = vld [vmem:[%s7316_s1 + $0x120] sm:$0xff]  }
  0x10   :  { %4938 = vmatprep.subr.bf16.mxu0 %v5534_v16  ;;  %3433 = vmatprep.mubr.bf16.mxu1 %v4483_v38  ;;  %v5561_v45 = vld [vmem:[%s7316_s1 + $0x1b0] sm:$0xff]   ;;  %v5564_v48 = vld [vmem:[%s7316_s1 + $0x1e8] sm:$0xff]   ;;  %v5568_v52 = vld [vmem:[%s7316_s1 + $0x1e0] sm:$0xff]  }
  0x11   :  { %4959 = vmatpush3.bf16.msra.mxu1 %v5533_v15  ;;  %v5565_v49 = vld [vmem:[%s7316_s1 + $0x1a8] sm:$0xff]   ;;  %v5569_v53 = vld [vmem:[%s7316_s1 + $0x1a0] sm:$0xff]   ;;  %v5570_v54 = vld [vmem:[%s7316_s1 + $0x158] sm:$0xff]  }
  0x12   :  { %4960 = vmatprep.subr.bf16.mxu1 %v5536_v18  ;;  %v5571_v55 = vld [vmem:[%s7316_s1 + $0x118] sm:$0xff]   ;;  %v5574_v58 = vld [vmem:[%s7316_s1 + $0x150] sm:$0xff]   ;;  %v5578_v62 = vld [vmem:[%s7316_s1 + $0x148] sm:$0xff]  }
  0x13   :  { %4939 = vmatpush3.bf16.msra.mxu0 %v5535_v17  ;;  %v5572_v56 = vld [vmem:[%s7316_s1 + $0x1d8] sm:$0xff]   ;;  %v5575_v59 = vld [vmem:[%s7316_s1 + $0x110] sm:$0xff]   ;;  %v5579_v63 = vld [vmem:[%s7316_s1 + $0x108] sm:$0xff]  }
  0x14   :  { %4940 = vmatprep.subr.bf16.mxu0 %v5538_v20  ;;  %v5573_v57 = vld [vmem:[%s7316_s1 + $0x198] sm:$0xff]   ;;  %v5576_v60 = vld [vmem:[%s7316_s1 + $0x1d0] sm:$0xff]   ;;  %v5580_v0 = vld [vmem:[%s7316_s1 + $0x1c8] sm:$0xff]  }
  0x15   :  { %4961 = vmatpush3.bf16.msra.mxu1 %v5537_v19  ;;  %v5577_v61 = vld [vmem:[%s7316_s1 + $0x190] sm:$0xff]   ;;  %v5581_v1 = vld [vmem:[%s7316_s1 + $0x188] sm:$0xff]   ;;  %v5582_v2 = vld [vmem:[%s7316_s1 + $0x140] sm:$0xff]  }
  0x16   :  { %4962 = vmatprep.subr.bf16.mxu1 %v5540_v22  ;;  %v5583_v3 = vld [vmem:[%s7316_s1 + $0x100] sm:$0xff]   ;;  %v23_v5 = vld [vmem:[%s7317_s0 + $0x10] sm:$0xff]  ;;  %v5588_v9 = vld [vmem:[%s7316_s1 + $0x278] sm:$0xff]  }
  0x17   :  { %4941 = vmatpush3.bf16.msra.mxu0 %v5539_v21  ;;  %v5584_v4 = vld [vmem:[%s7316_s1 + $0x1c0] sm:$0xff]   ;;  %v4484_v6 = vcombine.low %v23_v5, %v23_v5  ;;  %v4485_v7 = vcombine.high %v23_v5, %v23_v5  ;;  %v24_v10 = vld [vmem:[%s7317_s0 + $0x18] sm:$0xff]  ;;  %v5594_v16 = vld [vmem:[%s7316_s1 + $0x270] sm:$0xff]  }
  0x18   :  { %4942 = vmatprep.subr.bf16.mxu0 %v5542_v24  ;;  %v5587_v8 = vld [vmem:[%s7316_s1 + $0x180] sm:$0xff]   ;;  %v4486_v11 = vcombine.low %v24_v10, %v24_v10  ;;  %v4487_v12 = vcombine.high %v24_v10, %v24_v10  ;;  %v5591_v13 = vld [vmem:[%s7316_s1 + $0x238] sm:$0xff]   ;;  %v5595_v17 = vld [vmem:[%s7316_s1 + $0x230] sm:$0xff]  }
  0x19   :  { %4963 = vmatpush3.bf16.msra.mxu1 %v5541_v23  ;;  %v5592_v14 = vld [vmem:[%s7316_s1 + $0x2f8] sm:$0xff]   ;;  %v5596_v18 = vld [vmem:[%s7316_s1 + $0x2f0] sm:$0xff]   ;;  %v5598_v20 = vld [vmem:[%s7316_s1 + $0x268] sm:$0xff]  }
  0x1a   :  { %4964 = vmatprep.subr.bf16.mxu1 %v5544_v26  ;;  %v5593_v15 = vld [vmem:[%s7316_s1 + $0x2b8] sm:$0xff]   ;;  %v5597_v19 = vld [vmem:[%s7316_s1 + $0x2b0] sm:$0xff]   ;;  %v5599_v21 = vld [vmem:[%s7316_s1 + $0x228] sm:$0xff]  }
  0x1b   :  { %4943 = vmatpush3.bf16.msra.mxu0 %v5543_v25  ;;  %v5600_v22 = vld [vmem:[%s7316_s1 + $0x2e8] sm:$0xff]   ;;  %v5602_v24 = vld [vmem:[%s7316_s1 + $0x260] sm:$0xff]   ;;  %v5609_v31 = vld [vmem:[%s7316_s1 + $0x298] sm:$0xff]  }
  0x1c   :  { %4944 = vmatprep.subr.bf16.mxu0 %v5546_v28  ;;  %v5601_v23 = vld [vmem:[%s7316_s1 + $0x2a8] sm:$0xff]   ;;  %v5603_v25 = vld [vmem:[%s7316_s1 + $0x220] sm:$0xff]   ;;  %v5606_v28 = vld [vmem:[%s7316_s1 + $0x258] sm:$0xff]  }
  0x1d   :  { %4965 = vmatpush3.bf16.msra.mxu1 %v5545_v27  ;;  %v5604_v26 = vld [vmem:[%s7316_s1 + $0x2e0] sm:$0xff]   ;;  %v5611_v33 = vld [vmem:[%s7316_s1 + $0x210] sm:$0xff]   ;;  %v5614_v36 = vld [vmem:[%s7316_s1 + $0x248] sm:$0xff]  }
  0x1e   :  { %4966 = vmatprep.subr.bf16.mxu1 %v5548_v30  ;;  %v5605_v27 = vld [vmem:[%s7316_s1 + $0x2a0] sm:$0xff]   ;;  %v5608_v30 = vld [vmem:[%s7316_s1 + $0x2d8] sm:$0xff]   ;;  %v5616_v38 = vld [vmem:[%s7316_s1 + $0x2c8] sm:$0xff]  }
  0x1f   :  { %4945 = vmatpush3.bf16.msra.mxu0 %v5547_v29  ;;  %v5607_v29 = vld [vmem:[%s7316_s1 + $0x218] sm:$0xff]   ;;  %v5650_v10 = vld [vmem:[%s7316_s1 + $0x348] sm:$0xff]  }
  0x20   :  { %4974 = vmatprep.subr.bf16.mxu0 %v5552_v35  ;;  %v5613_v35 = vld [vmem:[%s7316_s1 + $0x290] sm:$0xff]   ;;  %v5645_v5 = vld [vmem:[%s7316_s1 + $0x398] sm:$0xff]  }
  0x21   :  { %4967 = vmatpush3.bf16.msra.mxu1 %v5551_v34  ;;  %v5612_v34 = vld [vmem:[%s7316_s1 + $0x2d0] sm:$0xff]  }
  0x22   :  { %3394 = vmatmul.mubr.bf16.vlgmr.msra.gmra.mxu0 %v4480_v32  ;;  %4996 = vmatprep.subr.bf16.mxu1 %v5556_v40  ;;  %v5610_v32 = vld [vmem:[%s7316_s1 + $0x250] sm:$0xff]   ;;  %v5618_v40 = vld [vmem:[%s7316_s1 + $0x240] sm:$0xff]  }
  0x23   :  { %4975 = vmatpush3.bf16.msra.mxu0 %v5555_v39  ;;  %3473 = vmatprep.mubr.bf16.mxu0 %v4485_v7  ;;  %v5617_v39 = vld [vmem:[%s7316_s1 + $0x288] sm:$0xff]   ;;  %v5647_v7 = vld [vmem:[%s7316_s1 + $0x310] sm:$0xff]  }
  0x24   :  { %3434 = vmatmul.mubr.bf16.vlgmr.msra.gmra.mxu1 %v4482_v37  ;;  %4976 = vmatprep.subr.bf16.mxu0 %v5558_v42  ;;  %v5615_v37 = vld [vmem:[%s7316_s1 + $0x208] sm:$0xff]   ;;  %v5620_v42 = vld [vmem:[%s7316_s1 + $0x2c0] sm:$0xff]  }
  0x25   :  { %4997 = vmatpush3.bf16.msra.mxu1 %v5557_v41  ;;  %3513 = vmatprep.mubr.bf16.mxu1 %v4487_v12  ;;  %v5619_v41 = vld [vmem:[%s7316_s1 + $0x200] sm:$0xff]   ;;  %v5652_v12 = vld [vmem:[%s7316_s1 + $0x3c8] sm:$0xff]  }
  0x26   :  { %4998 = vmatprep.subr.bf16.mxu1 %v5560_v44 }
  0x27   :  { %4977 = vmatpush3.bf16.msra.mxu0 %v5559_v43  ;;  %v25_v43 = vld [vmem:[%s7317_s0 + $0x20] sm:$0xff] }
  0x28   :  { %4978 = vmatprep.subr.bf16.mxu0 %v5562_v46  ;;  %v4488_v44 = vcombine.low %v25_v43, %v25_v43  ;;  %v5623_v46 = vld [vmem:[%s7316_s1 + $0x280] sm:$0xff]  }
  0x29   :  { %4999 = vmatpush3.bf16.msra.mxu1 %v5561_v45  ;;  %v4489_v45 = vcombine.high %v25_v43, %v25_v43  ;;  %v5681_v43 = vld [vmem:[%s7316_s1 + $0x498] sm:$0xff]  }
  0x2a   :  { %5000 = vmatprep.subr.bf16.mxu1 %v5564_v48  ;;  %v26_v48 = vld [vmem:[%s7317_s0 + $0x28] sm:$0xff] }
  0x2b   :  { %4979 = vmatpush3.bf16.msra.mxu0 %v5563_v47  ;;  %v5624_v47 = vld [vmem:[%s7316_s1 + $0x378] sm:$0xff]  }
  0x2c   :  { %4980 = vmatprep.subr.bf16.mxu0 %v5566_v50  ;;  %v4491_v50 = vcombine.high %v26_v48, %v26_v48 }
  0x2d   :  { %5001 = vmatpush3.bf16.msra.mxu1 %v5565_v49  ;;  %v4490_v49 = vcombine.low %v26_v48, %v26_v48  ;;  %v5686_v48 = vld [vmem:[%s7316_s1 + $0x448] sm:$0xff]  }
  0x2e   :  { %5002 = vmatprep.subr.bf16.mxu1 %v5568_v52  ;;  %v5628_v52 = vld [vmem:[%s7316_s1 + $0x3f8] sm:$0xff]  }
  0x2f   :  { %4981 = vmatpush3.bf16.msra.mxu0 %v5567_v51  ;;  %v5627_v51 = vld [vmem:[%s7316_s1 + $0x338] sm:$0xff]  }
  0x30   :  { %4982 = vmatprep.subr.bf16.mxu0 %v5570_v54  ;;  %v5630_v54 = vld [vmem:[%s7316_s1 + $0x370] sm:$0xff]  }
  0x31   :  { %5003 = vmatpush3.bf16.msra.mxu1 %v5569_v53  ;;  %v5629_v53 = vld [vmem:[%s7316_s1 + $0x3b8] sm:$0xff]  }
  0x32   :  { %5004 = vmatprep.subr.bf16.mxu1 %v5572_v56  ;;  %v5632_v56 = vld [vmem:[%s7316_s1 + $0x3f0] sm:$0xff]  }
  0x33   :  { %4983 = vmatpush3.bf16.msra.mxu0 %v5571_v55  ;;  %v5631_v55 = vld [vmem:[%s7316_s1 + $0x330] sm:$0xff]  }
  0x34   :  { %4984 = vmatprep.subr.bf16.mxu0 %v5574_v58  ;;  %v5634_v58 = vld [vmem:[%s7316_s1 + $0x368] sm:$0xff]  }
  0x35   :  { %5005 = vmatpush3.bf16.msra.mxu1 %v5573_v57  ;;  %v5633_v57 = vld [vmem:[%s7316_s1 + $0x3b0] sm:$0xff]  }
  0x36   :  { %5006 = vmatprep.subr.bf16.mxu1 %v5576_v60  ;;  %v5636_v60 = vld [vmem:[%s7316_s1 + $0x3e8] sm:$0xff]  }
  0x37   :  { %4985 = vmatpush3.bf16.msra.mxu0 %v5575_v59  ;;  %v5635_v59 = vld [vmem:[%s7316_s1 + $0x328] sm:$0xff]  }
  0x38   :  { %4986 = vmatprep.subr.bf16.mxu0 %v5578_v62  ;;  %v5638_v62 = vld [vmem:[%s7316_s1 + $0x360] sm:$0xff]  }
  0x39   :  { %5007 = vmatpush3.bf16.msra.mxu1 %v5577_v61  ;;  %v5637_v61 = vld [vmem:[%s7316_s1 + $0x3a8] sm:$0xff]  }
  0x3a   :  { %5008 = vmatprep.subr.bf16.mxu1 %v5580_v0  ;;  %v5640_v0 = vld [vmem:[%s7316_s1 + $0x3e0] sm:$0xff]  }
  0x3b   :  { %4987 = vmatpush3.bf16.msra.mxu0 %v5579_v63  ;;  %v5639_v63 = vld [vmem:[%s7316_s1 + $0x320] sm:$0xff]  }
  0x3c   :  { %4988 = vmatprep.subr.bf16.mxu0 %v5582_v2  ;;  %v5642_v2 = vld [vmem:[%s7316_s1 + $0x358] sm:$0xff]  }
  0x3d   :  { %5009 = vmatpush3.bf16.msra.mxu1 %v5581_v1  ;;  %v5641_v1 = vld [vmem:[%s7316_s1 + $0x3a0] sm:$0xff]  }
  0x3e   :  { %5010 = vmatprep.subr.bf16.mxu1 %v5584_v4  ;;  %v5644_v4 = vld [vmem:[%s7316_s1 + $0x3d8] sm:$0xff]  }
  0x3f   :  { %4989 = vmatpush3.bf16.msra.mxu0 %v5583_v3  ;;  %v5643_v3 = vld [vmem:[%s7316_s1 + $0x318] sm:$0xff]  }
  0x40   :  { %5018 = vmatprep.subr.bf16.mxu0 %v5588_v9  ;;  %v5649_v9 = vld [vmem:[%s7316_s1 + $0x390] sm:$0xff]  }
  0x41   :  { %5011 = vmatpush3.bf16.msra.mxu1 %v5587_v8  ;;  %v5648_v8 = vld [vmem:[%s7316_s1 + $0x3d0] sm:$0xff]  }
  0x42   :  { %3474 = vmatmul.mubr.bf16.vlgmr.msra.gmra.mxu0 %v4484_v6  ;;  %5040 = vmatprep.subr.bf16.mxu1 %v5592_v14  ;;  %v5646_v6 = vld [vmem:[%s7316_s1 + $0x350] sm:$0xff]   ;;  %v5654_v14 = vld [vmem:[%s7316_s1 + $0x340] sm:$0xff]  }
  0x43   :  { %5019 = vmatpush3.bf16.msra.mxu0 %v5591_v13  ;;  %3553 = vmatprep.mubr.bf16.mxu0 %v4489_v45  ;;  %v5653_v13 = vld [vmem:[%s7316_s1 + $0x388] sm:$0xff]   ;;  %v5683_v45 = vld [vmem:[%s7316_s1 + $0x410] sm:$0xff]  }
  0x44   :  { %3514 = vmatmul.mubr.bf16.vlgmr.msra.gmra.mxu1 %v4486_v11  ;;  %5020 = vmatprep.subr.bf16.mxu0 %v5594_v16  ;;  %v5651_v11 = vld [vmem:[%s7316_s1 + $0x308] sm:$0xff]   ;;  %v5656_v16 = vld [vmem:[%s7316_s1 + $0x3c0] sm:$0xff]  }
  0x45   :  { %5041 = vmatpush3.bf16.msra.mxu1 %v5593_v15  ;;  %3593 = vmatprep.mubr.bf16.mxu1 %v4491_v50  ;;  %v5655_v15 = vld [vmem:[%s7316_s1 + $0x300] sm:$0xff]   ;;  %v5688_v50 = vld [vmem:[%s7316_s1 + $0x4c8] sm:$0xff]  }
  0x46   :  { %5042 = vmatprep.subr.bf16.mxu1 %v5596_v18 }
  0x47   :  { %5021 = vmatpush3.bf16.msra.mxu0 %v5595_v17  ;;  %v27_v17 = vld [vmem:[%s7317_s0 + $0x30] sm:$0xff] }
  0x48   :  { %5022 = vmatprep.subr.bf16.mxu0 %v5598_v20  ;;  %v4492_v18 = vcombine.low %v27_v17, %v27_v17  ;;  %v5659_v20 = vld [vmem:[%s7316_s1 + $0x380] sm:$0xff]  }
  0x49   :  { %5043 = vmatpush3.bf16.msra.mxu1 %v5597_v19  ;;  %v4493_v19 = vcombine.high %v27_v17, %v27_v17  ;;  %v5717_v17 = vld [vmem:[%s7316_s1 + $0x598] sm:$0xff]  }
  0x4a   :  { %5044 = vmatprep.subr.bf16.mxu1 %v5600_v22  ;;  %v28_v22 = vld [vmem:[%s7317_s0 + $0x38] sm:$0xff] }
  0x4b   :  { %5023 = vmatpush3.bf16.msra.mxu0 %v5599_v21  ;;  %v5660_v21 = vld [vmem:[%s7316_s1 + $0x478] sm:$0xff]  }
  0x4c   :  { %5024 = vmatprep.subr.bf16.mxu0 %v5602_v24  ;;  %v4495_v24 = vcombine.high %v28_v22, %v28_v22 }
  0x4d   :  { %5045 = vmatpush3.bf16.msra.mxu1 %v5601_v23  ;;  %v4494_v23 = vcombine.low %v28_v22, %v28_v22  ;;  %v5722_v22 = vld [vmem:[%s7316_s1 + $0x548] sm:$0xff]  }
  0x4e   :  { %5046 = vmatprep.subr.bf16.mxu1 %v5604_v26  ;;  %v5664_v26 = vld [vmem:[%s7316_s1 + $0x4f8] sm:$0xff]  }
  0x4f   :  { %5025 = vmatpush3.bf16.msra.mxu0 %v5603_v25  ;;  %v5663_v25 = vld [vmem:[%s7316_s1 + $0x438] sm:$0xff]  }
  0x50   :  { %5026 = vmatprep.subr.bf16.mxu0 %v5606_v28  ;;  %v5666_v28 = vld [vmem:[%s7316_s1 + $0x470] sm:$0xff]  }
  0x51   :  { %5047 = vmatpush3.bf16.msra.mxu1 %v5605_v27  ;;  %v5665_v27 = vld [vmem:[%s7316_s1 + $0x4b8] sm:$0xff]  }
  0x52   :  { %5048 = vmatprep.subr.bf16.mxu1 %v5608_v30  ;;  %v5668_v30 = vld [vmem:[%s7316_s1 + $0x4f0] sm:$0xff]  }
  0x53   :  { %5027 = vmatpush3.bf16.msra.mxu0 %v5607_v29  ;;  %v5667_v29 = vld [vmem:[%s7316_s1 + $0x430] sm:$0xff]  }
  0x54   :  { %5028 = vmatprep.subr.bf16.mxu0 %v5610_v32  ;;  %v5670_v32 = vld [vmem:[%s7316_s1 + $0x468] sm:$0xff]  }
  0x55   :  { %5049 = vmatpush3.bf16.msra.mxu1 %v5609_v31  ;;  %v5669_v31 = vld [vmem:[%s7316_s1 + $0x4b0] sm:$0xff]  }
  0x56   :  { %5050 = vmatprep.subr.bf16.mxu1 %v5612_v34  ;;  %v5672_v34 = vld [vmem:[%s7316_s1 + $0x4e8] sm:$0xff]  }
  0x57   :  { %5029 = vmatpush3.bf16.msra.mxu0 %v5611_v33  ;;  %v5671_v33 = vld [vmem:[%s7316_s1 + $0x428] sm:$0xff]  }
  0x58   :  { %5030 = vmatprep.subr.bf16.mxu0 %v5614_v36  ;;  %v5674_v36 = vld [vmem:[%s7316_s1 + $0x460] sm:$0xff]  }
  0x59   :  { %5051 = vmatpush3.bf16.msra.mxu1 %v5613_v35  ;;  %v5673_v35 = vld [vmem:[%s7316_s1 + $0x4a8] sm:$0xff]  }
  0x5a   :  { %5052 = vmatprep.subr.bf16.mxu1 %v5616_v38  ;;  %v5676_v38 = vld [vmem:[%s7316_s1 + $0x4e0] sm:$0xff]  }
  0x5b   :  { %5031 = vmatpush3.bf16.msra.mxu0 %v5615_v37  ;;  %v5675_v37 = vld [vmem:[%s7316_s1 + $0x420] sm:$0xff]  }
  0x5c   :  { %5032 = vmatprep.subr.bf16.mxu0 %v5618_v40  ;;  %v5678_v40 = vld [vmem:[%s7316_s1 + $0x458] sm:$0xff]  }
  0x5d   :  { %5053 = vmatpush3.bf16.msra.mxu1 %v5617_v39  ;;  %v5677_v39 = vld [vmem:[%s7316_s1 + $0x4a0] sm:$0xff]  }
  0x5e   :  { %5054 = vmatprep.subr.bf16.mxu1 %v5620_v42  ;;  %v5680_v42 = vld [vmem:[%s7316_s1 + $0x4d8] sm:$0xff]  }
  0x5f   :  { %5033 = vmatpush3.bf16.msra.mxu0 %v5619_v41  ;;  %v5679_v41 = vld [vmem:[%s7316_s1 + $0x418] sm:$0xff]  }
  0x60   :  { %5062 = vmatprep.subr.bf16.mxu0 %v5624_v47  ;;  %v5685_v47 = vld [vmem:[%s7316_s1 + $0x490] sm:$0xff]  }
  0x61   :  { %5055 = vmatpush3.bf16.msra.mxu1 %v5623_v46  ;;  %v5684_v46 = vld [vmem:[%s7316_s1 + $0x4d0] sm:$0xff]  }
  0x62   :  { %3554 = vmatmul.mubr.bf16.vlgmr.msra.gmra.mxu0 %v4488_v44  ;;  %5084 = vmatprep.subr.bf16.mxu1 %v5628_v52  ;;  %v5682_v44 = vld [vmem:[%s7316_s1 + $0x450] sm:$0xff]   ;;  %v5690_v52 = vld [vmem:[%s7316_s1 + $0x440] sm:$0xff]  }
  0x63   :  { %5063 = vmatpush3.bf16.msra.mxu0 %v5627_v51  ;;  %3633 = vmatprep.mubr.bf16.mxu0 %v4493_v19  ;;  %v5689_v51 = vld [vmem:[%s7316_s1 + $0x488] sm:$0xff]   ;;  %v5719_v19 = vld [vmem:[%s7316_s1 + $0x510] sm:$0xff]  }
  0x64   :  { %3594 = vmatmul.mubr.bf16.vlgmr.msra.gmra.mxu1 %v4490_v49  ;;  %5064 = vmatprep.subr.bf16.mxu0 %v5630_v54  ;;  %v5687_v49 = vld [vmem:[%s7316_s1 + $0x408] sm:$0xff]   ;;  %v5692_v54 = vld [vmem:[%s7316_s1 + $0x4c0] sm:$0xff]  }
  0x65   :  { %5085 = vmatpush3.bf16.msra.mxu1 %v5629_v53  ;;  %3673 = vmatprep.mubr.bf16.mxu1 %v4495_v24  ;;  %v5691_v53 = vld [vmem:[%s7316_s1 + $0x400] sm:$0xff]   ;;  %v5724_v24 = vld [vmem:[%s7316_s1 + $0x5c8] sm:$0xff]  }
  0x66   :  { %5086 = vmatprep.subr.bf16.mxu1 %v5632_v56 }
  0x67   :  { %5065 = vmatpush3.bf16.msra.mxu0 %v5631_v55  ;;  %v29_v55 = vld [vmem:[%s7317_s0 + $0x40] sm:$0xff] }
  0x68   :  { %5066 = vmatprep.subr.bf16.mxu0 %v5634_v58  ;;  %v4496_v56 = vcombine.low %v29_v55, %v29_v55  ;;  %v5695_v58 = vld [vmem:[%s7316_s1 + $0x480] sm:$0xff]  }
  0x69   :  { %5087 = vmatpush3.bf16.msra.mxu1 %v5633_v57  ;;  %v4497_v57 = vcombine.high %v29_v55, %v29_v55  ;;  %v5753_v55 = vld [vmem:[%s7316_s1 + $0x698] sm:$0xff]  }
  0x6a   :  { %5088 = vmatprep.subr.bf16.mxu1 %v5636_v60  ;;  %v30_v60 = vld [vmem:[%s7317_s0 + $0x48] sm:$0xff] }
  0x6b   :  { %5067 = vmatpush3.bf16.msra.mxu0 %v5635_v59  ;;  %v5696_v59 = vld [vmem:[%s7316_s1 + $0x578] sm:$0xff]  }
  0x6c   :  { %5068 = vmatprep.subr.bf16.mxu0 %v5638_v62  ;;  %v4499_v62 = vcombine.high %v30_v60, %v30_v60 }
  0x6d   :  { %5089 = vmatpush3.bf16.msra.mxu1 %v5637_v61  ;;  %v4498_v61 = vcombine.low %v30_v60, %v30_v60  ;;  %v5758_v60 = vld [vmem:[%s7316_s1 + $0x648] sm:$0xff]  }
  0x6e   :  { %5090 = vmatprep.subr.bf16.mxu1 %v5640_v0  ;;  %v5700_v0 = vld [vmem:[%s7316_s1 + $0x5f8] sm:$0xff]  }
  0x6f   :  { %5069 = vmatpush3.bf16.msra.mxu0 %v5639_v63  ;;  %v5699_v63 = vld [vmem:[%s7316_s1 + $0x538] sm:$0xff]  }
  0x70   :  { %5070 = vmatprep.subr.bf16.mxu0 %v5642_v2  ;;  %v5702_v2 = vld [vmem:[%s7316_s1 + $0x570] sm:$0xff]  }
  0x71   :  { %5091 = vmatpush3.bf16.msra.mxu1 %v5641_v1  ;;  %v5701_v1 = vld [vmem:[%s7316_s1 + $0x5b8] sm:$0xff]  }
  0x72   :  { %5092 = vmatprep.subr.bf16.mxu1 %v5644_v4  ;;  %v5704_v4 = vld [vmem:[%s7316_s1 + $0x5f0] sm:$0xff]  }
  0x73   :  { %5071 = vmatpush3.bf16.msra.mxu0 %v5643_v3  ;;  %v5703_v3 = vld [vmem:[%s7316_s1 + $0x530] sm:$0xff]  }
  0x74   :  { %5072 = vmatprep.subr.bf16.mxu0 %v5646_v6  ;;  %v5706_v6 = vld [vmem:[%s7316_s1 + $0x568] sm:$0xff]  }
  0x75   :  { %5093 = vmatpush3.bf16.msra.mxu1 %v5645_v5  ;;  %v5705_v5 = vld [vmem:[%s7316_s1 + $0x5b0] sm:$0xff]  }
  0x76   :  { %5094 = vmatprep.subr.bf16.mxu1 %v5648_v8  ;;  %v5708_v8 = vld [vmem:[%s7316_s1 + $0x5e8] sm:$0xff]  }
  0x77   :  { %5073 = vmatpush3.bf16.msra.mxu0 %v5647_v7  ;;  %v5707_v7 = vld [vmem:[%s7316_s1 + $0x528] sm:$0xff]  }
  0x78   :  { %5074 = vmatprep.subr.bf16.mxu0 %v5650_v10  ;;  %v5710_v10 = vld [vmem:[%s7316_s1 + $0x560] sm:$0xff]  }
  0x79   :  { %5095 = vmatpush3.bf16.msra.mxu1 %v5649_v9  ;;  %v5709_v9 = vld [vmem:[%s7316_s1 + $0x5a8] sm:$0xff]  }
  0x7a   :  { %5096 = vmatprep.subr.bf16.mxu1 %v5652_v12  ;;  %v5712_v12 = vld [vmem:[%s7316_s1 + $0x5e0] sm:$0xff]  }
  0x7b   :  { %5075 = vmatpush3.bf16.msra.mxu0 %v5651_v11  ;;  %v5711_v11 = vld [vmem:[%s7316_s1 + $0x520] sm:$0xff]  }
  0x7c   :  { %5076 = vmatprep.subr.bf16.mxu0 %v5654_v14  ;;  %v5714_v14 = vld [vmem:[%s7316_s1 + $0x558] sm:$0xff]  }
  0x7d   :  { %5097 = vmatpush3.bf16.msra.mxu1 %v5653_v13  ;;  %v5713_v13 = vld [vmem:[%s7316_s1 + $0x5a0] sm:$0xff]  }
  0x7e   :  { %5098 = vmatprep.subr.bf16.mxu1 %v5656_v16  ;;  %v5716_v16 = vld [vmem:[%s7316_s1 + $0x5d8] sm:$0xff]  }
  0x7f   :  { %5077 = vmatpush3.bf16.msra.mxu0 %v5655_v15  ;;  %v5715_v15 = vld [vmem:[%s7316_s1 + $0x518] sm:$0xff]  }
  0x80   :  { %5106 = vmatprep.subr.bf16.mxu0 %v5660_v21  ;;  %v5721_v21 = vld [vmem:[%s7316_s1 + $0x590] sm:$0xff]  }
  0x81   :  { %5099 = vmatpush3.bf16.msra.mxu1 %v5659_v20  ;;  %v5720_v20 = vld [vmem:[%s7316_s1 + $0x5d0] sm:$0xff]  }
  0x82   :  { %3634 = vmatmul.mubr.bf16.vlgmr.msra.gmra.mxu0 %v4492_v18  ;;  %5128 = vmatprep.subr.bf16.mxu1 %v5664_v26  ;;  %v5718_v18 = vld [vmem:[%s7316_s1 + $0x550] sm:$0xff]   ;;  %v5726_v26 = vld [vmem:[%s7316_s1 + $0x540] sm:$0xff]  }
  0x83   :  { %5107 = vmatpush3.bf16.msra.mxu0 %v5663_v25  ;;  %3713 = vmatprep.mubr.bf16.mxu0 %v4497_v57  ;;  %v5725_v25 = vld [vmem:[%s7316_s1 + $0x588] sm:$0xff]   ;;  %v5755_v57 = vld [vmem:[%s7316_s1 + $0x610] sm:$0xff]  }
  0x84   :  { %3674 = vmatmul.mubr.bf16.vlgmr.msra.gmra.mxu1 %v4494_v23  ;;  %5108 = vmatprep.subr.bf16.mxu0 %v5666_v28  ;;  %v5723_v23 = vld [vmem:[%s7316_s1 + $0x508] sm:$0xff]   ;;  %v5728_v28 = vld [vmem:[%s7316_s1 + $0x5c0] sm:$0xff]  }
  0x85   :  { %5129 = vmatpush3.bf16.msra.mxu1 %v5665_v27  ;;  %3753 = vmatprep.mubr.bf16.mxu1 %v4499_v62  ;;  %v5727_v27 = vld [vmem:[%s7316_s1 + $0x500] sm:$0xff]   ;;  %v5760_v62 = vld [vmem:[%s7316_s1 + $0x6c8] sm:$0xff]  }
  0x86   :  { %5130 = vmatprep.subr.bf16.mxu1 %v5668_v30 }
  0x87   :  { %5109 = vmatpush3.bf16.msra.mxu0 %v5667_v29  ;;  %v31_v29 = vld [vmem:[%s7317_s0 + $0x50] sm:$0xff] }
  0x88   :  { %5110 = vmatprep.subr.bf16.mxu0 %v5670_v32  ;;  %v4500_v30 = vcombine.low %v31_v29, %v31_v29  ;;  %v5731_v32 = vld [vmem:[%s7316_s1 + $0x580] sm:$0xff]  }
  0x89   :  { %5131 = vmatpush3.bf16.msra.mxu1 %v5669_v31  ;;  %v4501_v31 = vcombine.high %v31_v29, %v31_v29 }
  0x8a   :  { %5132 = vmatprep.subr.bf16.mxu1 %v5672_v34  ;;  %v32_v34 = vld [vmem:[%s7317_s0 + $0x58] sm:$0xff] }
  0x8b   :  { %5111 = vmatpush3.bf16.msra.mxu0 %v5671_v33  ;;  %v5732_v33 = vld [vmem:[%s7316_s1 + $0x678] sm:$0xff]  }
  0x8c   :  { %5112 = vmatprep.subr.bf16.mxu0 %v5674_v36  ;;  %v4503_v36 = vcombine.high %v32_v34, %v32_v34 }
  0x8d   :  { %5133 = vmatpush3.bf16.msra.mxu1 %v5673_v35  ;;  %v4502_v35 = vcombine.low %v32_v34, %v32_v34  ;;  %v5781_v34 = vld [vmem:[%s7316_s1 + $0x7a8] sm:$0xff]  }
  0x8e   :  { %5134 = vmatprep.subr.bf16.mxu1 %v5676_v38  ;;  %v5736_v38 = vld [vmem:[%s7316_s1 + $0x6f8] sm:$0xff]  }
  0x8f   :  { %5113 = vmatpush3.bf16.msra.mxu0 %v5675_v37  ;;  %v5735_v37 = vld [vmem:[%s7316_s1 + $0x638] sm:$0xff]  }
  0x90   :  { %5114 = vmatprep.subr.bf16.mxu0 %v5678_v40  ;;  %v5738_v40 = vld [vmem:[%s7316_s1 + $0x670] sm:$0xff]  }
  0x91   :  { %5135 = vmatpush3.bf16.msra.mxu1 %v5677_v39  ;;  %v5737_v39 = vld [vmem:[%s7316_s1 + $0x6b8] sm:$0xff]  }
  0x92   :  { %5136 = vmatprep.subr.bf16.mxu1 %v5680_v42  ;;  %v5740_v42 = vld [vmem:[%s7316_s1 + $0x6f0] sm:$0xff]  }
  0x93   :  { %5115 = vmatpush3.bf16.msra.mxu0 %v5679_v41  ;;  %v5739_v41 = vld [vmem:[%s7316_s1 + $0x630] sm:$0xff]  }
  0x94   :  { %5116 = vmatprep.subr.bf16.mxu0 %v5682_v44  ;;  %v5742_v44 = vld [vmem:[%s7316_s1 + $0x668] sm:$0xff]  }
  0x95   :  { %5137 = vmatpush3.bf16.msra.mxu1 %v5681_v43  ;;  %v5741_v43 = vld [vmem:[%s7316_s1 + $0x6b0] sm:$0xff]  }
  0x96   :  { %5138 = vmatprep.subr.bf16.mxu1 %v5684_v46  ;;  %v5744_v46 = vld [vmem:[%s7316_s1 + $0x6e8] sm:$0xff]  }
  0x97   :  { %5117 = vmatpush3.bf16.msra.mxu0 %v5683_v45  ;;  %v5743_v45 = vld [vmem:[%s7316_s1 + $0x628] sm:$0xff]  }
  0x98   :  { %5118 = vmatprep.subr.bf16.mxu0 %v5686_v48  ;;  %v5746_v48 = vld [vmem:[%s7316_s1 + $0x660] sm:$0xff]  }
  0x99   :  { %5139 = vmatpush3.bf16.msra.mxu1 %v5685_v47  ;;  %v5745_v47 = vld [vmem:[%s7316_s1 + $0x6a8] sm:$0xff]  }
  0x9a   :  { %5140 = vmatprep.subr.bf16.mxu1 %v5688_v50  ;;  %v5748_v50 = vld [vmem:[%s7316_s1 + $0x6e0] sm:$0xff]  }
  0x9b   :  { %5119 = vmatpush3.bf16.msra.mxu0 %v5687_v49  ;;  %v5747_v49 = vld [vmem:[%s7316_s1 + $0x620] sm:$0xff]  }
  0x9c   :  { %5120 = vmatprep.subr.bf16.mxu0 %v5690_v52  ;;  %v5750_v52 = vld [vmem:[%s7316_s1 + $0x658] sm:$0xff]  }
  0x9d   :  { %5141 = vmatpush3.bf16.msra.mxu1 %v5689_v51  ;;  %v5749_v51 = vld [vmem:[%s7316_s1 + $0x6a0] sm:$0xff]  }
  0x9e   :  { %5142 = vmatprep.subr.bf16.mxu1 %v5692_v54  ;;  %v5752_v54 = vld [vmem:[%s7316_s1 + $0x6d8] sm:$0xff]  }
  0x9f   :  { %5121 = vmatpush3.bf16.msra.mxu0 %v5691_v53  ;;  %v5751_v53 = vld [vmem:[%s7316_s1 + $0x618] sm:$0xff]  }
  0xa0   :  { %5150 = vmatprep.subr.bf16.mxu0 %v5696_v59  ;;  %v5757_v59 = vld [vmem:[%s7316_s1 + $0x690] sm:$0xff]  }
  0xa1   :  { %5143 = vmatpush3.bf16.msra.mxu1 %v5695_v58  ;;  %v5756_v58 = vld [vmem:[%s7316_s1 + $0x6d0] sm:$0xff]  }
  0xa2   :  { %3714 = vmatmul.mubr.bf16.vlgmr.msra.gmra.mxu0 %v4496_v56  ;;  %5172 = vmatprep.subr.bf16.mxu1 %v5700_v0  ;;  %v5754_v56 = vld [vmem:[%s7316_s1 + $0x650] sm:$0xff]   ;;  %v5762_v0 = vld [vmem:[%s7316_s1 + $0x640] sm:$0xff]  }
  0xa3   :  { %5151 = vmatpush3.bf16.msra.mxu0 %v5699_v63  ;;  %3793 = vmatprep.mubr.bf16.mxu0 %v4501_v31  ;;  %v5761_v63 = vld [vmem:[%s7316_s1 + $0x688] sm:$0xff]  }
  0xa4   :  { %3754 = vmatmul.mubr.bf16.vlgmr.msra.gmra.mxu1 %v4498_v61  ;;  %5152 = vmatprep.subr.bf16.mxu0 %v5702_v2  ;;  %v5759_v61 = vld [vmem:[%s7316_s1 + $0x608] sm:$0xff]   ;;  %v5764_v2 = vld [vmem:[%s7316_s1 + $0x6c0] sm:$0xff]  }
  0xa5   :  { %5173 = vmatpush3.bf16.msra.mxu1 %v5701_v1  ;;  %3833 = vmatprep.mubr.bf16.mxu1 %v4503_v36  ;;  %v5763_v1 = vld [vmem:[%s7316_s1 + $0x600] sm:$0xff]   ;;  %v5778_v31 = vld [vmem:[%s7316_s1 + $0x768] sm:$0xff]  }
  0xa6   :  { %5174 = vmatprep.subr.bf16.mxu1 %v5704_v4  ;;  %v5783_v36 = vld [vmem:[%s7316_s1 + $0x720] sm:$0xff]  }
  0xa7   :  { %5153 = vmatpush3.bf16.msra.mxu0 %v5703_v3  ;;  %v33_v3 = vld [vmem:[%s7317_s0 + $0x60] sm:$0xff] }
  0xa8   :  { %5154 = vmatprep.subr.bf16.mxu0 %v5706_v6  ;;  %v4505_v6 = vcombine.high %v33_v3, %v33_v3 }
  0xa9   :  { %5175 = vmatpush3.bf16.msra.mxu1 %v5705_v5  ;;  %v4504_v5 = vcombine.low %v33_v3, %v33_v3 }
  0xaa   :  { %5176 = vmatprep.subr.bf16.mxu1 %v5708_v8  ;;  %v5768_v8 = vld [vmem:[%s7316_s1 + $0x778] sm:$0xff]  }
  0xab   :  { %5155 = vmatpush3.bf16.msra.mxu0 %v5707_v7  ;;  %v5767_v7 = vld [vmem:[%s7316_s1 + $0x680] sm:$0xff]  }
  0xac   :  { %5156 = vmatprep.subr.bf16.mxu0 %v5710_v10 }
  0xad   :  { %5177 = vmatpush3.bf16.msra.mxu1 %v5709_v9  ;;  %v34_v9 = vld [vmem:[%s7317_s0 + $0x68] sm:$0xff] }
  0xae   :  { %5178 = vmatprep.subr.bf16.mxu1 %v5712_v12  ;;  %v4506_v12 = vcombine.low %v34_v9, %v34_v9 }
  0xaf   :  { %5157 = vmatpush3.bf16.msra.mxu0 %v5711_v11 }
  0xb0   :  { %5158 = vmatprep.subr.bf16.mxu0 %v5714_v14  ;;  %v5771_v14 = vld [vmem:[%s7316_s1 + $0x738] sm:$0xff]  }
  0xb1   :  { %5179 = vmatpush3.bf16.msra.mxu1 %v5713_v13  ;;  %v4507_v13 = vcombine.high %v34_v9, %v34_v9 }
  0xb2   :  { %5180 = vmatprep.subr.bf16.mxu1 %v5716_v16 }
  0xb3   :  { %5159 = vmatpush3.bf16.msra.mxu0 %v5715_v15  ;;  %v4479_v15 = vld [vmem:[%s7318_s2] ss:$0 sm:$0xff] }
  0xb4   :  { %5160 = vmatprep.subr.bf16.mxu0 %v5718_v18 }
  0xb5   :  { %5181 = vmatpush3.bf16.msra.mxu1 %v5717_v17  ;;  %v5772_v17 = vld [vmem:[%s7316_s1 + $0x7f8] sm:$0xff]  }
  0xb6   :  { %5182 = vmatprep.subr.bf16.mxu1 %v5720_v20 }
  0xb7   :  { %5161 = vmatpush3.bf16.msra.mxu0 %v5719_v19 }
  0xb8   :  { %5162 = vmatprep.subr.bf16.mxu0 %v5722_v22 }
  0xb9   :  { %5183 = vmatpush3.bf16.msra.mxu1 %v5721_v21  ;;  %v5773_v21 = vld [vmem:[%s7316_s1 + $0x7b8] sm:$0xff]  }
  0xba   :  { %5184 = vmatprep.subr.bf16.mxu1 %v5724_v24 }
  0xbb   :  { %5163 = vmatpush3.bf16.msra.mxu0 %v5723_v23  ;;  %v5774_v23 = vld [vmem:[%s7316_s1 + $0x770] sm:$0xff]  }
  0xbc   :  { %5164 = vmatprep.subr.bf16.mxu0 %v5726_v26 }
  0xbd   :  { %5185 = vmatpush3.bf16.msra.mxu1 %v5725_v25 }
  0xbe   :  { %5186 = vmatprep.subr.bf16.mxu1 %v5728_v28  ;;  %v5776_v28 = vld [vmem:[%s7316_s1 + $0x7f0] sm:$0xff]  }
  0xbf   :  { %5165 = vmatpush3.bf16.msra.mxu0 %v5727_v27  ;;  %v5775_v27 = vld [vmem:[%s7316_s1 + $0x730] sm:$0xff]  }
  0xc0   :  { %5194 = vmatprep.subr.bf16.mxu0 %v5732_v33  ;;  %v5780_v33 = vld [vmem:[%s7316_s1 + $0x7e8] sm:$0xff]  }
  0xc1   :  { %5187 = vmatpush3.bf16.msra.mxu1 %v5731_v32  ;;  %v5779_v32 = vld [vmem:[%s7316_s1 + $0x728] sm:$0xff]  }
  0xc2   :  { %3794 = vmatmul.mubr.bf16.vlgmr.msra.gmra.mxu0 %v4500_v30  ;;  %5216 = vmatprep.subr.bf16.mxu1 %v5736_v38  ;;  %v5777_v30 = vld [vmem:[%s7316_s1 + $0x7b0] sm:$0xff]   ;;  %v5785_v38 = vld [vmem:[%s7316_s1 + $0x7a0] sm:$0xff]  }
  0xc3   :  { %5195 = vmatpush3.bf16.msra.mxu0 %v5735_v37  ;;  %3873 = vmatprep.mubr.bf16.mxu0 %v4505_v6  ;;  %v5784_v37 = vld [vmem:[%s7316_s1 + $0x7e0] sm:$0xff]  }
  0xc4   :  { %3834 = vmatmul.mubr.bf16.vlgmr.msra.gmra.mxu1 %v4502_v35  ;;  %5196 = vmatprep.subr.bf16.mxu0 %v5738_v40  ;;  %v5782_v35 = vld [vmem:[%s7316_s1 + $0x760] sm:$0xff]   ;;  %v5787_v40 = vld [vmem:[%s7316_s1 + $0x718] sm:$0xff]  }
  0xc5   :  { %5217 = vmatpush3.bf16.msra.mxu1 %v5737_v39  ;;  %3913 = vmatprep.mubr.bf16.mxu1 %v4507_v13  ;;  %v5786_v39 = vld [vmem:[%s7316_s1 + $0x758] sm:$0xff]   ;;  %v5811_v13 = vld [vmem:[%s7316_s1 + $0x830] sm:$0xff]  }
  0xc6   :  { %5218 = vmatprep.subr.bf16.mxu1 %v5740_v42  ;;  %v5789_v42 = vld [vmem:[%s7316_s1 + $0x798] sm:$0xff]  }
  0xc7   :  { %5197 = vmatpush3.bf16.msra.mxu0 %v5739_v41  ;;  %v5788_v41 = vld [vmem:[%s7316_s1 + $0x7d8] sm:$0xff]  }
  0xc8   :  { %5198 = vmatprep.subr.bf16.mxu0 %v5742_v44  ;;  %v5791_v44 = vld [vmem:[%s7316_s1 + $0x710] sm:$0xff]  }
  0xc9   :  { %5219 = vmatpush3.bf16.msra.mxu1 %v5741_v43  ;;  %v5790_v43 = vld [vmem:[%s7316_s1 + $0x750] sm:$0xff]  }
  0xca   :  { %5220 = vmatprep.subr.bf16.mxu1 %v5744_v46  ;;  %v5793_v46 = vld [vmem:[%s7316_s1 + $0x790] sm:$0xff]  }
  0xcb   :  { %5199 = vmatpush3.bf16.msra.mxu0 %v5743_v45  ;;  %v5792_v45 = vld [vmem:[%s7316_s1 + $0x7d0] sm:$0xff]  }
  0xcc   :  { %5200 = vmatprep.subr.bf16.mxu0 %v5746_v48  ;;  %v5795_v48 = vld [vmem:[%s7316_s1 + $0x708] sm:$0xff]  }
  0xcd   :  { %5221 = vmatpush3.bf16.msra.mxu1 %v5745_v47  ;;  %v5794_v47 = vld [vmem:[%s7316_s1 + $0x748] sm:$0xff]  }
  0xce   :  { %5222 = vmatprep.subr.bf16.mxu1 %v5748_v50  ;;  %v5797_v50 = vld [vmem:[%s7316_s1 + $0x788] sm:$0xff]  }
  0xcf   :  { %5201 = vmatpush3.bf16.msra.mxu0 %v5747_v49  ;;  %v5796_v49 = vld [vmem:[%s7316_s1 + $0x7c8] sm:$0xff]  }
  0xd0   :  { %5202 = vmatprep.subr.bf16.mxu0 %v5750_v52  ;;  %v5799_v52 = vld [vmem:[%s7316_s1 + $0x700] sm:$0xff]  }
  0xd1   :  { %5223 = vmatpush3.bf16.msra.mxu1 %v5749_v51  ;;  %v5798_v51 = vld [vmem:[%s7316_s1 + $0x740] sm:$0xff]  }
  0xd2   :  { %5224 = vmatprep.subr.bf16.mxu1 %v5752_v54 }
  0xd3   :  { %5203 = vmatpush3.bf16.msra.mxu0 %v5751_v53  ;;  %v5800_v53 = vld [vmem:[%s7316_s1 + $0x7c0] sm:$0xff]  }
  0xd4   :  { %5204 = vmatprep.subr.bf16.mxu0 %v5754_v56 }
  0xd5   :  { %5225 = vmatpush3.bf16.msra.mxu1 %v5753_v55  ;;  %v35_v55 = vld [vmem:[%s7317_s0 + $0x70] sm:$0xff] }
  0xd6   :  { %5226 = vmatprep.subr.bf16.mxu1 %v5756_v58  ;;  %v4508_v56 = vcombine.low %v35_v55, %v35_v55  ;;  %v5803_v58 = vld [vmem:[%s7316_s1 + $0x780] sm:$0xff]  }
  0xd7   :  { %5205 = vmatpush3.bf16.msra.mxu0 %v5755_v57  ;;  %v4509_v57 = vcombine.high %v35_v55, %v35_v55 }
  0xd8   :  { %5206 = vmatprep.subr.bf16.mxu0 %v5758_v60  ;;  %v5804_v60 = vld [vmem:[%s7316_s1 + $0x878] sm:$0xff]  }
  0xd9   :  { %5227 = vmatpush3.bf16.msra.mxu1 %v5757_v59 }
  0xda   :  { %5228 = vmatprep.subr.bf16.mxu1 %v5760_v62 }
  0xdb   :  { %5207 = vmatpush3.bf16.msra.mxu0 %v5759_v61  ;;  %v36_v61 = vld [vmem:[%s7317_s0 + $0x78] sm:$0xff] }
  0xdc   :  { %5208 = vmatprep.subr.bf16.mxu0 %v5762_v0  ;;  %v4510_v0 = vcombine.low %v36_v61, %v36_v61 }
  0xdd   :  { %5229 = vmatpush3.bf16.msra.mxu1 %v5761_v63 }
  0xde   :  { %5230 = vmatprep.subr.bf16.mxu1 %v5764_v2  ;;  %v5807_v2 = vld [vmem:[%s7316_s1 + $0x838] sm:$0xff]  }
  0xdf   :  { %5209 = vmatpush3.bf16.msra.mxu0 %v5763_v1  ;;  %v4511_v1 = vcombine.high %v36_v61, %v36_v61 }
  0xe0   :  { %5238 = vmatprep.subr.bf16.mxu0 %v5768_v8 }
  0xe1   :  { %5231 = vmatpush3.bf16.msra.mxu1 %v5767_v7  ;;  %v5809_v7 = vld [vmem:[%s7316_s1 + $0x8b8] sm:$0xff]  }
  0xe2   :  { %v4946_v4 = vpop.f32.mrf.mxu0  ;;  %3874 = vmatmul.mubr.bf16.vlgmr.msra.gmra.mxu0 %v4504_v5  ;;  %5260 = vmatprep.subr.bf16.mxu1 %v5772_v17  ;;  %v5808_v5 = vld [vmem:[%s7316_s1 + $0x8f8] sm:$0xff]   ;;  %v5814_v17 = vld [vmem:[%s7316_s1 + $0x868] sm:$0xff]  }
  0xe3   :  { %5239 = vmatpush3.bf16.msra.mxu0 %v5771_v14  ;;  %3953 = vmatprep.mubr.bf16.mxu0 %v4509_v57  ;;  %v5812_v14 = vld [vmem:[%s7316_s1 + $0x8f0] sm:$0xff]  }
  0xe4   :  { %v4947_v10 = vpop.f32.mrf.mxu0  ;;  %v4968_v11 = vpop.f32.mrf.mxu1  ;;  %3914 = vmatmul.mubr.bf16.vlgmr.msra.gmra.mxu1 %v4506_v12  ;;  %5240 = vmatprep.subr.bf16.mxu0 %v5774_v23  ;;  %v5820_v23 = vld [vmem:[%s7316_s1 + $0x8e0] sm:$0xff]  }
  0xe5   :  { %v4948_v16 = vadd.f32 %v4947_v10, %v4946_v4  ;;  %5261 = vmatpush3.bf16.msra.mxu1 %v5773_v21  ;;  %3993 = vmatprep.mubr.bf16.mxu1 %v4511_v1  ;;  %v5810_v10 = vld [vmem:[%s7316_s1 + $0x870] sm:$0xff]   ;;  %v5818_v21 = vld [vmem:[%s7316_s1 + $0x860] sm:$0xff]  }
  0xe6   :  { %v4949_v18 = vpop.f32.mrf.mxu0  ;;  %v4969_v19 = vpop.f32.mrf.mxu1  ;;  %5262 = vmatprep.subr.bf16.mxu1 %v5776_v28  ;;  %v5825_v28 = vld [vmem:[%s7316_s1 + $0x898] sm:$0xff]   ;;  %v5848_v1 = vld [vmem:[%s7316_s1 + $0x9f0] sm:$0xff]  }
  0xe7   :  { %v3396_v20 = vadd.f32 %v4948_v16, %v4479_v15  ;;  %v4970_v22 = vadd.f32 %v4969_v19, %v4968_v11  ;;  %5241 = vmatpush3.bf16.msra.mxu0 %v5775_v27  ;;  %v5813_v16 = vld [vmem:[%s7316_s1 + $0x8b0] sm:$0xff]   ;;  %v5815_v18 = vld [vmem:[%s7316_s1 + $0x828] sm:$0xff]   ;;  %v5824_v27 = vld [vmem:[%s7316_s1 + $0x8d8] sm:$0xff]  }
  0xe8   :  { %v4950_v24 = vpop.f32.mrf.mxu0  ;;  %v4971_v25 = vpop.f32.mrf.mxu1  ;;  %5242 = vmatprep.subr.bf16.mxu0 %v5778_v31  ;;  %v5816_v19 = vld [vmem:[%s7316_s1 + $0x8e8] sm:$0xff]   ;;  %v5828_v31 = vld [vmem:[%s7316_s1 + $0x8d0] sm:$0xff]  }
  0xe9   :  { %v6731_v26 = vadd.f32 %v4970_v22, %v3396_v20  ;;  %5263 = vmatpush3.bf16.msra.mxu1 %v5777_v30  ;;  %v5817_v20 = vld [vmem:[%s7316_s1 + $0x8a8] sm:$0xff]   ;;  %v5819_v22 = vld [vmem:[%s7316_s1 + $0x820] sm:$0xff]   ;;  %v5822_v25 = vld [vmem:[%s7316_s1 + $0x858] sm:$0xff]  }
  0xea   :  { %v4972_v29 = vpop.f32.mrf.mxu1  ;;  %5264 = vmatprep.subr.bf16.mxu1 %v5780_v33  ;;  %v5821_v24 = vld [vmem:[%s7316_s1 + $0x8a0] sm:$0xff]   ;;  %v5827_v30 = vld [vmem:[%s7316_s1 + $0x810] sm:$0xff]   ;;  %v5830_v33 = vld [vmem:[%s7316_s1 + $0x848] sm:$0xff]  }
  0xeb   :  { %5243 = vmatpush3.bf16.msra.mxu0 %v5779_v32  ;;  %v5826_v29 = vld [vmem:[%s7316_s1 + $0x850] sm:$0xff]  }
  0xec   :  { %5244 = vmatprep.subr.bf16.mxu0 %v5782_v35  ;;  %v5829_v32 = vld [vmem:[%s7316_s1 + $0x890] sm:$0xff]   ;;  %v5832_v35 = vld [vmem:[%s7316_s1 + $0x8c8] sm:$0xff]  }
  0xed   :  { %5265 = vmatpush3.bf16.msra.mxu1 %v5781_v34  ;;  %v5831_v34 = vld [vmem:[%s7316_s1 + $0x808] sm:$0xff]  }
  0xee   :  { %5266 = vmatprep.subr.bf16.mxu1 %v5784_v37  ;;  %v5834_v37 = vld [vmem:[%s7316_s1 + $0x840] sm:$0xff]  }
  0xef   :  { %5245 = vmatpush3.bf16.msra.mxu0 %v5783_v36  ;;  %v5833_v36 = vld [vmem:[%s7316_s1 + $0x888] sm:$0xff]  }
  0xf0   :  { %5246 = vmatprep.subr.bf16.mxu0 %v5786_v39  ;;  %v5836_v39 = vld [vmem:[%s7316_s1 + $0x8c0] sm:$0xff]  }
  0xf1   :  { %5267 = vmatpush3.bf16.msra.mxu1 %v5785_v38  ;;  %v5835_v38 = vld [vmem:[%s7316_s1 + $0x800] sm:$0xff]  }
  0xf2   :  { %5268 = vmatprep.subr.bf16.mxu1 %v5788_v41 }
  0xf3   :  { %5247 = vmatpush3.bf16.msra.mxu0 %v5787_v40  ;;  %v37_v40 = vld [vmem:[%s7317_s0 + $0x80] sm:$0xff] }
  0xf4   :  { %5248 = vmatprep.subr.bf16.mxu0 %v5790_v43  ;;  %v4513_v43 = vcombine.high %v37_v40, %v37_v40 }
  0xf5   :  { %5269 = vmatpush3.bf16.msra.mxu1 %v5789_v42  ;;  %v4512_v42 = vcombine.low %v37_v40, %v37_v40 }
  0xf6   :  { %5270 = vmatprep.subr.bf16.mxu1 %v5792_v45  ;;  %v5840_v45 = vld [vmem:[%s7316_s1 + $0x978] sm:$0xff]  }
  0xf7   :  { %5249 = vmatpush3.bf16.msra.mxu0 %v5791_v44  ;;  %v5839_v44 = vld [vmem:[%s7316_s1 + $0x880] sm:$0xff]  }
  0xf8   :  { %5250 = vmatprep.subr.bf16.mxu0 %v5794_v47 }
  0xf9   :  { %5271 = vmatpush3.bf16.msra.mxu1 %v5793_v46 }
  0xfa   :  { %5272 = vmatprep.subr.bf16.mxu1 %v5796_v49 }
  0xfb   :  { %5251 = vmatpush3.bf16.msra.mxu0 %v5795_v48  ;;  %v38_v48 = vld [vmem:[%s7317_s0 + $0x88] sm:$0xff] }
  0xfc   :  { %5252 = vmatprep.subr.bf16.mxu0 %v5798_v51  ;;  %v4515_v51 = vcombine.high %v38_v48, %v38_v48 }
  0xfd   :  { %5273 = vmatpush3.bf16.msra.mxu1 %v5797_v50  ;;  %v4514_v50 = vcombine.low %v38_v48, %v38_v48 }
  0xfe   :  { %5274 = vmatprep.subr.bf16.mxu1 %v5800_v53 }
  0xff   :  { %5253 = vmatpush3.bf16.msra.mxu0 %v5799_v52  ;;  %v5843_v52 = vld [vmem:[%s7316_s1 + $0x938] sm:$0xff]  }
 0x100   :  { %5282 = vmatprep.subr.bf16.mxu0 %v5804_v60 }
 0x101   :  { %5275 = vmatpush3.bf16.msra.mxu1 %v5803_v58  ;;  %v5845_v58 = vld [vmem:[%s7316_s1 + $0x9b8] sm:$0xff]  }
 0x102   :  { %v4990_v54 = vpop.f32.mrf.mxu0  ;;  %3954 = vmatmul.mubr.bf16.vlgmr.msra.gmra.mxu0 %v4508_v56  ;;  %5304 = vmatprep.subr.bf16.mxu1 %v5808_v5  ;;  %v5844_v56 = vld [vmem:[%s7316_s1 + $0x9f8] sm:$0xff]   ;;  %v5852_v5 = vld [vmem:[%s7316_s1 + $0x9e8] sm:$0xff]  }
 0x103   :  { %5283 = vmatpush3.bf16.msra.mxu0 %v5807_v2  ;;  %4033 = vmatprep.mubr.bf16.mxu0 %v4513_v43  ;;  %v5849_v2 = vld [vmem:[%s7316_s1 + $0x9b0] sm:$0xff]   ;;  %v5881_v43 = vld [vmem:[%s7316_s1 + $0xab8] sm:$0xff]  }
 0x104   :  { %v4991_v59 = vpop.f32.mrf.mxu0  ;;  %v5012_v63 = vpop.f32.mrf.mxu1  ;;  %3994 = vmatmul.mubr.bf16.vlgmr.msra.gmra.mxu1 %v4510_v0  ;;  %5284 = vmatprep.subr.bf16.mxu0 %v5810_v10  ;;  %v5857_v10 = vld [vmem:[%s7316_s1 + $0x9a0] sm:$0xff]  }
 0x105   :  { %v4992_v62 = vadd.f32 %v4991_v59, %v4990_v54  ;;  %5305 = vmatpush3.bf16.msra.mxu1 %v5809_v7  ;;  %4073 = vmatprep.mubr.bf16.mxu1 %v4515_v51  ;;  %v5854_v7 = vld [vmem:[%s7316_s1 + $0x960] sm:$0xff]  }
 0x106   :  { %v4993_v3 = vpop.f32.mrf.mxu0  ;;  %v5013_v6 = vpop.f32.mrf.mxu1  ;;  %5306 = vmatprep.subr.bf16.mxu1 %v5812_v14  ;;  %v5861_v14 = vld [vmem:[%s7316_s1 + $0x998] sm:$0xff]  }
 0x107   :  { %v3476_v4 = vadd.f32 %v4992_v62, %v6731_v26  ;;  %v5014_v8 = vadd.f32 %v5013_v6, %v5012_v63  ;;  %5285 = vmatpush3.bf16.msra.mxu0 %v5811_v13  ;;  %v5823_v26 = vld [vmem:[%s7316_s1 + $0x818] sm:$0xff]   ;;  %v5846_v62 = vld [vmem:[%s7316_s1 + $0x970] sm:$0xff]   ;;  %v5850_v3 = vld [vmem:[%s7316_s1 + $0x968] sm:$0xff]  }
 0x108   :  { %v4994_v9 = vpop.f32.mrf.mxu0  ;;  %v5015_v11 = vpop.f32.mrf.mxu1  ;;  %5286 = vmatprep.subr.bf16.mxu0 %v5814_v17  ;;  %v5847_v63 = vld [vmem:[%s7316_s1 + $0x930] sm:$0xff]   ;;  %v5853_v6 = vld [vmem:[%s7316_s1 + $0x9a8] sm:$0xff]   ;;  %v5860_v13 = vld [vmem:[%s7316_s1 + $0x9d8] sm:$0xff]  }
 0x109   :  { %v6836_v12 = vadd.f32 %v5014_v8, %v3476_v4  ;;  %5307 = vmatpush3.bf16.msra.mxu1 %v5813_v16  ;;  %v5851_v4 = vld [vmem:[%s7316_s1 + $0x928] sm:$0xff]   ;;  %v5855_v8 = vld [vmem:[%s7316_s1 + $0x920] sm:$0xff]   ;;  %v5858_v11 = vld [vmem:[%s7316_s1 + $0x958] sm:$0xff]  }
 0x10a   :  { %v5016_v15 = vpop.f32.mrf.mxu1  ;;  %5308 = vmatprep.subr.bf16.mxu1 %v5816_v19  ;;  %v5856_v9 = vld [vmem:[%s7316_s1 + $0x9e0] sm:$0xff]   ;;  %v5863_v16 = vld [vmem:[%s7316_s1 + $0x910] sm:$0xff]   ;;  %v5866_v19 = vld [vmem:[%s7316_s1 + $0x948] sm:$0xff]  }
 0x10b   :  { %5287 = vmatpush3.bf16.msra.mxu0 %v5815_v18  ;;  %v5862_v15 = vld [vmem:[%s7316_s1 + $0x950] sm:$0xff]  }
 0x10c   :  { %5288 = vmatprep.subr.bf16.mxu0 %v5818_v21  ;;  %v5864_v17 = vld [vmem:[%s7316_s1 + $0x9d0] sm:$0xff]   ;;  %v5868_v21 = vld [vmem:[%s7316_s1 + $0x9c8] sm:$0xff]  }
 0x10d   :  { %5309 = vmatpush3.bf16.msra.mxu1 %v5817_v20  ;;  %v5865_v18 = vld [vmem:[%s7316_s1 + $0x990] sm:$0xff]   ;;  %v5867_v20 = vld [vmem:[%s7316_s1 + $0x908] sm:$0xff]  }
 0x10e   :  { %5310 = vmatprep.subr.bf16.mxu1 %v5820_v23  ;;  %v5870_v23 = vld [vmem:[%s7316_s1 + $0x940] sm:$0xff]  }
 0x10f   :  { %5289 = vmatpush3.bf16.msra.mxu0 %v5819_v22  ;;  %v5869_v22 = vld [vmem:[%s7316_s1 + $0x988] sm:$0xff]  }
 0x110   :  { %5290 = vmatprep.subr.bf16.mxu0 %v5822_v25  ;;  %v5872_v25 = vld [vmem:[%s7316_s1 + $0x9c0] sm:$0xff]  }
 0x111   :  { %5311 = vmatpush3.bf16.msra.mxu1 %v5821_v24  ;;  %v5871_v24 = vld [vmem:[%s7316_s1 + $0x900] sm:$0xff]  }
 0x112   :  { %5312 = vmatprep.subr.bf16.mxu1 %v5824_v27 }
 0x113   :  { %5291 = vmatpush3.bf16.msra.mxu0 %v5823_v26  ;;  %v39_v26 = vld [vmem:[%s7317_s0 + $0x90] sm:$0xff] }
 0x114   :  { %5292 = vmatprep.subr.bf16.mxu0 %v5826_v29  ;;  %v4517_v29 = vcombine.high %v39_v26, %v39_v26 }
 0x115   :  { %5313 = vmatpush3.bf16.msra.mxu1 %v5825_v28  ;;  %v4516_v28 = vcombine.low %v39_v26, %v39_v26 }
 0x116   :  { %5314 = vmatprep.subr.bf16.mxu1 %v5828_v31  ;;  %v5876_v31 = vld [vmem:[%s7316_s1 + $0xa78] sm:$0xff]  }
 0x117   :  { %5293 = vmatpush3.bf16.msra.mxu0 %v5827_v30  ;;  %v5875_v30 = vld [vmem:[%s7316_s1 + $0x980] sm:$0xff]  }
 0x118   :  { %5294 = vmatprep.subr.bf16.mxu0 %v5830_v33 }
 0x119   :  { %5315 = vmatpush3.bf16.msra.mxu1 %v5829_v32  ;;  %v40_v32 = vld [vmem:[%s7317_s0 + $0x98] sm:$0xff] }
 0x11a   :  { %5316 = vmatprep.subr.bf16.mxu1 %v5832_v35  ;;  %v4518_v35 = vcombine.low %v40_v32, %v40_v32 }
 0x11b   :  { %5295 = vmatpush3.bf16.msra.mxu0 %v5831_v34 }
 0x11c   :  { %5296 = vmatprep.subr.bf16.mxu0 %v5834_v37  ;;  %v5879_v37 = vld [vmem:[%s7316_s1 + $0xa38] sm:$0xff]  }
 0x11d   :  { %5317 = vmatpush3.bf16.msra.mxu1 %v5833_v36  ;;  %v4519_v36 = vcombine.high %v40_v32, %v40_v32  ;;  %v5918_v32 = vld [vmem:[%s7316_s1 + $0xb70] sm:$0xff]  }
 0x11e   :  { %5318 = vmatprep.subr.bf16.mxu1 %v5836_v39  ;;  %v5880_v39 = vld [vmem:[%s7316_s1 + $0xaf8] sm:$0xff]  }
 0x11f   :  { %5297 = vmatpush3.bf16.msra.mxu0 %v5835_v38 }
 0x120   :  { %5326 = vmatprep.subr.bf16.mxu0 %v5840_v45  ;;  %v5882_v45 = vld [vmem:[%s7316_s1 + $0xa70] sm:$0xff]  }
 0x121   :  { %5319 = vmatpush3.bf16.msra.mxu1 %v5839_v44 }
 0x122   :  { %v5034_v41 = vpop.f32.mrf.mxu0  ;;  %4034 = vmatmul.mubr.bf16.vlgmr.msra.gmra.mxu0 %v4512_v42  ;;  %5348 = vmatprep.subr.bf16.mxu1 %v5844_v56  ;;  %v5889_v56 = vld [vmem:[%s7316_s1 + $0xaa8] sm:$0xff]  }
 0x123   :  { %5327 = vmatpush3.bf16.msra.mxu0 %v5843_v52  ;;  %4113 = vmatprep.mubr.bf16.mxu0 %v4517_v29  ;;  %v5885_v52 = vld [vmem:[%s7316_s1 + $0xab0] sm:$0xff]   ;;  %v5917_v29 = vld [vmem:[%s7316_s1 + $0xbb8] sm:$0xff]  }
 0x124   :  { %v5035_v46 = vpop.f32.mrf.mxu0  ;;  %v5056_v47 = vpop.f32.mrf.mxu1  ;;  %4074 = vmatmul.mubr.bf16.vlgmr.msra.gmra.mxu1 %v4514_v50  ;;  %5328 = vmatprep.subr.bf16.mxu0 %v5846_v62  ;;  %v5884_v50 = vld [vmem:[%s7316_s1 + $0xaf0] sm:$0xff]   ;;  %v5895_v62 = vld [vmem:[%s7316_s1 + $0xa18] sm:$0xff]  }
 0x125   :  { %v5036_v49 = vadd.f32 %v5035_v46, %v5034_v41  ;;  %5349 = vmatpush3.bf16.msra.mxu1 %v5845_v58  ;;  %4153 = vmatprep.mubr.bf16.mxu1 %v4519_v36  ;;  %v5891_v58 = vld [vmem:[%s7316_s1 + $0xa20] sm:$0xff]   ;;  %v5920_v36 = vld [vmem:[%s7316_s1 + $0xbf0] sm:$0xff]  }
 0x126   :  { %v5037_v53 = vpop.f32.mrf.mxu0  ;;  %v5057_v54 = vpop.f32.mrf.mxu1  ;;  %5350 = vmatprep.subr.bf16.mxu1 %v5848_v1  ;;  %v5898_v1 = vld [vmem:[%s7316_s1 + $0xa50] sm:$0xff]  }
 0x127   :  { %v3556_v55 = vadd.f32 %v5036_v49, %v6836_v12  ;;  %v5058_v57 = vadd.f32 %v5057_v54, %v5056_v47  ;;  %5329 = vmatpush3.bf16.msra.mxu0 %v5847_v63  ;;  %v5859_v12 = vld [vmem:[%s7316_s1 + $0x918] sm:$0xff]   ;;  %v5883_v49 = vld [vmem:[%s7316_s1 + $0xa30] sm:$0xff]   ;;  %v5886_v53 = vld [vmem:[%s7316_s1 + $0xa68] sm:$0xff]  }
 0x128   :  { %v5038_v59 = vpop.f32.mrf.mxu0  ;;  %v5059_v60 = vpop.f32.mrf.mxu1  ;;  %5330 = vmatprep.subr.bf16.mxu0 %v5850_v3  ;;  %v5887_v54 = vld [vmem:[%s7316_s1 + $0xa28] sm:$0xff]   ;;  %v5896_v63 = vld [vmem:[%s7316_s1 + $0xad8] sm:$0xff]   ;;  %v5900_v3 = vld [vmem:[%s7316_s1 + $0xad0] sm:$0xff]  }
 0x129   :  { %v6938_v61 = vadd.f32 %v5058_v57, %v3556_v55  ;;  %5351 = vmatpush3.bf16.msra.mxu1 %v5849_v2  ;;  %v5888_v55 = vld [vmem:[%s7316_s1 + $0xae8] sm:$0xff]   ;;  %v5890_v57 = vld [vmem:[%s7316_s1 + $0xa60] sm:$0xff]   ;;  %v5899_v2 = vld [vmem:[%s7316_s1 + $0xa10] sm:$0xff]  }
 0x12a   :  { %v5060_v0 = vpop.f32.mrf.mxu1  ;;  %5352 = vmatprep.subr.bf16.mxu1 %v5852_v5  ;;  %v5892_v59 = vld [vmem:[%s7316_s1 + $0xae0] sm:$0xff]   ;;  %v5902_v5 = vld [vmem:[%s7316_s1 + $0xa48] sm:$0xff]  }
 0x12b   :  { %5331 = vmatpush3.bf16.msra.mxu0 %v5851_v4  ;;  %v5893_v60 = vld [vmem:[%s7316_s1 + $0xaa0] sm:$0xff]   ;;  %v5897_v0 = vld [vmem:[%s7316_s1 + $0xa98] sm:$0xff]   ;;  %v5901_v4 = vld [vmem:[%s7316_s1 + $0xa90] sm:$0xff]  }
 0x12c   :  { %5332 = vmatprep.subr.bf16.mxu0 %v5854_v7  ;;  %v5904_v7 = vld [vmem:[%s7316_s1 + $0xac8] sm:$0xff]  }
 0x12d   :  { %5353 = vmatpush3.bf16.msra.mxu1 %v5853_v6  ;;  %v5903_v6 = vld [vmem:[%s7316_s1 + $0xa08] sm:$0xff]  }
 0x12e   :  { %5354 = vmatprep.subr.bf16.mxu1 %v5856_v9  ;;  %v5906_v9 = vld [vmem:[%s7316_s1 + $0xa40] sm:$0xff]  }
 0x12f   :  { %5333 = vmatpush3.bf16.msra.mxu0 %v5855_v8  ;;  %v5905_v8 = vld [vmem:[%s7316_s1 + $0xa88] sm:$0xff]  }
 0x130   :  { %5334 = vmatprep.subr.bf16.mxu0 %v5858_v11  ;;  %v5908_v11 = vld [vmem:[%s7316_s1 + $0xac0] sm:$0xff]  }
 0x131   :  { %5355 = vmatpush3.bf16.msra.mxu1 %v5857_v10  ;;  %v5907_v10 = vld [vmem:[%s7316_s1 + $0xa00] sm:$0xff]  }
 0x132   :  { %5356 = vmatprep.subr.bf16.mxu1 %v5860_v13  ;;  %v41_v13 = vld [vmem:[%s7317_s0 + $0xa0] sm:$0xff] }
 0x133   :  { %5335 = vmatpush3.bf16.msra.mxu0 %v5859_v12 }
 0x134   :  { %5336 = vmatprep.subr.bf16.mxu0 %v5862_v15  ;;  %v4521_v15 = vcombine.high %v41_v13, %v41_v13 }
 0x135   :  { %5357 = vmatpush3.bf16.msra.mxu1 %v5861_v14  ;;  %v4520_v14 = vcombine.low %v41_v13, %v41_v13 }
 0x136   :  { %5358 = vmatprep.subr.bf16.mxu1 %v5864_v17 }
 0x137   :  { %5337 = vmatpush3.bf16.msra.mxu0 %v5863_v16  ;;  %v5911_v16 = vld [vmem:[%s7316_s1 + $0xa80] sm:$0xff]  }
 0x138   :  { %5338 = vmatprep.subr.bf16.mxu0 %v5866_v19  ;;  %v42_v19 = vld [vmem:[%s7317_s0 + $0xa8] sm:$0xff] }
 0x139   :  { %5359 = vmatpush3.bf16.msra.mxu1 %v5865_v18  ;;  %v5912_v18 = vld [vmem:[%s7316_s1 + $0xb78] sm:$0xff]  }
 0x13a   :  { %5360 = vmatprep.subr.bf16.mxu1 %v5868_v21 }
 0x13b   :  { %5339 = vmatpush3.bf16.msra.mxu0 %v5867_v20 }
 0x13c   :  { %5340 = vmatprep.subr.bf16.mxu0 %v5870_v23  ;;  %v4523_v23 = vcombine.high %v42_v19, %v42_v19 }
 0x13d   :  { %5361 = vmatpush3.bf16.msra.mxu1 %v5869_v22  ;;  %v4522_v22 = vcombine.low %v42_v19, %v42_v19 }
 0x13e   :  { %5362 = vmatprep.subr.bf16.mxu1 %v5872_v25 }
 0x13f   :  { %5341 = vmatpush3.bf16.msra.mxu0 %v5871_v24  ;;  %v5915_v24 = vld [vmem:[%s7316_s1 + $0xb38] sm:$0xff]  }
 0x140   :  { %5370 = vmatprep.subr.bf16.mxu0 %v5876_v31 }
 0x141   :  { %5363 = vmatpush3.bf16.msra.mxu1 %v5875_v30 }
 0x142   :  { %v5078_v27 = vpop.f32.mrf.mxu0  ;;  %4114 = vmatmul.mubr.bf16.vlgmr.msra.gmra.mxu0 %v4516_v28  ;;  %5392 = vmatprep.subr.bf16.mxu1 %v5880_v39  ;;  %v5922_v39 = vld [vmem:[%s7316_s1 + $0xb68] sm:$0xff]  }
 0x143   :  { %5371 = vmatpush3.bf16.msra.mxu0 %v5879_v37  ;;  %4193 = vmatprep.mubr.bf16.mxu0 %v4521_v15  ;;  %v5951_v15 = vld [vmem:[%s7316_s1 + $0xc30] sm:$0xff]  }
 0x144   :  { %v5079_v33 = vpop.f32.mrf.mxu0  ;;  %v5100_v34 = vpop.f32.mrf.mxu1  ;;  %4154 = vmatmul.mubr.bf16.vlgmr.msra.gmra.mxu1 %v4518_v35  ;;  %5372 = vmatprep.subr.bf16.mxu0 %v5882_v45  ;;  %v5919_v35 = vld [vmem:[%s7316_s1 + $0xb30] sm:$0xff]   ;;  %v5928_v45 = vld [vmem:[%s7316_s1 + $0xbe0] sm:$0xff]  }
 0x145   :  { %v5080_v38 = vadd.f32 %v5079_v33, %v5078_v27  ;;  %5393 = vmatpush3.bf16.msra.mxu1 %v5881_v43  ;;  %v5916_v27 = vld [vmem:[%s7316_s1 + $0xbf8] sm:$0xff]   ;;  %4233 = vmatprep.mubr.bf16.mxu1 %v4523_v23  ;;  %v5926_v43 = vld [vmem:[%s7316_s1 + $0xb60] sm:$0xff]   ;;  %v5955_v23 = vld [vmem:[%s7316_s1 + $0xc10] sm:$0xff]  }
 0x146   :  { %v5081_v40 = vpop.f32.mrf.mxu0  ;;  %v5101_v41 = vpop.f32.mrf.mxu1  ;;  %5394 = vmatprep.subr.bf16.mxu1 %v5884_v50  ;;  %v5933_v50 = vld [vmem:[%s7316_s1 + $0xb98] sm:$0xff]  }
 0x147   :  { %v3636_v42 = vadd.f32 %v5080_v38, %v6938_v61  ;;  %v5102_v44 = vadd.f32 %v5101_v41, %v5100_v34  ;;  %5373 = vmatpush3.bf16.msra.mxu0 %v5883_v49  ;;  %v5894_v61 = vld [vmem:[%s7316_s1 + $0xa58] sm:$0xff]   ;;  %v5921_v38 = vld [vmem:[%s7316_s1 + $0xbb0] sm:$0xff]   ;;  %v5923_v40 = vld [vmem:[%s7316_s1 + $0xb28] sm:$0xff]  }
 0x148   :  { %v5082_v46 = vpop.f32.mrf.mxu0  ;;  %v5103_v47 = vpop.f32.mrf.mxu1  ;;  %5374 = vmatprep.subr.bf16.mxu0 %v5886_v53  ;;  %v5924_v41 = vld [vmem:[%s7316_s1 + $0xbe8] sm:$0xff]   ;;  %v5932_v49 = vld [vmem:[%s7316_s1 + $0xbd8] sm:$0xff]   ;;  %v5936_v53 = vld [vmem:[%s7316_s1 + $0xbd0] sm:$0xff]  }
 0x149   :  { %v7046_v48 = vadd.f32 %v5102_v44, %v3636_v42  ;;  %5395 = vmatpush3.bf16.msra.mxu1 %v5885_v52  ;;  %v5925_v42 = vld [vmem:[%s7316_s1 + $0xba8] sm:$0xff]   ;;  %v5927_v44 = vld [vmem:[%s7316_s1 + $0xb20] sm:$0xff]   ;;  %v5930_v47 = vld [vmem:[%s7316_s1 + $0xb58] sm:$0xff]  }
 0x14a   :  { %v5104_v51 = vpop.f32.mrf.mxu1  ;;  %5396 = vmatprep.subr.bf16.mxu1 %v5888_v55  ;;  %v5929_v46 = vld [vmem:[%s7316_s1 + $0xba0] sm:$0xff]   ;;  %v5935_v52 = vld [vmem:[%s7316_s1 + $0xb10] sm:$0xff]   ;;  %v5938_v55 = vld [vmem:[%s7316_s1 + $0xb48] sm:$0xff]  }
 0x14b   :  { %5375 = vmatpush3.bf16.msra.mxu0 %v5887_v54  ;;  %v5934_v51 = vld [vmem:[%s7316_s1 + $0xb50] sm:$0xff]  }
 0x14c   :  { %5376 = vmatprep.subr.bf16.mxu0 %v5890_v57  ;;  %v5937_v54 = vld [vmem:[%s7316_s1 + $0xb90] sm:$0xff]   ;;  %v5940_v57 = vld [vmem:[%s7316_s1 + $0xbc8] sm:$0xff]  }
 0x14d   :  { %5397 = vmatpush3.bf16.msra.mxu1 %v5889_v56  ;;  %v5939_v56 = vld [vmem:[%s7316_s1 + $0xb08] sm:$0xff]  }
 0x14e   :  { %5398 = vmatprep.subr.bf16.mxu1 %v5892_v59  ;;  %v5942_v59 = vld [vmem:[%s7316_s1 + $0xb40] sm:$0xff]  }
 0x14f   :  { %5377 = vmatpush3.bf16.msra.mxu0 %v5891_v58  ;;  %v5941_v58 = vld [vmem:[%s7316_s1 + $0xb88] sm:$0xff]  }
 0x150   :  { %5378 = vmatprep.subr.bf16.mxu0 %v5894_v61  ;;  %v5944_v61 = vld [vmem:[%s7316_s1 + $0xbc0] sm:$0xff]  }
 0x151   :  { %5399 = vmatpush3.bf16.msra.mxu1 %v5893_v60  ;;  %v5943_v60 = vld [vmem:[%s7316_s1 + $0xb00] sm:$0xff]  }
 0x152   :  { %5400 = vmatprep.subr.bf16.mxu1 %v5896_v63 }
 0x153   :  { %5379 = vmatpush3.bf16.msra.mxu0 %v5895_v62  ;;  %v43_v62 = vld [vmem:[%s7317_s0 + $0xb0] sm:$0xff] }
 0x154   :  { %5380 = vmatprep.subr.bf16.mxu0 %v5898_v1  ;;  %v4525_v1 = vcombine.high %v43_v62, %v43_v62 }
 0x155   :  { %5401 = vmatpush3.bf16.msra.mxu1 %v5897_v0  ;;  %v4524_v0 = vcombine.low %v43_v62, %v43_v62 }
 0x156   :  { %5402 = vmatprep.subr.bf16.mxu1 %v5900_v3  ;;  %v5967_v3 = vmov 0.0  }
 0x157   :  { %5381 = vmatpush3.bf16.msra.mxu0 %v5899_v2  ;;  %v5947_v2 = vld [vmem:[%s7316_s1 + $0xb80] sm:$0xff]  }
 0x158   :  { %5382 = vmatprep.subr.bf16.mxu0 %v5902_v5 }
 0x159   :  { %5403 = vmatpush3.bf16.msra.mxu1 %v5901_v4  ;;  %v44_v4 = vld [vmem:[%s7317_s0 + $0xb8] sm:$0xff] }
 0x15a   :  { %5404 = vmatprep.subr.bf16.mxu1 %v5904_v7  ;;  %v4526_v7 = vcombine.low %v44_v4, %v44_v4 }
 0x15b   :  { %5383 = vmatpush3.bf16.msra.mxu0 %v5903_v6 }
 0x15c   :  { %5384 = vmatprep.subr.bf16.mxu0 %v5906_v9  ;;  %v5950_v9 = vld [vmem:[%s7316_s1 + $0xc38] sm:$0xff]  }
 0x15d   :  { %5405 = vmatpush3.bf16.msra.mxu1 %v5905_v8  ;;  %v4527_v8 = vcombine.high %v44_v4, %v44_v4 }
 0x15e   :  { %5406 = vmatprep.subr.bf16.mxu1 %v5908_v11 }
 0x15f   :  { %5385 = vmatpush3.bf16.msra.mxu0 %v5907_v10 }
 0x160   :  { %5414 = vmatprep.subr.bf16.mxu0 %v5912_v18 }
 0x161   :  { %5407 = vmatpush3.bf16.msra.mxu1 %v5911_v16 }
 0x162   :  { %v5122_v12 = vpop.f32.mrf.mxu0  ;;  %4194 = vmatmul.mubr.bf16.vlgmr.msra.gmra.mxu0 %v4520_v14  ;;  %5436 = vmatprep.subr.bf16.mxu1 %v5916_v27 }
 0x163   :  { %5415 = vmatpush3.bf16.msra.mxu0 %v5915_v24  ;;  %4273 = vmatprep.mubr.bf16.mxu0 %v4525_v1  ;;  %v5956_v24 = vld [vmem:[%s7316_s1 + $0xc08] sm:$0xff]  }
 0x164   :  { %v5123_v17 = vpop.f32.mrf.mxu0  ;;  %v5144_v21 = vpop.f32.mrf.mxu1  ;;  %4234 = vmatmul.mubr.bf16.vlgmr.msra.gmra.mxu1 %v4522_v22  ;;  %5416 = vmatprep.subr.bf16.mxu0 %v5918_v32  ;;  %v5954_v22 = vld [vmem:[%s7316_s1 + $0xc18] sm:$0xff]  }
 0x165   :  { %v5124_v20 = vadd.f32 %v5123_v17, %v5122_v12  ;;  %5437 = vmatpush3.bf16.msra.mxu1 %v5917_v29  ;;  %4313 = vmatprep.mubr.bf16.mxu1 %v4527_v8 }
 0x166   :  { %v5125_v25 = vpop.f32.mrf.mxu0  ;;  %v5145_v28 = vpop.f32.mrf.mxu1  ;;  %5438 = vmatprep.subr.bf16.mxu1 %v5920_v36 }
 0x167   :  { %v3716_v26 = vadd.f32 %v5124_v20, %v7046_v48  ;;  %v5146_v30 = vadd.f32 %v5145_v28, %v5144_v21  ;;  %5417 = vmatpush3.bf16.msra.mxu0 %v5919_v35  ;;  %v5931_v48 = vld [vmem:[%s7316_s1 + $0xb18] sm:$0xff]   ;;  %v5952_v20 = vld [vmem:[%s7316_s1 + $0xc28] sm:$0xff]   ;;  %v5953_v21 = vld [vmem:[%s7316_s1 + $0xc20] sm:$0xff]  }
 0x168   :  { %v5126_v31 = vpop.f32.mrf.mxu0  ;;  %v5147_v33 = vpop.f32.mrf.mxu1  ;;  %5418 = vmatprep.subr.bf16.mxu0 %v5922_v39  ;;  %v5957_v25 = vld [vmem:[%s7316_s1 + $0xc00] sm:$0xff]  }
 0x169   :  { %v7151_v34 = vadd.f32 %v5146_v30, %v3716_v26  ;;  %5439 = vmatpush3.bf16.msra.mxu1 %v5921_v38  ;;  %v5958_v26 = vld [vmem:[%s7317_s0 + $0xc0] ss:$0 sps:$4 sm:$0xff]  }
 0x16a   :  { %v5148_v37 = vpop.f32.mrf.mxu1  ;;  %5440 = vmatprep.subr.bf16.mxu1 %v5924_v41 }
 0x16b   :  { %5419 = vmatpush3.bf16.msra.mxu0 %v5923_v40 }
 0x16c   :  { %5420 = vmatprep.subr.bf16.mxu0 %v5926_v43 }
 0x16d   :  { %5441 = vmatpush3.bf16.msra.mxu1 %v5925_v42 }
 0x16e   :  { %5442 = vmatprep.subr.bf16.mxu1 %v5928_v45 }
 0x16f   :  { %5421 = vmatpush3.bf16.msra.mxu0 %v5927_v44 }
 0x170   :  { %5422 = vmatprep.subr.bf16.mxu0 %v5930_v47 }
 0x171   :  { %5443 = vmatpush3.bf16.msra.mxu1 %v5929_v46 }
 0x172   :  { %5444 = vmatprep.subr.bf16.mxu1 %v5932_v49 }
 0x173   :  { %5423 = vmatpush3.bf16.msra.mxu0 %v5931_v48 }
 0x174   :  { %5424 = vmatprep.subr.bf16.mxu0 %v5934_v51  ;;  %v5959_v51 = vld [vmem:[%s7319_s3 + $0x38] sm:$0xff]  }
 0x175   :  { %5445 = vmatpush3.bf16.msra.mxu1 %v5933_v50 }
 0x176   :  { %5446 = vmatprep.subr.bf16.mxu1 %v5936_v53  ;;  %v5961_v53 = vld [vmem:[%s7319_s3 + $0x28] sm:$0xff]  }
 0x177   :  { %5425 = vmatpush3.bf16.msra.mxu0 %v5935_v52  ;;  %v5960_v52 = vld [vmem:[%s7319_s3 + $0x30] sm:$0xff]  }
 0x178   :  { %5426 = vmatprep.subr.bf16.mxu0 %v5938_v55  ;;  %v5963_v55 = vld [vmem:[%s7319_s3 + $0x18] sm:$0xff]  }
 0x179   :  { %5447 = vmatpush3.bf16.msra.mxu1 %v5937_v54  ;;  %v5962_v54 = vld [vmem:[%s7319_s3 + $0x20] sm:$0xff]  }
 0x17a   :  { %5448 = vmatprep.subr.bf16.mxu1 %v5940_v57 }
 0x17b   :  { %5427 = vmatpush3.bf16.msra.mxu0 %v5939_v56  ;;  %v5964_v56 = vld [vmem:[%s7319_s3 + $0x10] sm:$0xff]  }
 0x17c   :  { %5428 = vmatprep.subr.bf16.mxu0 %v5942_v59 }
 0x17d   :  { %5449 = vmatpush3.bf16.msra.mxu1 %v5941_v58  ;;  %v5965_v58 = vld [vmem:[%s7319_s3 + $0x8] sm:$0xff]  }
 0x17e   :  { %5450 = vmatprep.subr.bf16.mxu1 %v5944_v61 }
 0x17f   :  { %5429 = vmatpush3.bf16.msra.mxu0 %v5943_v60 }
 0x180   :  { %5476 = vmatprep.subr.bf16.mxu0 %v5967_v3 }
 0x181   :  { %5451 = vmatpush3.bf16.msra.mxu1 %v5947_v2 }
 0x182   :  { %v5166_v63 = vpop.f32.mrf.mxu0  ;;  %4274 = vmatmul.mubr.bf16.vlgmr.msra.gmra.mxu0 %v4524_v0  ;;  %5496 = vmatprep.subr.bf16.mxu1 %v5967_v3 }
 0x183   :  { %5477 = vmatpush3.bf16.msra.mxu0 %v5950_v9  ;;  %5492 = vmatprep.mubr.msk.bf16.mxu0 %vm5968_vm0, %v5967_v3 }
 0x184   :  { %v5167_v5 = vpop.f32.mrf.mxu0  ;;  %v5188_v6 = vpop.f32.mrf.mxu1  ;;  %4314 = vmatmul.mubr.bf16.vlgmr.msra.gmra.mxu1 %v4526_v7  ;;  %5478 = vmatprep.subr.bf16.mxu0 %v5967_v3 }
 0x185   :  { %v5168_v10 = vadd.f32 %v5167_v5, %v5166_v63  ;;  %5512 = vmatprep.mubr.msk.bf16.mxu1 %vm5968_vm0, %v5967_v3  ;;  %5497 = vmatpush3.bf16.msra.mxu1 %v5959_v51  ;;  %v5966_v63 = vld [vmem:[%s7319_s3] sm:$0xff]  }
 0x186   :  { %v5169_v11 = vpop.f32.mrf.mxu0  ;;  %v5189_v12 = vpop.f32.mrf.mxu1  ;;  %5498 = vmatprep.subr.bf16.mxu1 %v5967_v3 }
 0x187   :  { %v3796_v13 = vadd.f32 %v5168_v10, %v7151_v34  ;;  %v5190_v14 = vadd.f32 %v5189_v12, %v5188_v6  ;;  %5479 = vmatpush3.bf16.msra.mxu0 %v5951_v15 }
 0x188   :  { %v5170_v16 = vpop.f32.mrf.mxu0  ;;  %v5191_v17 = vpop.f32.mrf.mxu1  ;;  %5480 = vmatprep.subr.bf16.mxu0 %v5967_v3 }
 0x189   :  { %v3836_v18 = vadd.f32 %v5190_v14, %v3796_v13  ;;  %5499 = vmatpush3.bf16.msra.mxu1 %v5960_v52 }
 0x18a   :  { %v5192_v19 = vpop.f32.mrf.mxu1  ;;  %5500 = vmatprep.subr.bf16.mxu1 %v5967_v3 }
 0x18b   :  { %5481 = vmatpush3.bf16.msra.mxu0 %v5952_v20 }
 0x18c   :  { %5482 = vmatprep.subr.bf16.mxu0 %v5967_v3 }
 0x18d   :  { %5501 = vmatpush3.bf16.msra.mxu1 %v5961_v53 }
 0x18e   :  { %5502 = vmatprep.subr.bf16.mxu1 %v5967_v3 }
 0x18f   :  { %5483 = vmatpush3.bf16.msra.mxu0 %v5953_v21 }
 0x190   :  { %5484 = vmatprep.subr.bf16.mxu0 %v5967_v3 }
 0x191   :  { %5503 = vmatpush3.bf16.msra.mxu1 %v5962_v54 }
 0x192   :  { %5504 = vmatprep.subr.bf16.mxu1 %v5967_v3 }
 0x193   :  { %5485 = vmatpush3.bf16.msra.mxu0 %v5954_v22 }
 0x194   :  { %5486 = vmatprep.subr.bf16.mxu0 %v5967_v3 }
 0x195   :  { %5505 = vmatpush3.bf16.msra.mxu1 %v5963_v55 }
 0x196   :  { %5506 = vmatprep.subr.bf16.mxu1 %v5967_v3 }
 0x197   :  { %5487 = vmatpush3.bf16.msra.mxu0 %v5955_v23 }
 0x198   :  { %5488 = vmatprep.subr.bf16.mxu0 %v5967_v3 }
 0x199   :  { %5507 = vmatpush3.bf16.msra.mxu1 %v5964_v56 }
 0x19a   :  { %5508 = vmatprep.subr.bf16.mxu1 %v5967_v3 }
 0x19b   :  { %5489 = vmatpush3.bf16.msra.mxu0 %v5956_v24 }
 0x19c   :  { %5490 = vmatprep.subr.bf16.mxu0 %v5967_v3 }
 0x19d   :  { %5509 = vmatpush3.bf16.msra.mxu1 %v5965_v58 }
 0x19e   :  { %5510 = vmatprep.subr.bf16.mxu1 %v5967_v3 }
 0x19f   :  { %5491 = vmatpush3.bf16.msra.mxu0 %v5957_v25 }
 0x1a1   :  { %5511 = vmatpush3.bf16.msra.mxu1 %v5966_v63 }
 0x1a2   :  { %v5210_v27 = vpop.f32.mrf.mxu0  ;;  %5493 = vmatmul.mubr.bf16.vlgmr.msra.gmra.mxu0 %v5958_v26 }
 0x1a4   :  { %v5211_v28 = vpop.f32.mrf.mxu0  ;;  %v5232_v29 = vpop.f32.mrf.mxu1 }
 0x1a5   :  { %v5212_v30 = vadd.f32 %v5211_v28, %v5210_v27 }
 0x1a6   :  { %v5213_v31 = vpop.f32.mrf.mxu0  ;;  %v5233_v32 = vpop.f32.mrf.mxu1 }
 0x1a7   :  { %v3876_v33 = vadd.f32 %v5212_v30, %v3836_v18  ;;  %v5234_v34 = vadd.f32 %v5233_v32, %v5232_v29 }
 0x1a8   :  { %v5214_v35 = vpop.f32.mrf.mxu0  ;;  %v5235_v36 = vpop.f32.mrf.mxu1 }
 0x1a9   :  { %v3916_v37 = vadd.f32 %v5234_v34, %v3876_v33 }
 0x1aa   :  { %v5236_v38 = vpop.f32.mrf.mxu1 }
 0x1c2   :  { %v5254_v39 = vpop.f32.mrf.mxu0 }
 0x1c4   :  { %v5255_v40 = vpop.f32.mrf.mxu0  ;;  %v5276_v41 = vpop.f32.mrf.mxu1 }
 0x1c5   :  { %v5256_v42 = vadd.f32 %v5255_v40, %v5254_v39 }
 0x1c6   :  { %v5257_v43 = vpop.f32.mrf.mxu0  ;;  %v5277_v44 = vpop.f32.mrf.mxu1 }
 0x1c7   :  { %v3956_v45 = vadd.f32 %v5256_v42, %v3916_v37  ;;  %v5278_v46 = vadd.f32 %v5277_v44, %v5276_v41 }
 0x1c8   :  { %v5258_v47 = vpop.f32.mrf.mxu0  ;;  %v5279_v48 = vpop.f32.mrf.mxu1 }
 0x1c9   :  { %v3996_v49 = vadd.f32 %v5278_v46, %v3956_v45 }
 0x1ca   :  { %v5280_v50 = vpop.f32.mrf.mxu1 }
 0x1cb   :  { %v4921_v50 = vld [vmem:[%s7320_s4] ss:$0 sm:$0xff] }
 0x1e2   :  { %v5298_v57 = vpop.f32.mrf.mxu0 }
 0x1e4   :  { %v5299_v59 = vpop.f32.mrf.mxu0  ;;  %v5320_v61 = vpop.f32.mrf.mxu1 }
 0x1e5   :  { %v5300_v60 = vadd.f32 %v5299_v59, %v5298_v57 }
 0x1e6   :  { %v5301_v62 = vpop.f32.mrf.mxu0  ;;  %v5321_v1 = vpop.f32.mrf.mxu1 }
 0x1e7   :  { %v4036_v0 = vadd.f32 %v5300_v60, %v3996_v49  ;;  %v5322_v2 = vadd.f32 %v5321_v1, %v5320_v61 }
 0x1e8   :  { %v5302_v4 = vpop.f32.mrf.mxu0  ;;  %v5323_v5 = vpop.f32.mrf.mxu1 }
 0x1e9   :  { %v4076_v6 = vadd.f32 %v5322_v2, %v4036_v0 }
 0x1ea   :  { %v5324_v7 = vpop.f32.mrf.mxu1 }
 0x202   :  { %v5342_v8 = vpop.f32.mrf.mxu0 }
 0x204   :  { %v5343_v9 = vpop.f32.mrf.mxu0  ;;  %v5364_v10 = vpop.f32.mrf.mxu1 }
 0x205   :  { %v5344_v11 = vadd.f32 %v5343_v9, %v5342_v8 }
 0x206   :  { %v5345_v12 = vpop.f32.mrf.mxu0  ;;  %v5365_v13 = vpop.f32.mrf.mxu1 }
 0x207   :  { %v4116_v3 = vadd.f32 %v5344_v11, %v4076_v6  ;;  %v5366_v14 = vadd.f32 %v5365_v13, %v5364_v10 }
 0x208   :  { %v5346_v15 = vpop.f32.mrf.mxu0  ;;  %v5367_v16 = vpop.f32.mrf.mxu1 }
 0x209   :  { %v4156_v17 = vadd.f32 %v5366_v14, %v4116_v3 }
 0x20a   :  { %v5368_v18 = vpop.f32.mrf.mxu1 }
 0x222   :  { %v5386_v19 = vpop.f32.mrf.mxu0 }
 0x224   :  { %v5387_v20 = vpop.f32.mrf.mxu0  ;;  %v5408_v21 = vpop.f32.mrf.mxu1 }
 0x225   :  { %v5388_v35 = vadd.f32 %v5387_v20, %v5386_v19 }
 0x226   :  { %v5389_v22 = vpop.f32.mrf.mxu0  ;;  %v5409_v23 = vpop.f32.mrf.mxu1 }
 0x227   :  { %v4196_v36 = vadd.f32 %v5388_v35, %v4156_v17  ;;  %v5410_v37 = vadd.f32 %v5409_v23, %v5408_v21 }
 0x228   :  { %v5390_v24 = vpop.f32.mrf.mxu0  ;;  %v5411_v25 = vpop.f32.mrf.mxu1 }
 0x229   :  { %v4236_v39 = vadd.f32 %v5410_v37, %v4196_v36 }
 0x22a   :  { %v5412_v26 = vpop.f32.mrf.mxu1 }
 0x242   :  { %v5430_v27 = vpop.f32.mrf.mxu0 }
 0x244   :  { %v5431_v28 = vpop.f32.mrf.mxu0  ;;  %v5452_v29 = vpop.f32.mrf.mxu1 }
 0x245   :  { %v5432_v38 = vadd.f32 %v5431_v28, %v5430_v27 }
 0x246   :  { %v5433_v30 = vpop.f32.mrf.mxu0  ;;  %v5453_v31 = vpop.f32.mrf.mxu1 }
 0x247   :  { %v4276_v40 = vadd.f32 %v5432_v38, %v4236_v39  ;;  %v5454_v41 = vadd.f32 %v5453_v31, %v5452_v29 }
 0x248   :  { %v5434_v32 = vpop.f32.mrf.mxu0  ;;  %v5455_v33 = vpop.f32.mrf.mxu1 }
 0x249   :  { %v4316_v42 = vadd.f32 %v5454_v41, %v4276_v40 }
 0x24a   :  { %v5456_v34 = vpop.f32.mrf.mxu1 }
 0x262   :  { %v4355_v43 = vpop.f32.mrf.mxu0 }
 0x263   :  { %v4356_v44 = vadd.f32 %v4355_v43, %v4316_v42 }
 0x264   :  { %v5494_v45 = vpop.f32.mrf.mxu0 }
 0x265   :  { %v4361_v46 = vmax.f32 %v4356_v44, 0.0 }
 0x266   :  { %v4358_v47 = vpop.f32.mrf.mxu0 }
 0x267   :  { %v4362_v48 = vpack.c.bf16 %v4361_v46, %v4361_v46 }
 0x268   :  { %v5495_v49 = vpop.f32.mrf.mxu0 }
 0x269   :  { %5513 = vmatmul.mubr.bf16.vlgmr.msra.gmra.mxu1 %v4362_v48 }
 0x329   :  { %v4468_v51 = vpop.f32.mrf.mxu1 }
 0x32a   :  { %v4469_v52 = vadd.f32 %v4921_v50, %v4468_v51 }
 0x32b   :  { %v5514_v53 = vpop.f32.mrf.mxu1 }
 0x32c   :  { %4474 = vst [vmem:[%s7321_s5] sm:$0xff] %v4469_v52 }
 0x32d   :  { %v4471_v54 = vpop.f32.mrf.mxu1 }
 0x32f   :  { %v5515_v55 = vpop.f32.mrf.mxu1 }

</bundles_post_ra>
